<compile_context>
chip_gen: v7x
topology: tpu7x:2x2x1
jax: 0.10.0
libtpu: 0.0.40
codegen_flags: <defaults>
</compile_context>

<pallas_src>
import jax
import jax.numpy as jnp
from jax.experimental import pallas as pl
from jax.experimental.pallas import tpu as pltpu

HIDDEN = 128          # lstm_size == embedding_dim == 128 (from the module)
NUM_LAYERS = 2
N_VOCAB = 256         # synthetic vocab (words.txt is not read in this script)


# ----------------------------------------------------------------------------
# Single fused kernel: 2-layer LSTM recurrence + final Linear, all VMEM-resident.
# ----------------------------------------------------------------------------
def _make_model_kernel(T, B):
    H = HIDDEN

    def kernel(x_ref, h0_ref, c0_ref, wih_ref, whh_ref, b_ref,
               wfc_ref, bfc_ref, logits_ref, hT_ref, cT_ref, hseq_ref):
        layer_in = x_ref[...]                                   # (T*B, H) f32

        for l in range(NUM_LAYERS):
            # Hoisted input projection + bias over the whole sequence
            # (one MXU matmul per layer instead of one per timestep).
            gates_in = (jnp.dot(layer_in.astype(jnp.bfloat16), wih_ref[l],
                                preferred_element_type=jnp.float32)
                        + b_ref[l])                             # (T*B, 4H) f32

            h = h0_ref[l]                                       # (B, H) f32
            c = c0_ref[l]                                       # (B, H) f32

            for t in range(T):                                  # serial recurrence
                g = gates_in[t * B:(t + 1) * B, :] + jnp.dot(
                    h.astype(jnp.bfloat16), whh_ref[l],
                    preferred_element_type=jnp.float32)         # (B, 4H)

                i_g = jax.nn.sigmoid(g[:, 0 * H:1 * H])
                f_g = jax.nn.sigmoid(g[:, 1 * H:2 * H])
                g_g = jnp.tanh(g[:, 2 * H:3 * H])
                o_g = jax.nn.sigmoid(g[:, 3 * H:4 * H])

                c = f_g * c + i_g * g_g
                h = o_g * jnp.tanh(c)

                hseq_ref[t * B:(t + 1) * B, :] = h              # layer output seq

            hT_ref[l] = h                                       # written once
            cT_ref[l] = c

            layer_in = hseq_ref[...]                            # feed next layer
            # TODO(synk): nn.LSTM inter-layer dropout(p=0.2) is train-only;
            # identity at inference.

        # Fused final Linear: logits = h_seq @ W_fc^T + b_fc
        logits_ref[...] = (jnp.dot(layer_in.astype(jnp.bfloat16), wfc_ref[...],
                                   preferred_element_type=jnp.float32)
                           + bfc_ref[...])

    return kernel


def model_apply(embed_flat, h0, c0, w_ih_t, w_hh_t, b, w_fc_t, b_fc, *, T, B):
    return pl.pallas_call(
        _make_model_kernel(T, B),
        out_shape=(jax.ShapeDtypeStruct((T * B, N_VOCAB), jnp.float32),
                   jax.ShapeDtypeStruct((NUM_LAYERS, B, HIDDEN), jnp.float32),
                   jax.ShapeDtypeStruct((NUM_LAYERS, B, HIDDEN), jnp.float32)),
        scratch_shapes=[pltpu.VMEM((T * B, HIDDEN), jnp.float32)],
    )(embed_flat, h0, c0, w_ih_t, w_hh_t, b, w_fc_t, b_fc)


# ----------------------------------------------------------------------------
# Parameters (deterministic, in-script). Weights bf16, biases/embedding f32.
# ----------------------------------------------------------------------------
def init_params(key):
    ks = jax.random.split(key, 6)
    scale = 1.0 / jnp.sqrt(HIDDEN)

    def u(k, shape):
        return jax.random.uniform(k, shape, jnp.float32, -scale, scale)

    return {
        "embedding": jax.random.normal(ks[0], (N_VOCAB, HIDDEN), jnp.float32),
        "w_ih_t": u(ks[1], (NUM_LAYERS, HIDDEN, 4 * HIDDEN)).astype(jnp.bfloat16),
        "w_hh_t": u(ks[2], (NUM_LAYERS, HIDDEN, 4 * HIDDEN)).astype(jnp.bfloat16),
        "b":      u(ks[3], (NUM_LAYERS, 1, 4 * HIDDEN)),   # b_ih + b_hh combined
        "w_fc_t": u(ks[4], (HIDDEN, N_VOCAB)).astype(jnp.bfloat16),
        "b_fc":   u(ks[5], (1, N_VOCAB)),
    }


# ----------------------------------------------------------------------------
# Full forward: logits, (h, c)
# ----------------------------------------------------------------------------
def model_forward(params, x_ids, prev_state):
    T, B = x_ids.shape
    h0, c0 = prev_state                          # each (NUM_LAYERS, B, HIDDEN)

    # Embedding lookup (gather) — plain-JAX glue, not a matmul hot path.
    embed_flat = jnp.take(params["embedding"], x_ids.reshape(-1), axis=0)

    logits_flat, hT, cT = model_apply(
        embed_flat, h0, c0,
        params["w_ih_t"], params["w_hh_t"], params["b"],
        params["w_fc_t"], params["b_fc"], T=T, B=B)

    return logits_flat.reshape(T, B, N_VOCAB), (hT, cT)


if __name__ == "__main__":
    key = jax.random.PRNGKey(0)
    k_param, k_x = jax.random.split(key)

    T, B = 8, 2                                  # seq_len=8, batch=2
    params = init_params(k_param)
    x_ids = jax.random.randint(k_x, (T, B), 0, N_VOCAB, dtype=jnp.int32)
    prev_state = (jnp.zeros((NUM_LAYERS, B, HIDDEN), jnp.float32),
                  jnp.zeros((NUM_LAYERS, B, HIDDEN), jnp.float32))

    logits, (h, c) = jax.jit(model_forward)(params, x_ids, prev_state)
    jax.block_until_ready((logits, h, c))

    assert logits.shape == (T, B, N_VOCAB)
    assert h.shape == (NUM_LAYERS, B, HIDDEN) and c.shape == (NUM_LAYERS, B, HIDDEN)
    print("KERNEL_OK")
</pallas_src>

<mosaic_0001>
module attributes {stable_mosaic.version = 11 : i64} {
  func.func @kernel(%arg0: memref<16x128xf32, #tpu.memory_space<vmem>>, %arg1: memref<2x2x128xf32, #tpu.memory_space<vmem>>, %arg2: memref<2x2x128xf32, #tpu.memory_space<vmem>>, %arg3: memref<2x128x512xbf16, #tpu.memory_space<vmem>>, %arg4: memref<2x128x512xbf16, #tpu.memory_space<vmem>>, %arg5: memref<2x1x512xf32, #tpu.memory_space<vmem>>, %arg6: memref<128x256xbf16, #tpu.memory_space<vmem>>, %arg7: memref<1x256xf32, #tpu.memory_space<vmem>>, %arg8: memref<16x256xf32, #tpu.memory_space<vmem>>, %arg9: memref<2x2x128xf32, #tpu.memory_space<vmem>>, %arg10: memref<2x2x128xf32, #tpu.memory_space<vmem>>, %arg11: memref<16x128xf32, #tpu.memory_space<vmem>>) attributes {dimension_semantics = [], scalar_prefetch = 0 : i64, scratch_operands = 1 : i64, tpu.core_type = #tpu.core_type<tc>} {
    %c0 = arith.constant 0 : index
    %c0_0 = arith.constant 0 : index
    %0 = vector.load %arg0[%c0, %c0_0] : memref<16x128xf32, #tpu.memory_space<vmem>>, vector<16x128xf32>
    %1 = arith.truncf %0 : vector<16x128xf32> to vector<16x128xbf16>
    %c0_1 = arith.constant 0 : index
    %c0_2 = arith.constant 0 : index
    %c0_3 = arith.constant 0 : index
    %2 = vector.load %arg3[%c0_1, %c0_2, %c0_3] : memref<2x128x512xbf16, #tpu.memory_space<vmem>>, vector<1x128x512xbf16>
    %3 = vector.shape_cast %2 : vector<1x128x512xbf16> to vector<128x512xbf16>
    %cst = arith.constant dense<0.000000e+00> : vector<16x512xf32>
    %4 = tpu.matmul %1, %3, %cst {dimension_numbers = #tpu.dot_dimension_numbers<[1], [0], [0], [1], [0, 0, 1, 1], [], []>} : vector<16x128xbf16>, vector<128x512xbf16>, vector<16x512xf32> -> vector<16x512xf32>
    %c0_4 = arith.constant 0 : index
    %c0_5 = arith.constant 0 : index
    %c0_6 = arith.constant 0 : index
    %5 = vector.load %arg5[%c0_4, %c0_5, %c0_6] : memref<2x1x512xf32, #tpu.memory_space<vmem>>, vector<1x1x512xf32>
    %6 = vector.shape_cast %5 : vector<1x1x512xf32> to vector<1x512xf32>
    %7 = vector.broadcast %6 : vector<1x512xf32> to vector<16x512xf32>
    %8 = arith.addf %4, %7 : vector<16x512xf32>
    %c0_7 = arith.constant 0 : index
    %c0_8 = arith.constant 0 : index
    %c0_9 = arith.constant 0 : index
    %9 = vector.load %arg1[%c0_7, %c0_8, %c0_9] : memref<2x2x128xf32, #tpu.memory_space<vmem>>, vector<1x2x128xf32>
    %10 = vector.shape_cast %9 : vector<1x2x128xf32> to vector<2x128xf32>
    %c0_10 = arith.constant 0 : index
    %c0_11 = arith.constant 0 : index
    %c0_12 = arith.constant 0 : index
    %11 = vector.load %arg2[%c0_10, %c0_11, %c0_12] : memref<2x2x128xf32, #tpu.memory_space<vmem>>, vector<1x2x128xf32>
    %12 = vector.shape_cast %11 : vector<1x2x128xf32> to vector<2x128xf32>
    %13 = vector.extract_strided_slice %8 {offsets = [0, 0], sizes = [2, 512], strides = [1, 1]} : vector<16x512xf32> to vector<2x512xf32>
    %14 = arith.truncf %10 : vector<2x128xf32> to vector<2x128xbf16>
    %c0_13 = arith.constant 0 : index
    %c0_14 = arith.constant 0 : index
    %c0_15 = arith.constant 0 : index
    %15 = vector.load %arg4[%c0_13, %c0_14, %c0_15] : memref<2x128x512xbf16, #tpu.memory_space<vmem>>, vector<1x128x512xbf16>
    %16 = vector.shape_cast %15 : vector<1x128x512xbf16> to vector<128x512xbf16>
    %cst_16 = arith.constant dense<0.000000e+00> : vector<2x512xf32>
    %17 = tpu.matmul %14, %16, %cst_16 {dimension_numbers = #tpu.dot_dimension_numbers<[1], [0], [0], [1], [0, 0, 1, 1], [], []>} : vector<2x128xbf16>, vector<128x512xbf16>, vector<2x512xf32> -> vector<2x512xf32>
    %18 = arith.addf %13, %17 : vector<2x512xf32>
    %19 = vector.extract_strided_slice %18 {offsets = [0, 0], sizes = [2, 128], strides = [1, 1]} : vector<2x512xf32> to vector<2x128xf32>
    %20 = arith.negf %19 : vector<2x128xf32>
    %21 = math.exp %20 : vector<2x128xf32>
    %cst_17 = arith.constant 1.000000e+00 : f32
    %22 = vector.broadcast %cst_17 : f32 to vector<2x128xf32>
    %23 = arith.addf %22, %21 : vector<2x128xf32>
    %24 = arith.divf %22, %23 : vector<2x128xf32>
    %25 = vector.extract_strided_slice %18 {offsets = [0, 128], sizes = [2, 128], strides = [1, 1]} : vector<2x512xf32> to vector<2x128xf32>
    %26 = arith.negf %25 : vector<2x128xf32>
    %27 = math.exp %26 : vector<2x128xf32>
    %cst_18 = arith.constant 1.000000e+00 : f32
    %28 = vector.broadcast %cst_18 : f32 to vector<2x128xf32>
    %29 = arith.addf %28, %27 : vector<2x128xf32>
    %30 = arith.divf %28, %29 : vector<2x128xf32>
    %31 = vector.extract_strided_slice %18 {offsets = [0, 256], sizes = [2, 128], strides = [1, 1]} : vector<2x512xf32> to vector<2x128xf32>
    %32 = math.tanh %31 : vector<2x128xf32>
    %33 = vector.extract_strided_slice %18 {offsets = [0, 384], sizes = [2, 128], strides = [1, 1]} : vector<2x512xf32> to vector<2x128xf32>
    %34 = arith.negf %33 : vector<2x128xf32>
    %35 = math.exp %34 : vector<2x128xf32>
    %cst_19 = arith.constant 1.000000e+00 : f32
    %36 = vector.broadcast %cst_19 : f32 to vector<2x128xf32>
    %37 = arith.addf %36, %35 : vector<2x128xf32>
    %38 = arith.divf %36, %37 : vector<2x128xf32>
    %39 = arith.mulf %30, %12 : vector<2x128xf32>
    %40 = arith.mulf %24, %32 : vector<2x128xf32>
    %41 = arith.addf %39, %40 : vector<2x128xf32>
    %42 = math.tanh %41 : vector<2x128xf32>
    %43 = arith.mulf %38, %42 : vector<2x128xf32>
    %c0_20 = arith.constant 0 : index
    %c0_21 = arith.constant 0 : index
    %44 = vector.load %arg11[%c0_20, %c0_21] : memref<16x128xf32, #tpu.memory_space<vmem>>, vector<2x128xf32>
    tpu.vector_store %arg11[%c0_20, %c0_21], %43 {strides = array<i32>} : memref<16x128xf32, #tpu.memory_space<vmem>>, vector<2x128xf32>,
    %45 = vector.extract_strided_slice %8 {offsets = [2, 0], sizes = [2, 512], strides = [1, 1]} : vector<16x512xf32> to vector<2x512xf32>
    %46 = arith.truncf %43 : vector<2x128xf32> to vector<2x128xbf16>
    %c0_22 = arith.constant 0 : index
    %c0_23 = arith.constant 0 : index
    %c0_24 = arith.constant 0 : index
    %47 = vector.load %arg4[%c0_22, %c0_23, %c0_24] : memref<2x128x512xbf16, #tpu.memory_space<vmem>>, vector<1x128x512xbf16>
    %48 = vector.shape_cast %47 : vector<1x128x512xbf16> to vector<128x512xbf16>
    %cst_25 = arith.constant dense<0.000000e+00> : vector<2x512xf32>
    %49 = tpu.matmul %46, %48, %cst_25 {dimension_numbers = #tpu.dot_dimension_numbers<[1], [0], [0], [1], [0, 0, 1, 1], [], []>} : vector<2x128xbf16>, vector<128x512xbf16>, vector<2x512xf32> -> vector<2x512xf32>
    %50 = arith.addf %45, %49 : vector<2x512xf32>
    %51 = vector.extract_strided_slice %50 {offsets = [0, 0], sizes = [2, 128], strides = [1, 1]} : vector<2x512xf32> to vector<2x128xf32>
    %52 = arith.negf %51 : vector<2x128xf32>
    %53 = math.exp %52 : vector<2x128xf32>
    %cst_26 = arith.constant 1.000000e+00 : f32
    %54 = vector.broadcast %cst_26 : f32 to vector<2x128xf32>
    %55 = arith.addf %54, %53 : vector<2x128xf32>
    %56 = arith.divf %54, %55 : vector<2x128xf32>
    %57 = vector.extract_strided_slice %50 {offsets = [0, 128], sizes = [2, 128], strides = [1, 1]} : vector<2x512xf32> to vector<2x128xf32>
    %58 = arith.negf %57 : vector<2x128xf32>
    %59 = math.exp %58 : vector<2x128xf32>
    %cst_27 = arith.constant 1.000000e+00 : f32
    %60 = vector.broadcast %cst_27 : f32 to vector<2x128xf32>
    %61 = arith.addf %60, %59 : vector<2x128xf32>
    %62 = arith.divf %60, %61 : vector<2x128xf32>
    %63 = vector.extract_strided_slice %50 {offsets = [0, 256], sizes = [2, 128], strides = [1, 1]} : vector<2x512xf32> to vector<2x128xf32>
    %64 = math.tanh %63 : vector<2x128xf32>
    %65 = vector.extract_strided_slice %50 {offsets = [0, 384], sizes = [2, 128], strides = [1, 1]} : vector<2x512xf32> to vector<2x128xf32>
    %66 = arith.negf %65 : vector<2x128xf32>
    %67 = math.exp %66 : vector<2x128xf32>
    %cst_28 = arith.constant 1.000000e+00 : f32
    %68 = vector.broadcast %cst_28 : f32 to vector<2x128xf32>
    %69 = arith.addf %68, %67 : vector<2x128xf32>
    %70 = arith.divf %68, %69 : vector<2x128xf32>
    %71 = arith.mulf %62, %41 : vector<2x128xf32>
    %72 = arith.mulf %56, %64 : vector<2x128xf32>
    %73 = arith.addf %71, %72 : vector<2x128xf32>
    %74 = math.tanh %73 : vector<2x128xf32>
    %75 = arith.mulf %70, %74 : vector<2x128xf32>
    %c2 = arith.constant 2 : index
    %c0_29 = arith.constant 0 : index
    %76 = vector.load %arg11[%c2, %c0_29] : memref<16x128xf32, #tpu.memory_space<vmem>>, vector<2x128xf32>
    tpu.vector_store %arg11[%c2, %c0_29], %75 {strides = array<i32>} : memref<16x128xf32, #tpu.memory_space<vmem>>, vector<2x128xf32>,
    %77 = vector.extract_strided_slice %8 {offsets = [4, 0], sizes = [2, 512], strides = [1, 1]} : vector<16x512xf32> to vector<2x512xf32>
    %78 = arith.truncf %75 : vector<2x128xf32> to vector<2x128xbf16>
    %c0_30 = arith.constant 0 : index
    %c0_31 = arith.constant 0 : index
    %c0_32 = arith.constant 0 : index
    %79 = vector.load %arg4[%c0_30, %c0_31, %c0_32] : memref<2x128x512xbf16, #tpu.memory_space<vmem>>, vector<1x128x512xbf16>
    %80 = vector.shape_cast %79 : vector<1x128x512xbf16> to vector<128x512xbf16>
    %cst_33 = arith.constant dense<0.000000e+00> : vector<2x512xf32>
    %81 = tpu.matmul %78, %80, %cst_33 {dimension_numbers = #tpu.dot_dimension_numbers<[1], [0], [0], [1], [0, 0, 1, 1], [], []>} : vector<2x128xbf16>, vector<128x512xbf16>, vector<2x512xf32> -> vector<2x512xf32>
    %82 = arith.addf %77, %81 : vector<2x512xf32>
    %83 = vector.extract_strided_slice %82 {offsets = [0, 0], sizes = [2, 128], strides = [1, 1]} : vector<2x512xf32> to vector<2x128xf32>
    %84 = arith.negf %83 : vector<2x128xf32>
    %85 = math.exp %84 : vector<2x128xf32>
    %cst_34 = arith.constant 1.000000e+00 : f32
    %86 = vector.broadcast %cst_34 : f32 to vector<2x128xf32>
    %87 = arith.addf %86, %85 : vector<2x128xf32>
    %88 = arith.divf %86, %87 : vector<2x128xf32>
    %89 = vector.extract_strided_slice %82 {offsets = [0, 128], sizes = [2, 128], strides = [1, 1]} : vector<2x512xf32> to vector<2x128xf32>
    %90 = arith.negf %89 : vector<2x128xf32>
    %91 = math.exp %90 : vector<2x128xf32>
    %cst_35 = arith.constant 1.000000e+00 : f32
    %92 = vector.broadcast %cst_35 : f32 to vector<2x128xf32>
    %93 = arith.addf %92, %91 : vector<2x128xf32>
    %94 = arith.divf %92, %93 : vector<2x128xf32>
    %95 = vector.extract_strided_slice %82 {offsets = [0, 256], sizes = [2, 128], strides = [1, 1]} : vector<2x512xf32> to vector<2x128xf32>
    %96 = math.tanh %95 : vector<2x128xf32>
    %97 = vector.extract_strided_slice %82 {offsets = [0, 384], sizes = [2, 128], strides = [1, 1]} : vector<2x512xf32> to vector<2x128xf32>
    %98 = arith.negf %97 : vector<2x128xf32>
    %99 = math.exp %98 : vector<2x128xf32>
    %cst_36 = arith.constant 1.000000e+00 : f32
    %100 = vector.broadcast %cst_36 : f32 to vector<2x128xf32>
    %101 = arith.addf %100, %99 : vector<2x128xf32>
    %102 = arith.divf %100, %101 : vector<2x128xf32>
    %103 = arith.mulf %94, %73 : vector<2x128xf32>
    %104 = arith.mulf %88, %96 : vector<2x128xf32>
    %105 = arith.addf %103, %104 : vector<2x128xf32>
    %106 = math.tanh %105 : vector<2x128xf32>
    %107 = arith.mulf %102, %106 : vector<2x128xf32>
    %c4 = arith.constant 4 : index
    %c0_37 = arith.constant 0 : index
    %108 = vector.load %arg11[%c4, %c0_37] : memref<16x128xf32, #tpu.memory_space<vmem>>, vector<2x128xf32>
    tpu.vector_store %arg11[%c4, %c0_37], %107 {strides = array<i32>} : memref<16x128xf32, #tpu.memory_space<vmem>>, vector<2x128xf32>,
    %109 = vector.extract_strided_slice %8 {offsets = [6, 0], sizes = [2, 512], strides = [1, 1]} : vector<16x512xf32> to vector<2x512xf32>
    %110 = arith.truncf %107 : vector<2x128xf32> to vector<2x128xbf16>
    %c0_38 = arith.constant 0 : index
    %c0_39 = arith.constant 0 : index
    %c0_40 = arith.constant 0 : index
    %111 = vector.load %arg4[%c0_38, %c0_39, %c0_40] : memref<2x128x512xbf16, #tpu.memory_space<vmem>>, vector<1x128x512xbf16>
    %112 = vector.shape_cast %111 : vector<1x128x512xbf16> to vector<128x512xbf16>
    %cst_41 = arith.constant dense<0.000000e+00> : vector<2x512xf32>
    %113 = tpu.matmul %110, %112, %cst_41 {dimension_numbers = #tpu.dot_dimension_numbers<[1], [0], [0], [1], [0, 0, 1, 1], [], []>} : vector<2x128xbf16>, vector<128x512xbf16>, vector<2x512xf32> -> vector<2x512xf32>
    %114 = arith.addf %109, %113 : vector<2x512xf32>
    %115 = vector.extract_strided_slice %114 {offsets = [0, 0], sizes = [2, 128], strides = [1, 1]} : vector<2x512xf32> to vector<2x128xf32>
    %116 = arith.negf %115 : vector<2x128xf32>
    %117 = math.exp %116 : vector<2x128xf32>
    %cst_42 = arith.constant 1.000000e+00 : f32
    %118 = vector.broadcast %cst_42 : f32 to vector<2x128xf32>
    %119 = arith.addf %118, %117 : vector<2x128xf32>
    %120 = arith.divf %118, %119 : vector<2x128xf32>
    %121 = vector.extract_strided_slice %114 {offsets = [0, 128], sizes = [2, 128], strides = [1, 1]} : vector<2x512xf32> to vector<2x128xf32>
    %122 = arith.negf %121 : vector<2x128xf32>
    %123 = math.exp %122 : vector<2x128xf32>
    %cst_43 = arith.constant 1.000000e+00 : f32
    %124 = vector.broadcast %cst_43 : f32 to vector<2x128xf32>
    %125 = arith.addf %124, %123 : vector<2x128xf32>
    %126 = arith.divf %124, %125 : vector<2x128xf32>
    %127 = vector.extract_strided_slice %114 {offsets = [0, 256], sizes = [2, 128], strides = [1, 1]} : vector<2x512xf32> to vector<2x128xf32>
    %128 = math.tanh %127 : vector<2x128xf32>
    %129 = vector.extract_strided_slice %114 {offsets = [0, 384], sizes = [2, 128], strides = [1, 1]} : vector<2x512xf32> to vector<2x128xf32>
    %130 = arith.negf %129 : vector<2x128xf32>
    %131 = math.exp %130 : vector<2x128xf32>
    %cst_44 = arith.constant 1.000000e+00 : f32
    %132 = vector.broadcast %cst_44 : f32 to vector<2x128xf32>
    %133 = arith.addf %132, %131 : vector<2x128xf32>
    %134 = arith.divf %132, %133 : vector<2x128xf32>
    %135 = arith.mulf %126, %105 : vector<2x128xf32>
    %136 = arith.mulf %120, %128 : vector<2x128xf32>
    %137 = arith.addf %135, %136 : vector<2x128xf32>
    %138 = math.tanh %137 : vector<2x128xf32>
    %139 = arith.mulf %134, %138 : vector<2x128xf32>
    %c6 = arith.constant 6 : index
    %c0_45 = arith.constant 0 : index
    %140 = vector.load %arg11[%c6, %c0_45] : memref<16x128xf32, #tpu.memory_space<vmem>>, vector<2x128xf32>
    tpu.vector_store %arg11[%c6, %c0_45], %139 {strides = array<i32>} : memref<16x128xf32, #tpu.memory_space<vmem>>, vector<2x128xf32>,
    %141 = vector.extract_strided_slice %8 {offsets = [8, 0], sizes = [2, 512], strides = [1, 1]} : vector<16x512xf32> to vector<2x512xf32>
    %142 = arith.truncf %139 : vector<2x128xf32> to vector<2x128xbf16>
    %c0_46 = arith.constant 0 : index
    %c0_47 = arith.constant 0 : index
    %c0_48 = arith.constant 0 : index
    %143 = vector.load %arg4[%c0_46, %c0_47, %c0_48] : memref<2x128x512xbf16, #tpu.memory_space<vmem>>, vector<1x128x512xbf16>
    %144 = vector.shape_cast %143 : vector<1x128x512xbf16> to vector<128x512xbf16>
    %cst_49 = arith.constant dense<0.000000e+00> : vector<2x512xf32>
    %145 = tpu.matmul %142, %144, %cst_49 {dimension_numbers = #tpu.dot_dimension_numbers<[1], [0], [0], [1], [0, 0, 1, 1], [], []>} : vector<2x128xbf16>, vector<128x512xbf16>, vector<2x512xf32> -> vector<2x512xf32>
    %146 = arith.addf %141, %145 : vector<2x512xf32>
    %147 = vector.extract_strided_slice %146 {offsets = [0, 0], sizes = [2, 128], strides = [1, 1]} : vector<2x512xf32> to vector<2x128xf32>
    %148 = arith.negf %147 : vector<2x128xf32>
    %149 = math.exp %148 : vector<2x128xf32>
    %cst_50 = arith.constant 1.000000e+00 : f32
    %150 = vector.broadcast %cst_50 : f32 to vector<2x128xf32>
    %151 = arith.addf %150, %149 : vector<2x128xf32>
    %152 = arith.divf %150, %151 : vector<2x128xf32>
    %153 = vector.extract_strided_slice %146 {offsets = [0, 128], sizes = [2, 128], strides = [1, 1]} : vector<2x512xf32> to vector<2x128xf32>
    %154 = arith.negf %153 : vector<2x128xf32>
    %155 = math.exp %154 : vector<2x128xf32>
    %cst_51 = arith.constant 1.000000e+00 : f32
    %156 = vector.broadcast %cst_51 : f32 to vector<2x128xf32>
    %157 = arith.addf %156, %155 : vector<2x128xf32>
    %158 = arith.divf %156, %157 : vector<2x128xf32>
    %159 = vector.extract_strided_slice %146 {offsets = [0, 256], sizes = [2, 128], strides = [1, 1]} : vector<2x512xf32> to vector<2x128xf32>
    %160 = math.tanh %159 : vector<2x128xf32>
    %161 = vector.extract_strided_slice %146 {offsets = [0, 384], sizes = [2, 128], strides = [1, 1]} : vector<2x512xf32> to vector<2x128xf32>
    %162 = arith.negf %161 : vector<2x128xf32>
    %163 = math.exp %162 : vector<2x128xf32>
    %cst_52 = arith.constant 1.000000e+00 : f32
    %164 = vector.broadcast %cst_52 : f32 to vector<2x128xf32>
    %165 = arith.addf %164, %163 : vector<2x128xf32>
    %166 = arith.divf %164, %165 : vector<2x128xf32>
    %167 = arith.mulf %158, %137 : vector<2x128xf32>
    %168 = arith.mulf %152, %160 : vector<2x128xf32>
    %169 = arith.addf %167, %168 : vector<2x128xf32>
    %170 = math.tanh %169 : vector<2x128xf32>
    %171 = arith.mulf %166, %170 : vector<2x128xf32>
    %c8 = arith.constant 8 : index
    %c0_53 = arith.constant 0 : index
    %172 = vector.load %arg11[%c8, %c0_53] : memref<16x128xf32, #tpu.memory_space<vmem>>, vector<2x128xf32>
    tpu.vector_store %arg11[%c8, %c0_53], %171 {strides = array<i32>} : memref<16x128xf32, #tpu.memory_space<vmem>>, vector<2x128xf32>,
    %173 = vector.extract_strided_slice %8 {offsets = [10, 0], sizes = [2, 512], strides = [1, 1]} : vector<16x512xf32> to vector<2x512xf32>
    %174 = arith.truncf %171 : vector<2x128xf32> to vector<2x128xbf16>
    %c0_54 = arith.constant 0 : index
    %c0_55 = arith.constant 0 : index
    %c0_56 = arith.constant 0 : index
    %175 = vector.load %arg4[%c0_54, %c0_55, %c0_56] : memref<2x128x512xbf16, #tpu.memory_space<vmem>>, vector<1x128x512xbf16>
    %176 = vector.shape_cast %175 : vector<1x128x512xbf16> to vector<128x512xbf16>
    %cst_57 = arith.constant dense<0.000000e+00> : vector<2x512xf32>
    %177 = tpu.matmul %174, %176, %cst_57 {dimension_numbers = #tpu.dot_dimension_numbers<[1], [0], [0], [1], [0, 0, 1, 1], [], []>} : vector<2x128xbf16>, vector<128x512xbf16>, vector<2x512xf32> -> vector<2x512xf32>
    %178 = arith.addf %173, %177 : vector<2x512xf32>
    %179 = vector.extract_strided_slice %178 {offsets = [0, 0], sizes = [2, 128], strides = [1, 1]} : vector<2x512xf32> to vector<2x128xf32>
    %180 = arith.negf %179 : vector<2x128xf32>
    %181 = math.exp %180 : vector<2x128xf32>
    %cst_58 = arith.constant 1.000000e+00 : f32
    %182 = vector.broadcast %cst_58 : f32 to vector<2x128xf32>
    %183 = arith.addf %182, %181 : vector<2x128xf32>
    %184 = arith.divf %182, %183 : vector<2x128xf32>
    %185 = vector.extract_strided_slice %178 {offsets = [0, 128], sizes = [2, 128], strides = [1, 1]} : vector<2x512xf32> to vector<2x128xf32>
    %186 = arith.negf %185 : vector<2x128xf32>
    %187 = math.exp %186 : vector<2x128xf32>
    %cst_59 = arith.constant 1.000000e+00 : f32
    %188 = vector.broadcast %cst_59 : f32 to vector<2x128xf32>
    %189 = arith.addf %188, %187 : vector<2x128xf32>
    %190 = arith.divf %188, %189 : vector<2x128xf32>
    %191 = vector.extract_strided_slice %178 {offsets = [0, 256], sizes = [2, 128], strides = [1, 1]} : vector<2x512xf32> to vector<2x128xf32>
    %192 = math.tanh %191 : vector<2x128xf32>
    %193 = vector.extract_strided_slice %178 {offsets = [0, 384], sizes = [2, 128], strides = [1, 1]} : vector<2x512xf32> to vector<2x128xf32>
    %194 = arith.negf %193 : vector<2x128xf32>
    %195 = math.exp %194 : vector<2x128xf32>
    %cst_60 = arith.constant 1.000000e+00 : f32
    %196 = vector.broadcast %cst_60 : f32 to vector<2x128xf32>
    %197 = arith.addf %196, %195 : vector<2x128xf32>
    %198 = arith.divf %196, %197 : vector<2x128xf32>
    %199 = arith.mulf %190, %169 : vector<2x128xf32>
    %200 = arith.mulf %184, %192 : vector<2x128xf32>
    %201 = arith.addf %199, %200 : vector<2x128xf32>
    %202 = math.tanh %201 : vector<2x128xf32>
    %203 = arith.mulf %198, %202 : vector<2x128xf32>
    %c10 = arith.constant 10 : index
    %c0_61 = arith.constant 0 : index
    %204 = vector.load %arg11[%c10, %c0_61] : memref<16x128xf32, #tpu.memory_space<vmem>>, vector<2x128xf32>
    tpu.vector_store %arg11[%c10, %c0_61], %203 {strides = array<i32>} : memref<16x128xf32, #tpu.memory_space<vmem>>, vector<2x128xf32>,
    %205 = vector.extract_strided_slice %8 {offsets = [12, 0], sizes = [2, 512], strides = [1, 1]} : vector<16x512xf32> to vector<2x512xf32>
    %206 = arith.truncf %203 : vector<2x128xf32> to vector<2x128xbf16>
    %c0_62 = arith.constant 0 : index
    %c0_63 = arith.constant 0 : index
    %c0_64 = arith.constant 0 : index
    %207 = vector.load %arg4[%c0_62, %c0_63, %c0_64] : memref<2x128x512xbf16, #tpu.memory_space<vmem>>, vector<1x128x512xbf16>
    %208 = vector.shape_cast %207 : vector<1x128x512xbf16> to vector<128x512xbf16>
    %cst_65 = arith.constant dense<0.000000e+00> : vector<2x512xf32>
    %209 = tpu.matmul %206, %208, %cst_65 {dimension_numbers = #tpu.dot_dimension_numbers<[1], [0], [0], [1], [0, 0, 1, 1], [], []>} : vector<2x128xbf16>, vector<128x512xbf16>, vector<2x512xf32> -> vector<2x512xf32>
    %210 = arith.addf %205, %209 : vector<2x512xf32>
    %211 = vector.extract_strided_slice %210 {offsets = [0, 0], sizes = [2, 128], strides = [1, 1]} : vector<2x512xf32> to vector<2x128xf32>
    %212 = arith.negf %211 : vector<2x128xf32>
    %213 = math.exp %212 : vector<2x128xf32>
    %cst_66 = arith.constant 1.000000e+00 : f32
    %214 = vector.broadcast %cst_66 : f32 to vector<2x128xf32>
    %215 = arith.addf %214, %213 : vector<2x128xf32>
    %216 = arith.divf %214, %215 : vector<2x128xf32>
    %217 = vector.extract_strided_slice %210 {offsets = [0, 128], sizes = [2, 128], strides = [1, 1]} : vector<2x512xf32> to vector<2x128xf32>
    %218 = arith.negf %217 : vector<2x128xf32>
    %219 = math.exp %218 : vector<2x128xf32>
    %cst_67 = arith.constant 1.000000e+00 : f32
    %220 = vector.broadcast %cst_67 : f32 to vector<2x128xf32>
    %221 = arith.addf %220, %219 : vector<2x128xf32>
    %222 = arith.divf %220, %221 : vector<2x128xf32>
    %223 = vector.extract_strided_slice %210 {offsets = [0, 256], sizes = [2, 128], strides = [1, 1]} : vector<2x512xf32> to vector<2x128xf32>
    %224 = math.tanh %223 : vector<2x128xf32>
    %225 = vector.extract_strided_slice %210 {offsets = [0, 384], sizes = [2, 128], strides = [1, 1]} : vector<2x512xf32> to vector<2x128xf32>
    %226 = arith.negf %225 : vector<2x128xf32>
    %227 = math.exp %226 : vector<2x128xf32>
    %cst_68 = arith.constant 1.000000e+00 : f32
    %228 = vector.broadcast %cst_68 : f32 to vector<2x128xf32>
    %229 = arith.addf %228, %227 : vector<2x128xf32>
    %230 = arith.divf %228, %229 : vector<2x128xf32>
    %231 = arith.mulf %222, %201 : vector<2x128xf32>
    %232 = arith.mulf %216, %224 : vector<2x128xf32>
    %233 = arith.addf %231, %232 : vector<2x128xf32>
    %234 = math.tanh %233 : vector<2x128xf32>
    %235 = arith.mulf %230, %234 : vector<2x128xf32>
    %c12 = arith.constant 12 : index
    %c0_69 = arith.constant 0 : index
    %236 = vector.load %arg11[%c12, %c0_69] : memref<16x128xf32, #tpu.memory_space<vmem>>, vector<2x128xf32>
    tpu.vector_store %arg11[%c12, %c0_69], %235 {strides = array<i32>} : memref<16x128xf32, #tpu.memory_space<vmem>>, vector<2x128xf32>,
    %237 = vector.extract_strided_slice %8 {offsets = [14, 0], sizes = [2, 512], strides = [1, 1]} : vector<16x512xf32> to vector<2x512xf32>
    %238 = arith.truncf %235 : vector<2x128xf32> to vector<2x128xbf16>
    %c0_70 = arith.constant 0 : index
    %c0_71 = arith.constant 0 : index
    %c0_72 = arith.constant 0 : index
    %239 = vector.load %arg4[%c0_70, %c0_71, %c0_72] : memref<2x128x512xbf16, #tpu.memory_space<vmem>>, vector<1x128x512xbf16>
    %240 = vector.shape_cast %239 : vector<1x128x512xbf16> to vector<128x512xbf16>
    %cst_73 = arith.constant dense<0.000000e+00> : vector<2x512xf32>
    %241 = tpu.matmul %238, %240, %cst_73 {dimension_numbers = #tpu.dot_dimension_numbers<[1], [0], [0], [1], [0, 0, 1, 1], [], []>} : vector<2x128xbf16>, vector<128x512xbf16>, vector<2x512xf32> -> vector<2x512xf32>
    %242 = arith.addf %237, %241 : vector<2x512xf32>
    %243 = vector.extract_strided_slice %242 {offsets = [0, 0], sizes = [2, 128], strides = [1, 1]} : vector<2x512xf32> to vector<2x128xf32>
    %244 = arith.negf %243 : vector<2x128xf32>
    %245 = math.exp %244 : vector<2x128xf32>
    %cst_74 = arith.constant 1.000000e+00 : f32
    %246 = vector.broadcast %cst_74 : f32 to vector<2x128xf32>
    %247 = arith.addf %246, %245 : vector<2x128xf32>
    %248 = arith.divf %246, %247 : vector<2x128xf32>
    %249 = vector.extract_strided_slice %242 {offsets = [0, 128], sizes = [2, 128], strides = [1, 1]} : vector<2x512xf32> to vector<2x128xf32>
    %250 = arith.negf %249 : vector<2x128xf32>
    %251 = math.exp %250 : vector<2x128xf32>
    %cst_75 = arith.constant 1.000000e+00 : f32
    %252 = vector.broadcast %cst_75 : f32 to vector<2x128xf32>
    %253 = arith.addf %252, %251 : vector<2x128xf32>
    %254 = arith.divf %252, %253 : vector<2x128xf32>
    %255 = vector.extract_strided_slice %242 {offsets = [0, 256], sizes = [2, 128], strides = [1, 1]} : vector<2x512xf32> to vector<2x128xf32>
    %256 = math.tanh %255 : vector<2x128xf32>
    %257 = vector.extract_strided_slice %242 {offsets = [0, 384], sizes = [2, 128], strides = [1, 1]} : vector<2x512xf32> to vector<2x128xf32>
    %258 = arith.negf %257 : vector<2x128xf32>
    %259 = math.exp %258 : vector<2x128xf32>
    %cst_76 = arith.constant 1.000000e+00 : f32
    %260 = vector.broadcast %cst_76 : f32 to vector<2x128xf32>
    %261 = arith.addf %260, %259 : vector<2x128xf32>
    %262 = arith.divf %260, %261 : vector<2x128xf32>
    %263 = arith.mulf %254, %233 : vector<2x128xf32>
    %264 = arith.mulf %248, %256 : vector<2x128xf32>
    %265 = arith.addf %263, %264 : vector<2x128xf32>
    %266 = math.tanh %265 : vector<2x128xf32>
    %267 = arith.mulf %262, %266 : vector<2x128xf32>
    %c14 = arith.constant 14 : index
    %c0_77 = arith.constant 0 : index
    %268 = vector.load %arg11[%c14, %c0_77] : memref<16x128xf32, #tpu.memory_space<vmem>>, vector<2x128xf32>
    tpu.vector_store %arg11[%c14, %c0_77], %267 {strides = array<i32>} : memref<16x128xf32, #tpu.memory_space<vmem>>, vector<2x128xf32>,
    %c0_78 = arith.constant 0 : index
    %c0_79 = arith.constant 0 : index
    %c0_80 = arith.constant 0 : index
    %269 = vector.load %arg9[%c0_78, %c0_79, %c0_80] : memref<2x2x128xf32, #tpu.memory_space<vmem>>, vector<1x2x128xf32>
    %270 = vector.shape_cast %269 : vector<1x2x128xf32> to vector<2x128xf32>
    %271 = vector.shape_cast %267 : vector<2x128xf32> to vector<1x2x128xf32>
    tpu.vector_store %arg9[%c0_78, %c0_79, %c0_80], %271 {strides = array<i32>} : memref<2x2x128xf32, #tpu.memory_space<vmem>>, vector<1x2x128xf32>,
    %c0_81 = arith.constant 0 : index
    %c0_82 = arith.constant 0 : index
    %c0_83 = arith.constant 0 : index
    %272 = vector.load %arg10[%c0_81, %c0_82, %c0_83] : memref<2x2x128xf32, #tpu.memory_space<vmem>>, vector<1x2x128xf32>
    %273 = vector.shape_cast %272 : vector<1x2x128xf32> to vector<2x128xf32>
    %274 = vector.shape_cast %265 : vector<2x128xf32> to vector<1x2x128xf32>
    tpu.vector_store %arg10[%c0_81, %c0_82, %c0_83], %274 {strides = array<i32>} : memref<2x2x128xf32, #tpu.memory_space<vmem>>, vector<1x2x128xf32>,
    %c0_84 = arith.constant 0 : index
    %c0_85 = arith.constant 0 : index
    %275 = vector.load %arg11[%c0_84, %c0_85] : memref<16x128xf32, #tpu.memory_space<vmem>>, vector<16x128xf32>
    %276 = arith.truncf %275 : vector<16x128xf32> to vector<16x128xbf16>
    %c1 = arith.constant 1 : index
    %c0_86 = arith.constant 0 : index
    %c0_87 = arith.constant 0 : index
    %277 = vector.load %arg3[%c1, %c0_86, %c0_87] : memref<2x128x512xbf16, #tpu.memory_space<vmem>>, vector<1x128x512xbf16>
    %278 = vector.shape_cast %277 : vector<1x128x512xbf16> to vector<128x512xbf16>
    %cst_88 = arith.constant dense<0.000000e+00> : vector<16x512xf32>
    %279 = tpu.matmul %276, %278, %cst_88 {dimension_numbers = #tpu.dot_dimension_numbers<[1], [0], [0], [1], [0, 0, 1, 1], [], []>} : vector<16x128xbf16>, vector<128x512xbf16>, vector<16x512xf32> -> vector<16x512xf32>
    %c1_89 = arith.constant 1 : index
    %c0_90 = arith.constant 0 : index
    %c0_91 = arith.constant 0 : index
    %280 = vector.load %arg5[%c1_89, %c0_90, %c0_91] : memref<2x1x512xf32, #tpu.memory_space<vmem>>, vector<1x1x512xf32>
    %281 = vector.shape_cast %280 : vector<1x1x512xf32> to vector<1x512xf32>
    %282 = vector.broadcast %281 : vector<1x512xf32> to vector<16x512xf32>
    %283 = arith.addf %279, %282 : vector<16x512xf32>
    %c1_92 = arith.constant 1 : index
    %c0_93 = arith.constant 0 : index
    %c0_94 = arith.constant 0 : index
    %284 = vector.load %arg1[%c1_92, %c0_93, %c0_94] : memref<2x2x128xf32, #tpu.memory_space<vmem>>, vector<1x2x128xf32>
    %285 = vector.shape_cast %284 : vector<1x2x128xf32> to vector<2x128xf32>
    %c1_95 = arith.constant 1 : index
    %c0_96 = arith.constant 0 : index
    %c0_97 = arith.constant 0 : index
    %286 = vector.load %arg2[%c1_95, %c0_96, %c0_97] : memref<2x2x128xf32, #tpu.memory_space<vmem>>, vector<1x2x128xf32>
    %287 = vector.shape_cast %286 : vector<1x2x128xf32> to vector<2x128xf32>
    %288 = vector.extract_strided_slice %283 {offsets = [0, 0], sizes = [2, 512], strides = [1, 1]} : vector<16x512xf32> to vector<2x512xf32>
    %289 = arith.truncf %285 : vector<2x128xf32> to vector<2x128xbf16>
    %c1_98 = arith.constant 1 : index
    %c0_99 = arith.constant 0 : index
    %c0_100 = arith.constant 0 : index
    %290 = vector.load %arg4[%c1_98, %c0_99, %c0_100] : memref<2x128x512xbf16, #tpu.memory_space<vmem>>, vector<1x128x512xbf16>
    %291 = vector.shape_cast %290 : vector<1x128x512xbf16> to vector<128x512xbf16>
    %cst_101 = arith.constant dense<0.000000e+00> : vector<2x512xf32>
    %292 = tpu.matmul %289, %291, %cst_101 {dimension_numbers = #tpu.dot_dimension_numbers<[1], [0], [0], [1], [0, 0, 1, 1], [], []>} : vector<2x128xbf16>, vector<128x512xbf16>, vector<2x512xf32> -> vector<2x512xf32>
    %293 = arith.addf %288, %292 : vector<2x512xf32>
    %294 = vector.extract_strided_slice %293 {offsets = [0, 0], sizes = [2, 128], strides = [1, 1]} : vector<2x512xf32> to vector<2x128xf32>
    %295 = arith.negf %294 : vector<2x128xf32>
    %296 = math.exp %295 : vector<2x128xf32>
    %cst_102 = arith.constant 1.000000e+00 : f32
    %297 = vector.broadcast %cst_102 : f32 to vector<2x128xf32>
    %298 = arith.addf %297, %296 : vector<2x128xf32>
    %299 = arith.divf %297, %298 : vector<2x128xf32>
    %300 = vector.extract_strided_slice %293 {offsets = [0, 128], sizes = [2, 128], strides = [1, 1]} : vector<2x512xf32> to vector<2x128xf32>
    %301 = arith.negf %300 : vector<2x128xf32>
    %302 = math.exp %301 : vector<2x128xf32>
    %cst_103 = arith.constant 1.000000e+00 : f32
    %303 = vector.broadcast %cst_103 : f32 to vector<2x128xf32>
    %304 = arith.addf %303, %302 : vector<2x128xf32>
    %305 = arith.divf %303, %304 : vector<2x128xf32>
    %306 = vector.extract_strided_slice %293 {offsets = [0, 256], sizes = [2, 128], strides = [1, 1]} : vector<2x512xf32> to vector<2x128xf32>
    %307 = math.tanh %306 : vector<2x128xf32>
    %308 = vector.extract_strided_slice %293 {offsets = [0, 384], sizes = [2, 128], strides = [1, 1]} : vector<2x512xf32> to vector<2x128xf32>
    %309 = arith.negf %308 : vector<2x128xf32>
    %310 = math.exp %309 : vector<2x128xf32>
    %cst_104 = arith.constant 1.000000e+00 : f32
    %311 = vector.broadcast %cst_104 : f32 to vector<2x128xf32>
    %312 = arith.addf %311, %310 : vector<2x128xf32>
    %313 = arith.divf %311, %312 : vector<2x128xf32>
    %314 = arith.mulf %305, %287 : vector<2x128xf32>
    %315 = arith.mulf %299, %307 : vector<2x128xf32>
    %316 = arith.addf %314, %315 : vector<2x128xf32>
    %317 = math.tanh %316 : vector<2x128xf32>
    %318 = arith.mulf %313, %317 : vector<2x128xf32>
    %c0_105 = arith.constant 0 : index
    %c0_106 = arith.constant 0 : index
    %319 = vector.load %arg11[%c0_105, %c0_106] : memref<16x128xf32, #tpu.memory_space<vmem>>, vector<2x128xf32>
    tpu.vector_store %arg11[%c0_105, %c0_106], %318 {strides = array<i32>} : memref<16x128xf32, #tpu.memory_space<vmem>>, vector<2x128xf32>,
    %320 = vector.extract_strided_slice %283 {offsets = [2, 0], sizes = [2, 512], strides = [1, 1]} : vector<16x512xf32> to vector<2x512xf32>
    %321 = arith.truncf %318 : vector<2x128xf32> to vector<2x128xbf16>
    %c1_107 = arith.constant 1 : index
    %c0_108 = arith.constant 0 : index
    %c0_109 = arith.constant 0 : index
    %322 = vector.load %arg4[%c1_107, %c0_108, %c0_109] : memref<2x128x512xbf16, #tpu.memory_space<vmem>>, vector<1x128x512xbf16>
    %323 = vector.shape_cast %322 : vector<1x128x512xbf16> to vector<128x512xbf16>
    %cst_110 = arith.constant dense<0.000000e+00> : vector<2x512xf32>
    %324 = tpu.matmul %321, %323, %cst_110 {dimension_numbers = #tpu.dot_dimension_numbers<[1], [0], [0], [1], [0, 0, 1, 1], [], []>} : vector<2x128xbf16>, vector<128x512xbf16>, vector<2x512xf32> -> vector<2x512xf32>
    %325 = arith.addf %320, %324 : vector<2x512xf32>
    %326 = vector.extract_strided_slice %325 {offsets = [0, 0], sizes = [2, 128], strides = [1, 1]} : vector<2x512xf32> to vector<2x128xf32>
    %327 = arith.negf %326 : vector<2x128xf32>
    %328 = math.exp %327 : vector<2x128xf32>
    %cst_111 = arith.constant 1.000000e+00 : f32
    %329 = vector.broadcast %cst_111 : f32 to vector<2x128xf32>
    %330 = arith.addf %329, %328 : vector<2x128xf32>
    %331 = arith.divf %329, %330 : vector<2x128xf32>
    %332 = vector.extract_strided_slice %325 {offsets = [0, 128], sizes = [2, 128], strides = [1, 1]} : vector<2x512xf32> to vector<2x128xf32>
    %333 = arith.negf %332 : vector<2x128xf32>
    %334 = math.exp %333 : vector<2x128xf32>
    %cst_112 = arith.constant 1.000000e+00 : f32
    %335 = vector.broadcast %cst_112 : f32 to vector<2x128xf32>
    %336 = arith.addf %335, %334 : vector<2x128xf32>
    %337 = arith.divf %335, %336 : vector<2x128xf32>
    %338 = vector.extract_strided_slice %325 {offsets = [0, 256], sizes = [2, 128], strides = [1, 1]} : vector<2x512xf32> to vector<2x128xf32>
    %339 = math.tanh %338 : vector<2x128xf32>
    %340 = vector.extract_strided_slice %325 {offsets = [0, 384], sizes = [2, 128], strides = [1, 1]} : vector<2x512xf32> to vector<2x128xf32>
    %341 = arith.negf %340 : vector<2x128xf32>
    %342 = math.exp %341 : vector<2x128xf32>
    %cst_113 = arith.constant 1.000000e+00 : f32
    %343 = vector.broadcast %cst_113 : f32 to vector<2x128xf32>
    %344 = arith.addf %343, %342 : vector<2x128xf32>
    %345 = arith.divf %343, %344 : vector<2x128xf32>
    %346 = arith.mulf %337, %316 : vector<2x128xf32>
    %347 = arith.mulf %331, %339 : vector<2x128xf32>
    %348 = arith.addf %346, %347 : vector<2x128xf32>
    %349 = math.tanh %348 : vector<2x128xf32>
    %350 = arith.mulf %345, %349 : vector<2x128xf32>
    %c2_114 = arith.constant 2 : index
    %c0_115 = arith.constant 0 : index
    %351 = vector.load %arg11[%c2_114, %c0_115] : memref<16x128xf32, #tpu.memory_space<vmem>>, vector<2x128xf32>
    tpu.vector_store %arg11[%c2_114, %c0_115], %350 {strides = array<i32>} : memref<16x128xf32, #tpu.memory_space<vmem>>, vector<2x128xf32>,
    %352 = vector.extract_strided_slice %283 {offsets = [4, 0], sizes = [2, 512], strides = [1, 1]} : vector<16x512xf32> to vector<2x512xf32>
    %353 = arith.truncf %350 : vector<2x128xf32> to vector<2x128xbf16>
    %c1_116 = arith.constant 1 : index
    %c0_117 = arith.constant 0 : index
    %c0_118 = arith.constant 0 : index
    %354 = vector.load %arg4[%c1_116, %c0_117, %c0_118] : memref<2x128x512xbf16, #tpu.memory_space<vmem>>, vector<1x128x512xbf16>
    %355 = vector.shape_cast %354 : vector<1x128x512xbf16> to vector<128x512xbf16>
    %cst_119 = arith.constant dense<0.000000e+00> : vector<2x512xf32>
    %356 = tpu.matmul %353, %355, %cst_119 {dimension_numbers = #tpu.dot_dimension_numbers<[1], [0], [0], [1], [0, 0, 1, 1], [], []>} : vector<2x128xbf16>, vector<128x512xbf16>, vector<2x512xf32> -> vector<2x512xf32>
    %357 = arith.addf %352, %356 : vector<2x512xf32>
    %358 = vector.extract_strided_slice %357 {offsets = [0, 0], sizes = [2, 128], strides = [1, 1]} : vector<2x512xf32> to vector<2x128xf32>
    %359 = arith.negf %358 : vector<2x128xf32>
    %360 = math.exp %359 : vector<2x128xf32>
    %cst_120 = arith.constant 1.000000e+00 : f32
    %361 = vector.broadcast %cst_120 : f32 to vector<2x128xf32>
    %362 = arith.addf %361, %360 : vector<2x128xf32>
    %363 = arith.divf %361, %362 : vector<2x128xf32>
    %364 = vector.extract_strided_slice %357 {offsets = [0, 128], sizes = [2, 128], strides = [1, 1]} : vector<2x512xf32> to vector<2x128xf32>
    %365 = arith.negf %364 : vector<2x128xf32>
    %366 = math.exp %365 : vector<2x128xf32>
    %cst_121 = arith.constant 1.000000e+00 : f32
    %367 = vector.broadcast %cst_121 : f32 to vector<2x128xf32>
    %368 = arith.addf %367, %366 : vector<2x128xf32>
    %369 = arith.divf %367, %368 : vector<2x128xf32>
    %370 = vector.extract_strided_slice %357 {offsets = [0, 256], sizes = [2, 128], strides = [1, 1]} : vector<2x512xf32> to vector<2x128xf32>
    %371 = math.tanh %370 : vector<2x128xf32>
    %372 = vector.extract_strided_slice %357 {offsets = [0, 384], sizes = [2, 128], strides = [1, 1]} : vector<2x512xf32> to vector<2x128xf32>
    %373 = arith.negf %372 : vector<2x128xf32>
    %374 = math.exp %373 : vector<2x128xf32>
    %cst_122 = arith.constant 1.000000e+00 : f32
    %375 = vector.broadcast %cst_122 : f32 to vector<2x128xf32>
    %376 = arith.addf %375, %374 : vector<2x128xf32>
    %377 = arith.divf %375, %376 : vector<2x128xf32>
    %378 = arith.mulf %369, %348 : vector<2x128xf32>
    %379 = arith.mulf %363, %371 : vector<2x128xf32>
    %380 = arith.addf %378, %379 : vector<2x128xf32>
    %381 = math.tanh %380 : vector<2x128xf32>
    %382 = arith.mulf %377, %381 : vector<2x128xf32>
    %c4_123 = arith.constant 4 : index
    %c0_124 = arith.constant 0 : index
    %383 = vector.load %arg11[%c4_123, %c0_124] : memref<16x128xf32, #tpu.memory_space<vmem>>, vector<2x128xf32>
    tpu.vector_store %arg11[%c4_123, %c0_124], %382 {strides = array<i32>} : memref<16x128xf32, #tpu.memory_space<vmem>>, vector<2x128xf32>,
    %384 = vector.extract_strided_slice %283 {offsets = [6, 0], sizes = [2, 512], strides = [1, 1]} : vector<16x512xf32> to vector<2x512xf32>
    %385 = arith.truncf %382 : vector<2x128xf32> to vector<2x128xbf16>
    %c1_125 = arith.constant 1 : index
    %c0_126 = arith.constant 0 : index
    %c0_127 = arith.constant 0 : index
    %386 = vector.load %arg4[%c1_125, %c0_126, %c0_127] : memref<2x128x512xbf16, #tpu.memory_space<vmem>>, vector<1x128x512xbf16>
    %387 = vector.shape_cast %386 : vector<1x128x512xbf16> to vector<128x512xbf16>
    %cst_128 = arith.constant dense<0.000000e+00> : vector<2x512xf32>
    %388 = tpu.matmul %385, %387, %cst_128 {dimension_numbers = #tpu.dot_dimension_numbers<[1], [0], [0], [1], [0, 0, 1, 1], [], []>} : vector<2x128xbf16>, vector<128x512xbf16>, vector<2x512xf32> -> vector<2x512xf32>
    %389 = arith.addf %384, %388 : vector<2x512xf32>
    %390 = vector.extract_strided_slice %389 {offsets = [0, 0], sizes = [2, 128], strides = [1, 1]} : vector<2x512xf32> to vector<2x128xf32>
    %391 = arith.negf %390 : vector<2x128xf32>
    %392 = math.exp %391 : vector<2x128xf32>
    %cst_129 = arith.constant 1.000000e+00 : f32
    %393 = vector.broadcast %cst_129 : f32 to vector<2x128xf32>
    %394 = arith.addf %393, %392 : vector<2x128xf32>
    %395 = arith.divf %393, %394 : vector<2x128xf32>
    %396 = vector.extract_strided_slice %389 {offsets = [0, 128], sizes = [2, 128], strides = [1, 1]} : vector<2x512xf32> to vector<2x128xf32>
    %397 = arith.negf %396 : vector<2x128xf32>
    %398 = math.exp %397 : vector<2x128xf32>
    %cst_130 = arith.constant 1.000000e+00 : f32
    %399 = vector.broadcast %cst_130 : f32 to vector<2x128xf32>
    %400 = arith.addf %399, %398 : vector<2x128xf32>
    %401 = arith.divf %399, %400 : vector<2x128xf32>
    %402 = vector.extract_strided_slice %389 {offsets = [0, 256], sizes = [2, 128], strides = [1, 1]} : vector<2x512xf32> to vector<2x128xf32>
    %403 = math.tanh %402 : vector<2x128xf32>
    %404 = vector.extract_strided_slice %389 {offsets = [0, 384], sizes = [2, 128], strides = [1, 1]} : vector<2x512xf32> to vector<2x128xf32>
    %405 = arith.negf %404 : vector<2x128xf32>
    %406 = math.exp %405 : vector<2x128xf32>
    %cst_131 = arith.constant 1.000000e+00 : f32
    %407 = vector.broadcast %cst_131 : f32 to vector<2x128xf32>
    %408 = arith.addf %407, %406 : vector<2x128xf32>
    %409 = arith.divf %407, %408 : vector<2x128xf32>
    %410 = arith.mulf %401, %380 : vector<2x128xf32>
    %411 = arith.mulf %395, %403 : vector<2x128xf32>
    %412 = arith.addf %410, %411 : vector<2x128xf32>
    %413 = math.tanh %412 : vector<2x128xf32>
    %414 = arith.mulf %409, %413 : vector<2x128xf32>
    %c6_132 = arith.constant 6 : index
    %c0_133 = arith.constant 0 : index
    %415 = vector.load %arg11[%c6_132, %c0_133] : memref<16x128xf32, #tpu.memory_space<vmem>>, vector<2x128xf32>
    tpu.vector_store %arg11[%c6_132, %c0_133], %414 {strides = array<i32>} : memref<16x128xf32, #tpu.memory_space<vmem>>, vector<2x128xf32>,
    %416 = vector.extract_strided_slice %283 {offsets = [8, 0], sizes = [2, 512], strides = [1, 1]} : vector<16x512xf32> to vector<2x512xf32>
    %417 = arith.truncf %414 : vector<2x128xf32> to vector<2x128xbf16>
    %c1_134 = arith.constant 1 : index
    %c0_135 = arith.constant 0 : index
    %c0_136 = arith.constant 0 : index
    %418 = vector.load %arg4[%c1_134, %c0_135, %c0_136] : memref<2x128x512xbf16, #tpu.memory_space<vmem>>, vector<1x128x512xbf16>
    %419 = vector.shape_cast %418 : vector<1x128x512xbf16> to vector<128x512xbf16>
    %cst_137 = arith.constant dense<0.000000e+00> : vector<2x512xf32>
    %420 = tpu.matmul %417, %419, %cst_137 {dimension_numbers = #tpu.dot_dimension_numbers<[1], [0], [0], [1], [0, 0, 1, 1], [], []>} : vector<2x128xbf16>, vector<128x512xbf16>, vector<2x512xf32> -> vector<2x512xf32>
    %421 = arith.addf %416, %420 : vector<2x512xf32>
    %422 = vector.extract_strided_slice %421 {offsets = [0, 0], sizes = [2, 128], strides = [1, 1]} : vector<2x512xf32> to vector<2x128xf32>
    %423 = arith.negf %422 : vector<2x128xf32>
    %424 = math.exp %423 : vector<2x128xf32>
    %cst_138 = arith.constant 1.000000e+00 : f32
    %425 = vector.broadcast %cst_138 : f32 to vector<2x128xf32>
    %426 = arith.addf %425, %424 : vector<2x128xf32>
    %427 = arith.divf %425, %426 : vector<2x128xf32>
    %428 = vector.extract_strided_slice %421 {offsets = [0, 128], sizes = [2, 128], strides = [1, 1]} : vector<2x512xf32> to vector<2x128xf32>
    %429 = arith.negf %428 : vector<2x128xf32>
    %430 = math.exp %429 : vector<2x128xf32>
    %cst_139 = arith.constant 1.000000e+00 : f32
    %431 = vector.broadcast %cst_139 : f32 to vector<2x128xf32>
    %432 = arith.addf %431, %430 : vector<2x128xf32>
    %433 = arith.divf %431, %432 : vector<2x128xf32>
    %434 = vector.extract_strided_slice %421 {offsets = [0, 256], sizes = [2, 128], strides = [1, 1]} : vector<2x512xf32> to vector<2x128xf32>
    %435 = math.tanh %434 : vector<2x128xf32>
    %436 = vector.extract_strided_slice %421 {offsets = [0, 384], sizes = [2, 128], strides = [1, 1]} : vector<2x512xf32> to vector<2x128xf32>
    %437 = arith.negf %436 : vector<2x128xf32>
    %438 = math.exp %437 : vector<2x128xf32>
    %cst_140 = arith.constant 1.000000e+00 : f32
    %439 = vector.broadcast %cst_140 : f32 to vector<2x128xf32>
    %440 = arith.addf %439, %438 : vector<2x128xf32>
    %441 = arith.divf %439, %440 : vector<2x128xf32>
    %442 = arith.mulf %433, %412 : vector<2x128xf32>
    %443 = arith.mulf %427, %435 : vector<2x128xf32>
    %444 = arith.addf %442, %443 : vector<2x128xf32>
    %445 = math.tanh %444 : vector<2x128xf32>
    %446 = arith.mulf %441, %445 : vector<2x128xf32>
    %c8_141 = arith.constant 8 : index
    %c0_142 = arith.constant 0 : index
    %447 = vector.load %arg11[%c8_141, %c0_142] : memref<16x128xf32, #tpu.memory_space<vmem>>, vector<2x128xf32>
    tpu.vector_store %arg11[%c8_141, %c0_142], %446 {strides = array<i32>} : memref<16x128xf32, #tpu.memory_space<vmem>>, vector<2x128xf32>,
    %448 = vector.extract_strided_slice %283 {offsets = [10, 0], sizes = [2, 512], strides = [1, 1]} : vector<16x512xf32> to vector<2x512xf32>
    %449 = arith.truncf %446 : vector<2x128xf32> to vector<2x128xbf16>
    %c1_143 = arith.constant 1 : index
    %c0_144 = arith.constant 0 : index
    %c0_145 = arith.constant 0 : index
    %450 = vector.load %arg4[%c1_143, %c0_144, %c0_145] : memref<2x128x512xbf16, #tpu.memory_space<vmem>>, vector<1x128x512xbf16>
    %451 = vector.shape_cast %450 : vector<1x128x512xbf16> to vector<128x512xbf16>
    %cst_146 = arith.constant dense<0.000000e+00> : vector<2x512xf32>
    %452 = tpu.matmul %449, %451, %cst_146 {dimension_numbers = #tpu.dot_dimension_numbers<[1], [0], [0], [1], [0, 0, 1, 1], [], []>} : vector<2x128xbf16>, vector<128x512xbf16>, vector<2x512xf32> -> vector<2x512xf32>
    %453 = arith.addf %448, %452 : vector<2x512xf32>
    %454 = vector.extract_strided_slice %453 {offsets = [0, 0], sizes = [2, 128], strides = [1, 1]} : vector<2x512xf32> to vector<2x128xf32>
    %455 = arith.negf %454 : vector<2x128xf32>
    %456 = math.exp %455 : vector<2x128xf32>
    %cst_147 = arith.constant 1.000000e+00 : f32
    %457 = vector.broadcast %cst_147 : f32 to vector<2x128xf32>
    %458 = arith.addf %457, %456 : vector<2x128xf32>
    %459 = arith.divf %457, %458 : vector<2x128xf32>
    %460 = vector.extract_strided_slice %453 {offsets = [0, 128], sizes = [2, 128], strides = [1, 1]} : vector<2x512xf32> to vector<2x128xf32>
    %461 = arith.negf %460 : vector<2x128xf32>
    %462 = math.exp %461 : vector<2x128xf32>
    %cst_148 = arith.constant 1.000000e+00 : f32
    %463 = vector.broadcast %cst_148 : f32 to vector<2x128xf32>
    %464 = arith.addf %463, %462 : vector<2x128xf32>
    %465 = arith.divf %463, %464 : vector<2x128xf32>
    %466 = vector.extract_strided_slice %453 {offsets = [0, 256], sizes = [2, 128], strides = [1, 1]} : vector<2x512xf32> to vector<2x128xf32>
    %467 = math.tanh %466 : vector<2x128xf32>
    %468 = vector.extract_strided_slice %453 {offsets = [0, 384], sizes = [2, 128], strides = [1, 1]} : vector<2x512xf32> to vector<2x128xf32>
    %469 = arith.negf %468 : vector<2x128xf32>
    %470 = math.exp %469 : vector<2x128xf32>
    %cst_149 = arith.constant 1.000000e+00 : f32
    %471 = vector.broadcast %cst_149 : f32 to vector<2x128xf32>
    %472 = arith.addf %471, %470 : vector<2x128xf32>
    %473 = arith.divf %471, %472 : vector<2x128xf32>
    %474 = arith.mulf %465, %444 : vector<2x128xf32>
    %475 = arith.mulf %459, %467 : vector<2x128xf32>
    %476 = arith.addf %474, %475 : vector<2x128xf32>
    %477 = math.tanh %476 : vector<2x128xf32>
    %478 = arith.mulf %473, %477 : vector<2x128xf32>
    %c10_150 = arith.constant 10 : index
    %c0_151 = arith.constant 0 : index
    %479 = vector.load %arg11[%c10_150, %c0_151] : memref<16x128xf32, #tpu.memory_space<vmem>>, vector<2x128xf32>
    tpu.vector_store %arg11[%c10_150, %c0_151], %478 {strides = array<i32>} : memref<16x128xf32, #tpu.memory_space<vmem>>, vector<2x128xf32>,
    %480 = vector.extract_strided_slice %283 {offsets = [12, 0], sizes = [2, 512], strides = [1, 1]} : vector<16x512xf32> to vector<2x512xf32>
    %481 = arith.truncf %478 : vector<2x128xf32> to vector<2x128xbf16>
    %c1_152 = arith.constant 1 : index
    %c0_153 = arith.constant 0 : index
    %c0_154 = arith.constant 0 : index
    %482 = vector.load %arg4[%c1_152, %c0_153, %c0_154] : memref<2x128x512xbf16, #tpu.memory_space<vmem>>, vector<1x128x512xbf16>
    %483 = vector.shape_cast %482 : vector<1x128x512xbf16> to vector<128x512xbf16>
    %cst_155 = arith.constant dense<0.000000e+00> : vector<2x512xf32>
    %484 = tpu.matmul %481, %483, %cst_155 {dimension_numbers = #tpu.dot_dimension_numbers<[1], [0], [0], [1], [0, 0, 1, 1], [], []>} : vector<2x128xbf16>, vector<128x512xbf16>, vector<2x512xf32> -> vector<2x512xf32>
    %485 = arith.addf %480, %484 : vector<2x512xf32>
    %486 = vector.extract_strided_slice %485 {offsets = [0, 0], sizes = [2, 128], strides = [1, 1]} : vector<2x512xf32> to vector<2x128xf32>
    %487 = arith.negf %486 : vector<2x128xf32>
    %488 = math.exp %487 : vector<2x128xf32>
    %cst_156 = arith.constant 1.000000e+00 : f32
    %489 = vector.broadcast %cst_156 : f32 to vector<2x128xf32>
    %490 = arith.addf %489, %488 : vector<2x128xf32>
    %491 = arith.divf %489, %490 : vector<2x128xf32>
    %492 = vector.extract_strided_slice %485 {offsets = [0, 128], sizes = [2, 128], strides = [1, 1]} : vector<2x512xf32> to vector<2x128xf32>
    %493 = arith.negf %492 : vector<2x128xf32>
    %494 = math.exp %493 : vector<2x128xf32>
    %cst_157 = arith.constant 1.000000e+00 : f32
    %495 = vector.broadcast %cst_157 : f32 to vector<2x128xf32>
    %496 = arith.addf %495, %494 : vector<2x128xf32>
    %497 = arith.divf %495, %496 : vector<2x128xf32>
    %498 = vector.extract_strided_slice %485 {offsets = [0, 256], sizes = [2, 128], strides = [1, 1]} : vector<2x512xf32> to vector<2x128xf32>
    %499 = math.tanh %498 : vector<2x128xf32>
    %500 = vector.extract_strided_slice %485 {offsets = [0, 384], sizes = [2, 128], strides = [1, 1]} : vector<2x512xf32> to vector<2x128xf32>
    %501 = arith.negf %500 : vector<2x128xf32>
    %502 = math.exp %501 : vector<2x128xf32>
    %cst_158 = arith.constant 1.000000e+00 : f32
    %503 = vector.broadcast %cst_158 : f32 to vector<2x128xf32>
    %504 = arith.addf %503, %502 : vector<2x128xf32>
    %505 = arith.divf %503, %504 : vector<2x128xf32>
    %506 = arith.mulf %497, %476 : vector<2x128xf32>
    %507 = arith.mulf %491, %499 : vector<2x128xf32>
    %508 = arith.addf %506, %507 : vector<2x128xf32>
    %509 = math.tanh %508 : vector<2x128xf32>
    %510 = arith.mulf %505, %509 : vector<2x128xf32>
    %c12_159 = arith.constant 12 : index
    %c0_160 = arith.constant 0 : index
    %511 = vector.load %arg11[%c12_159, %c0_160] : memref<16x128xf32, #tpu.memory_space<vmem>>, vector<2x128xf32>
    tpu.vector_store %arg11[%c12_159, %c0_160], %510 {strides = array<i32>} : memref<16x128xf32, #tpu.memory_space<vmem>>, vector<2x128xf32>,
    %512 = vector.extract_strided_slice %283 {offsets = [14, 0], sizes = [2, 512], strides = [1, 1]} : vector<16x512xf32> to vector<2x512xf32>
    %513 = arith.truncf %510 : vector<2x128xf32> to vector<2x128xbf16>
    %c1_161 = arith.constant 1 : index
    %c0_162 = arith.constant 0 : index
    %c0_163 = arith.constant 0 : index
    %514 = vector.load %arg4[%c1_161, %c0_162, %c0_163] : memref<2x128x512xbf16, #tpu.memory_space<vmem>>, vector<1x128x512xbf16>
    %515 = vector.shape_cast %514 : vector<1x128x512xbf16> to vector<128x512xbf16>
    %cst_164 = arith.constant dense<0.000000e+00> : vector<2x512xf32>
    %516 = tpu.matmul %513, %515, %cst_164 {dimension_numbers = #tpu.dot_dimension_numbers<[1], [0], [0], [1], [0, 0, 1, 1], [], []>} : vector<2x128xbf16>, vector<128x512xbf16>, vector<2x512xf32> -> vector<2x512xf32>
    %517 = arith.addf %512, %516 : vector<2x512xf32>
    %518 = vector.extract_strided_slice %517 {offsets = [0, 0], sizes = [2, 128], strides = [1, 1]} : vector<2x512xf32> to vector<2x128xf32>
    %519 = arith.negf %518 : vector<2x128xf32>
    %520 = math.exp %519 : vector<2x128xf32>
    %cst_165 = arith.constant 1.000000e+00 : f32
    %521 = vector.broadcast %cst_165 : f32 to vector<2x128xf32>
    %522 = arith.addf %521, %520 : vector<2x128xf32>
    %523 = arith.divf %521, %522 : vector<2x128xf32>
    %524 = vector.extract_strided_slice %517 {offsets = [0, 128], sizes = [2, 128], strides = [1, 1]} : vector<2x512xf32> to vector<2x128xf32>
    %525 = arith.negf %524 : vector<2x128xf32>
    %526 = math.exp %525 : vector<2x128xf32>
    %cst_166 = arith.constant 1.000000e+00 : f32
    %527 = vector.broadcast %cst_166 : f32 to vector<2x128xf32>
    %528 = arith.addf %527, %526 : vector<2x128xf32>
    %529 = arith.divf %527, %528 : vector<2x128xf32>
    %530 = vector.extract_strided_slice %517 {offsets = [0, 256], sizes = [2, 128], strides = [1, 1]} : vector<2x512xf32> to vector<2x128xf32>
    %531 = math.tanh %530 : vector<2x128xf32>
    %532 = vector.extract_strided_slice %517 {offsets = [0, 384], sizes = [2, 128], strides = [1, 1]} : vector<2x512xf32> to vector<2x128xf32>
    %533 = arith.negf %532 : vector<2x128xf32>
    %534 = math.exp %533 : vector<2x128xf32>
    %cst_167 = arith.constant 1.000000e+00 : f32
    %535 = vector.broadcast %cst_167 : f32 to vector<2x128xf32>
    %536 = arith.addf %535, %534 : vector<2x128xf32>
    %537 = arith.divf %535, %536 : vector<2x128xf32>
    %538 = arith.mulf %529, %508 : vector<2x128xf32>
    %539 = arith.mulf %523, %531 : vector<2x128xf32>
    %540 = arith.addf %538, %539 : vector<2x128xf32>
    %541 = math.tanh %540 : vector<2x128xf32>
    %542 = arith.mulf %537, %541 : vector<2x128xf32>
    %c14_168 = arith.constant 14 : index
    %c0_169 = arith.constant 0 : index
    %543 = vector.load %arg11[%c14_168, %c0_169] : memref<16x128xf32, #tpu.memory_space<vmem>>, vector<2x128xf32>
    tpu.vector_store %arg11[%c14_168, %c0_169], %542 {strides = array<i32>} : memref<16x128xf32, #tpu.memory_space<vmem>>, vector<2x128xf32>,
    %c1_170 = arith.constant 1 : index
    %c0_171 = arith.constant 0 : index
    %c0_172 = arith.constant 0 : index
    %544 = vector.load %arg9[%c1_170, %c0_171, %c0_172] : memref<2x2x128xf32, #tpu.memory_space<vmem>>, vector<1x2x128xf32>
    %545 = vector.shape_cast %544 : vector<1x2x128xf32> to vector<2x128xf32>
    %546 = vector.shape_cast %542 : vector<2x128xf32> to vector<1x2x128xf32>
    tpu.vector_store %arg9[%c1_170, %c0_171, %c0_172], %546 {strides = array<i32>} : memref<2x2x128xf32, #tpu.memory_space<vmem>>, vector<1x2x128xf32>,
    %c1_173 = arith.constant 1 : index
    %c0_174 = arith.constant 0 : index
    %c0_175 = arith.constant 0 : index
    %547 = vector.load %arg10[%c1_173, %c0_174, %c0_175] : memref<2x2x128xf32, #tpu.memory_space<vmem>>, vector<1x2x128xf32>
    %548 = vector.shape_cast %547 : vector<1x2x128xf32> to vector<2x128xf32>
    %549 = vector.shape_cast %540 : vector<2x128xf32> to vector<1x2x128xf32>
    tpu.vector_store %arg10[%c1_173, %c0_174, %c0_175], %549 {strides = array<i32>} : memref<2x2x128xf32, #tpu.memory_space<vmem>>, vector<1x2x128xf32>,
    %c0_176 = arith.constant 0 : index
    %c0_177 = arith.constant 0 : index
    %550 = vector.load %arg11[%c0_176, %c0_177] : memref<16x128xf32, #tpu.memory_space<vmem>>, vector<16x128xf32>
    %551 = arith.truncf %550 : vector<16x128xf32> to vector<16x128xbf16>
    %c0_178 = arith.constant 0 : index
    %c0_179 = arith.constant 0 : index
    %552 = vector.load %arg6[%c0_178, %c0_179] : memref<128x256xbf16, #tpu.memory_space<vmem>>, vector<128x256xbf16>
    %cst_180 = arith.constant dense<0.000000e+00> : vector<16x256xf32>
    %553 = tpu.matmul %551, %552, %cst_180 {dimension_numbers = #tpu.dot_dimension_numbers<[1], [0], [0], [1], [0, 0, 1, 1], [], []>} : vector<16x128xbf16>, vector<128x256xbf16>, vector<16x256xf32> -> vector<16x256xf32>
    %c0_181 = arith.constant 0 : index
    %c0_182 = arith.constant 0 : index
    %554 = vector.load %arg7[%c0_181, %c0_182] : memref<1x256xf32, #tpu.memory_space<vmem>>, vector<1x256xf32>
    %555 = vector.broadcast %554 : vector<1x256xf32> to vector<16x256xf32>
    %556 = arith.addf %553, %555 : vector<16x256xf32>
    %c0_183 = arith.constant 0 : index
    %c0_184 = arith.constant 0 : index
    %557 = vector.load %arg8[%c0_183, %c0_184] : memref<16x256xf32, #tpu.memory_space<vmem>>, vector<16x256xf32>
    tpu.vector_store %arg8[%c0_183, %c0_184], %556 {strides = array<i32>} : memref<16x256xf32, #tpu.memory_space<vmem>>, vector<16x256xf32>,
    return
  }
}

</mosaic_0001>

<bundles_post_ra>
// kernel: model_forward.1
= control target key start
LH: loop header
LB: loop body
LE: loop exit
PB: predicated region body
PF: predicated region fallthrough
CT: control target
= control target key end

     0   :  { %16 = vsyncpa [#allocation4], 0  ;;  %s8463_s0 = inlined_call_operand.vmem [shape: f32[16,128], index: 0, kind: input, shape index: {}]   ;;  %s8464_s1 = inlined_call_operand.vmem [shape: f32[2,2,128], index: 1, kind: input, shape index: {}]   ;;  %s8465_s2 = inlined_call_operand.vmem [shape: f32[2,2,128], index: 2, kind: input, shape index: {}]   ;;  %s8466_s3 = inlined_call_operand.hbm [shape: bf16[2,128,512], index: 3, kind: input, shape index: {}]   ;;  %s8467_s4 = inlined_call_operand.hbm [shape: bf16[2,128,512], index: 4, kind: input, shape index: {}]   ;;  %s8468_s5 = inlined_call_operand.vmem [shape: f32[2,1,512], index: 5, kind: input, shape index: {}]   ;;  %s8469_s6 = inlined_call_operand.vmem [shape: bf16[128,256], index: 6, kind: input, shape index: {}]   ;;  %s8470_s7 = inlined_call_operand.vmem [shape: f32[1,256], index: 7, kind: input, shape index: {}]   ;;  %s8471_s8 = inlined_call_operand.vmem [shape: f32[16,256], index: 8, kind: output, shape index: {0}]   ;;  %s8472_s9 = inlined_call_operand.hbm [shape: f32[2,2,128], index: 9, kind: output, shape index: {1}]   ;;  %s8473_s10 = inlined_call_operand.hbm [shape: f32[2,2,128], index: 10, kind: output, shape index: {2}]  }
   0x1   :  { %17 = vsyncpa [#allocation7], 0 }
   0x2   :  { %18 = vsyncpa [#allocation5], 0 }
   0x3   :  { %19 = vsyncpa [#allocation10], 0  ;;  %s7276_s13 = smov [#allocation3]   ;;  %s7180_s17 = scalar_lea.hbm %s8466_s3, 8192 }
   0x4   :  { %s31_s14 = sshll.u32 %s7276_s13, 4  ;;  %p7181_p0 = scmp.ne.s32.totalorder %s8466_s3, %s7180_s17  ;;  %s32_s14 = int_to_ptr.vmem [resolvable:$true] %s31_s14 }
   0x5   :  { %p7184_p1 = scmp.lt.u32.totalorder %s7180_s17, %s8466_s3 }
   0x7   :  { %p7186_p2 = pnand %p7184_p1, %p7181_p0 }
   0x9   :  { %7189 = shalt.err (!%p7186_p2)
}
   0xa   :  { %s7190_s22 = scalar_lea.vmem %s32_s14, 8192  ;;  %p7195_p4 = scmp.lt.s32.totalorder %s32_s14, %s32_s14 }
   0xb   :  { %p7191_p3 = scmp.ne.s32.totalorder %s32_s14, %s7190_s22  ;;  %p7196_p5 = scmp.lt.s32.totalorder %s7190_s22, %s7190_s22 }
   0xd   :  { %p7197_p6 = por %p7196_p5, %p7195_p4 }
   0xf   :  { %p7198_p7 = pnand %p7197_p6, %p7191_p3 }
  0x11   :  { %7201 = shalt.err (!%p7198_p7)
}
  0x12   :  { %s7277_s23 = smov 256   ;;  %s7278_s24 = smov 16  }
  0x13   :  { %37 = dma.hbm_to_vmem [thread:$0]  %s8466_s3, 8192, %s32_s14, [#allocation4], %s7277_s23, %s7277_s23, %s7278_s24  }
  0x14   :  { %s7279_s27 = smov [#allocation6]   ;;  %s7202_s11 = scalar_lea.hbm %s8467_s4, 8192 }
  0x15   :  { %s43_s28 = sshll.u32 %s7279_s27, 4  ;;  %p7203_p8 = scmp.ne.s32.totalorder %s8467_s4, %s7202_s11  ;;  %s44_s28 = int_to_ptr.vmem [resolvable:$true] %s43_s28 }
  0x16   :  { %p7206_p9 = scmp.lt.u32.totalorder %s7202_s11, %s8467_s4 }
  0x18   :  { %p7208_p10 = pnand %p7206_p9, %p7203_p8 }
  0x1a   :  { %7211 = shalt.err (!%p7208_p10)
}
  0x1b   :  { %s7212_s17 = scalar_lea.vmem %s44_s28, 8192  ;;  %p7217_p12 = scmp.lt.s32.totalorder %s44_s28, %s44_s28 }
  0x1c   :  { %p7213_p11 = scmp.ne.s32.totalorder %s44_s28, %s7212_s17  ;;  %p7218_p13 = scmp.lt.s32.totalorder %s7212_s17, %s7212_s17 }
  0x1e   :  { %p7219_p0 = por %p7218_p13, %p7217_p12 }
  0x20   :  { %p7220_p1 = pnand %p7219_p0, %p7213_p11 }
  0x22   :  { %7223 = shalt.err (!%p7220_p1)
}
  0x23   :  { %49 = dma.hbm_to_vmem [thread:$0]  %s8467_s4, 8192, %s44_s28, [#allocation7], %s7277_s23, %s7277_s23, %s7278_s24  }
  0x24   :  { %7268 = dma.done.wait [#allocation4], 8192  }
  0x25   :  { %7269 = vsyncadd [#allocation4], 4294959104 }
  0x26   :  { %7270 = dma.done.wait [#allocation7], 8192  }
  0x27   :  { %7271 = vsyncadd [#allocation7], 4294959104  ;;  %v7280_v0 = vmov 0   ;;  %v6612_v1 = vld [vmem:[#allocation3 + $0x4] ss:$16 sps:$4 sm:$0xff]   ;;  %v64_v34 = vld [vmem:[%s8463_s0 + $0x8] sm:$0xff] }
  0x28   :  { %312 = vmatprep.mubr.bf16.mxu0 %v7280_v0  ;;  %355 = vmatprep.mubr.bf16.mxu1 %v7280_v0  ;;  %v6614_v2 = vld [vmem:[#allocation3 + $0xc] ss:$16 sps:$4 sm:$0xff]   ;;  %v6616_v3 = vld [vmem:[#allocation3] ss:$16 sps:$4 sm:$0xff]   ;;  %v6617_v4 = vld [vmem:[#allocation3 + $0x8] ss:$16 sps:$4 sm:$0xff]  }
  0x29   :  { %280 = vmatprep.subr.bf16.mxu0 %v6612_v1  ;;  %323 = vmatprep.subr.bf16.mxu1 %v6614_v2  ;;  %v6618_v5 = vld [vmem:[#allocation3 + $0x24] ss:$16 sps:$4 sm:$0xff]   ;;  %v6620_v6 = vld [vmem:[#allocation3 + $0x2c] ss:$16 sps:$4 sm:$0xff]   ;;  %v6622_v7 = vld [vmem:[#allocation3 + $0x20] ss:$16 sps:$4 sm:$0xff]  }
  0x2a   :  { %281 = vmatpush1.bf16.msra.mxu0 %v6616_v3  ;;  %324 = vmatpush1.bf16.msra.mxu1 %v6617_v4  ;;  %v6623_v8 = vld [vmem:[#allocation3 + $0x28] ss:$16 sps:$4 sm:$0xff]   ;;  %v6624_v9 = vld [vmem:[#allocation3 + $0x44] ss:$16 sps:$4 sm:$0xff]   ;;  %v6626_v10 = vld [vmem:[#allocation3 + $0x4c] ss:$16 sps:$4 sm:$0xff]  }
  0x2b   :  { %282 = vmatprep.subr.bf16.mxu0 %v6618_v5  ;;  %325 = vmatprep.subr.bf16.mxu1 %v6620_v6  ;;  %v6628_v11 = vld [vmem:[#allocation3 + $0x40] ss:$16 sps:$4 sm:$0xff]   ;;  %v6629_v12 = vld [vmem:[#allocation3 + $0x48] ss:$16 sps:$4 sm:$0xff]   ;;  %v6630_v13 = vld [vmem:[#allocation3 + $0x64] ss:$16 sps:$4 sm:$0xff]  }
  0x2c   :  { %v6632_v14 = vld [vmem:[#allocation3 + $0x6c] ss:$16 sps:$4 sm:$0xff]   ;;  %v6634_v15 = vld [vmem:[#allocation3 + $0x60] ss:$16 sps:$4 sm:$0xff]   ;;  %v6635_v16 = vld [vmem:[#allocation3 + $0x68] ss:$16 sps:$4 sm:$0xff]  }
  0x2d   :  { %v6636_v17 = vld [vmem:[#allocation3 + $0x84] ss:$16 sps:$4 sm:$0xff]   ;;  %v6638_v18 = vld [vmem:[#allocation3 + $0x8c] ss:$16 sps:$4 sm:$0xff]   ;;  %v6640_v19 = vld [vmem:[#allocation3 + $0x80] ss:$16 sps:$4 sm:$0xff]  }
  0x2e   :  { %283 = vmatpush1.bf16.msra.mxu0 %v6622_v7  ;;  %326 = vmatpush1.bf16.msra.mxu1 %v6623_v8  ;;  %v6641_v20 = vld [vmem:[#allocation3 + $0x88] ss:$16 sps:$4 sm:$0xff]   ;;  %v6642_v21 = vld [vmem:[#allocation3 + $0xa4] ss:$16 sps:$4 sm:$0xff]   ;;  %v6644_v22 = vld [vmem:[#allocation3 + $0xac] ss:$16 sps:$4 sm:$0xff]   ;;  %v100_v7 = vlaneseq }
  0x2f   :  { %284 = vmatprep.subr.bf16.mxu0 %v6624_v9  ;;  %327 = vmatprep.subr.bf16.mxu1 %v6626_v10  ;;  %v6646_v23 = vld [vmem:[#allocation3 + $0xa0] ss:$16 sps:$4 sm:$0xff]   ;;  %v6647_v24 = vld [vmem:[#allocation3 + $0xa8] ss:$16 sps:$4 sm:$0xff]   ;;  %v6648_v25 = vld [vmem:[#allocation3 + $0xc4] ss:$16 sps:$4 sm:$0xff]  }
  0x30   :  { %v6650_v26 = vld [vmem:[#allocation3 + $0xcc] ss:$16 sps:$4 sm:$0xff]   ;;  %v6652_v27 = vld [vmem:[#allocation3 + $0xc0] ss:$16 sps:$4 sm:$0xff]   ;;  %v6653_v28 = vld [vmem:[#allocation3 + $0xc8] ss:$16 sps:$4 sm:$0xff]  }
  0x31   :  { %v6654_v29 = vld [vmem:[#allocation3 + $0xe4] ss:$16 sps:$4 sm:$0xff]   ;;  %v6656_v30 = vld [vmem:[#allocation3 + $0xec] ss:$16 sps:$4 sm:$0xff]   ;;  %v6658_v31 = vld [vmem:[#allocation3 + $0xe0] ss:$16 sps:$4 sm:$0xff]  }
  0x32   :  { %285 = vmatpush1.bf16.msra.mxu0 %v6628_v11  ;;  %328 = vmatpush1.bf16.msra.mxu1 %v6629_v12  ;;  %v6659_v32 = vld [vmem:[#allocation3 + $0xe8] ss:$16 sps:$4 sm:$0xff]   ;;  %v63_v33 = vld [vmem:[%s8463_s0] sm:$0xff]  ;;  %v7374_v36 = vld [vmem:[#allocation6 + $0xc] ss:$16 sps:$4 sm:$0xff]   ;;  %v7509_v8 = vshrl.u32 %v100_v7, 7 }
  0x33   :  { %286 = vmatprep.subr.bf16.mxu0 %v6630_v13  ;;  %329 = vmatprep.subr.bf16.mxu1 %v6632_v14  ;;  %v7372_v35 = vld [vmem:[#allocation6 + $0x4] ss:$16 sps:$4 sm:$0xff]   ;;  %v65_v37 = vpack.c.bf16 %v64_v34, %v63_v33  ;;  %v7376_v38 = vld [vmem:[#allocation6] ss:$16 sps:$4 sm:$0xff]   ;;  %v7378_v39 = vld [vmem:[#allocation6 + $0x8] ss:$16 sps:$4 sm:$0xff]  }
  0x34   :  { %v7382_v40 = vld [vmem:[#allocation6 + $0x24] ss:$16 sps:$4 sm:$0xff]   ;;  %v7384_v41 = vld [vmem:[#allocation6 + $0x2c] ss:$16 sps:$4 sm:$0xff]   ;;  %v7388_v42 = vld [vmem:[#allocation6 + $0x20] ss:$16 sps:$4 sm:$0xff]  }
  0x35   :  { %v7390_v43 = vld [vmem:[#allocation6 + $0x28] ss:$16 sps:$4 sm:$0xff]   ;;  %v7394_v44 = vld [vmem:[#allocation6 + $0x44] ss:$16 sps:$4 sm:$0xff]   ;;  %v7396_v45 = vld [vmem:[#allocation6 + $0x4c] ss:$16 sps:$4 sm:$0xff]  }
  0x36   :  { %287 = vmatpush1.bf16.msra.mxu0 %v6634_v15  ;;  %330 = vmatpush1.bf16.msra.mxu1 %v6635_v16  ;;  %v7402_v46 = vld [vmem:[#allocation6 + $0x40] ss:$16 sps:$4 sm:$0xff]   ;;  %v7404_v47 = vld [vmem:[#allocation6 + $0x48] ss:$16 sps:$4 sm:$0xff]   ;;  %v7408_v48 = vld [vmem:[#allocation6 + $0x64] ss:$16 sps:$4 sm:$0xff]  }
  0x37   :  { %288 = vmatprep.subr.bf16.mxu0 %v6636_v17  ;;  %331 = vmatprep.subr.bf16.mxu1 %v6638_v18  ;;  %v7410_v49 = vld [vmem:[#allocation6 + $0x6c] ss:$16 sps:$4 sm:$0xff]   ;;  %v7412_v50 = vld [vmem:[#allocation6 + $0x60] ss:$16 sps:$4 sm:$0xff]   ;;  %v7414_v51 = vld [vmem:[#allocation6 + $0x68] ss:$16 sps:$4 sm:$0xff]  }
  0x38   :  { %v7416_v52 = vld [vmem:[#allocation6 + $0x84] ss:$16 sps:$4 sm:$0xff]   ;;  %v7418_v53 = vld [vmem:[#allocation6 + $0x8c] ss:$16 sps:$4 sm:$0xff]   ;;  %v7424_v54 = vld [vmem:[#allocation6 + $0x80] ss:$16 sps:$4 sm:$0xff]  }
  0x39   :  { %v7426_v55 = vld [vmem:[#allocation6 + $0x88] ss:$16 sps:$4 sm:$0xff]   ;;  %v7428_v56 = vld [vmem:[#allocation6 + $0xa4] ss:$16 sps:$4 sm:$0xff]   ;;  %v7430_v57 = vld [vmem:[#allocation6 + $0xac] ss:$16 sps:$4 sm:$0xff]  }
  0x3a   :  { %289 = vmatpush1.bf16.msra.mxu0 %v6640_v19  ;;  %332 = vmatpush1.bf16.msra.mxu1 %v6641_v20  ;;  %v7436_v58 = vld [vmem:[#allocation6 + $0xa0] ss:$16 sps:$4 sm:$0xff]   ;;  %v7438_v59 = vld [vmem:[#allocation6 + $0xa8] ss:$16 sps:$4 sm:$0xff]   ;;  %v7440_v60 = vld [vmem:[#allocation6 + $0xc4] ss:$16 sps:$4 sm:$0xff]  }
  0x3b   :  { %290 = vmatprep.subr.bf16.mxu0 %v6642_v21  ;;  %333 = vmatprep.subr.bf16.mxu1 %v6644_v22  ;;  %v7442_v61 = vld [vmem:[#allocation6 + $0xcc] ss:$16 sps:$4 sm:$0xff]   ;;  %v7448_v62 = vld [vmem:[#allocation6 + $0xc0] ss:$16 sps:$4 sm:$0xff]   ;;  %v7450_v63 = vld [vmem:[#allocation6 + $0xc8] ss:$16 sps:$4 sm:$0xff]  }
  0x3c   :  { %v7452_v1 = vld [vmem:[#allocation6 + $0xe4] ss:$16 sps:$4 sm:$0xff]   ;;  %v7454_v2 = vld [vmem:[#allocation6 + $0xec] ss:$16 sps:$4 sm:$0xff]   ;;  %v7460_v3 = vld [vmem:[#allocation6 + $0xe0] ss:$16 sps:$4 sm:$0xff]  }
  0x3d   :  { %v7462_v4 = vld [vmem:[#allocation6 + $0xe8] ss:$16 sps:$4 sm:$0xff]   ;;  %v366_v5 = vld [vmem:[%s8464_s1] sm:$0x3]  ;;  %v7512_v9 = vsub.s32 0, %v7509_v8  ;;  %v8475_v10 = vsub.s32 2, %v7509_v8 }
  0x3e   :  { %291 = vmatpush1.bf16.msra.mxu0 %v6646_v23  ;;  %334 = vmatpush1.bf16.msra.mxu1 %v6647_v24  ;;  %v368_v6 = vpack.c.bf16 %v366_v5, %v366_v5  ;;  %v98_v11 = vld [vmem:[%s8468_s5] sm:$0xf]  ;;  %v8474_v12 = vsub.s32 3, %v7509_v8  ;;  %v7520_v13 = vsub.s32 1, %v7509_v8  ;;  %s7282_s17 = smov [#allocation9]  }
  0x3f   :  { %292 = vmatprep.subr.bf16.mxu0 %v6648_v25  ;;  %335 = vmatprep.subr.bf16.mxu1 %v6650_v26  ;;  %v103_v14 = vrot.slane %v98_v11, %v7512_v9  ;;  %v111_v15 = vrot.slane %v98_v11, %v8475_v10  ;;  %s5941_s3 = sshll.u32 %s7282_s17, 4  ;;  %s8415_s3 = int_to_ptr.vmem [resolvable:$true] %s5941_s3 }
  0x40   :  { %v115_v18 = vrot.slane %v98_v11, %v8474_v12  ;;  %v107_v21 = vrot.slane %v98_v11, %v7520_v13 }
  0x42   :  { %293 = vmatpush1.bf16.msra.mxu0 %v6652_v27  ;;  %336 = vmatpush1.bf16.msra.mxu1 %v6653_v28 }
  0x43   :  { %294 = vmatprep.subr.bf16.mxu0 %v6654_v29  ;;  %337 = vmatprep.subr.bf16.mxu1 %v6656_v30 }
  0x46   :  { %295 = vmatpush1.bf16.msra.mxu0 %v6658_v31  ;;  %338 = vmatpush1.bf16.msra.mxu1 %v6659_v32 }
  0x47   :  { %561 = vmatprep.subr.bf16.mxu0 %v7372_v35  ;;  %602 = vmatprep.subr.bf16.mxu1 %v7374_v36 }
  0x49   :  { %313 = vmatmul.mubr.bf16.vlgmr.msra.gmra.mrb[0].mxu0 %v65_v37  ;;  %356 = vmatmul.mubr.bf16.vlgmr.msra.gmra.mrb[0].mxu1 %v65_v37 }
  0x4a   :  { %562 = vmatpush1.bf16.msra.mxu0 %v7376_v38  ;;  %603 = vmatpush1.bf16.msra.mxu1 %v7378_v39 }
  0x4b   :  { %563 = vmatprep.subr.bf16.mxu0 %v7382_v40  ;;  %604 = vmatprep.subr.bf16.mxu1 %v7384_v41 }
  0x4c   :  { %593 = vmatprep.mubr.bf16.mxu0 %v7280_v0  ;;  %634 = vmatprep.mubr.bf16.mxu1 %v7280_v0 }
  0x4e   :  { %564 = vmatpush1.bf16.msra.mxu0 %v7388_v42  ;;  %605 = vmatpush1.bf16.msra.mxu1 %v7390_v43 }
  0x4f   :  { %565 = vmatprep.subr.bf16.mxu0 %v7394_v44  ;;  %606 = vmatprep.subr.bf16.mxu1 %v7396_v45 }
  0x52   :  { %566 = vmatpush1.bf16.msra.mxu0 %v7402_v46  ;;  %607 = vmatpush1.bf16.msra.mxu1 %v7404_v47 }
  0x53   :  { %567 = vmatprep.subr.bf16.mxu0 %v7408_v48  ;;  %608 = vmatprep.subr.bf16.mxu1 %v7410_v49 }
  0x56   :  { %568 = vmatpush1.bf16.msra.mxu0 %v7412_v50  ;;  %609 = vmatpush1.bf16.msra.mxu1 %v7414_v51 }
  0x57   :  { %569 = vmatprep.subr.bf16.mxu0 %v7416_v52  ;;  %610 = vmatprep.subr.bf16.mxu1 %v7418_v53 }
  0x5a   :  { %570 = vmatpush1.bf16.msra.mxu0 %v7424_v54  ;;  %611 = vmatpush1.bf16.msra.mxu1 %v7426_v55 }
  0x5b   :  { %571 = vmatprep.subr.bf16.mxu0 %v7428_v56  ;;  %612 = vmatprep.subr.bf16.mxu1 %v7430_v57 }
  0x5e   :  { %572 = vmatpush1.bf16.msra.mxu0 %v7436_v58  ;;  %613 = vmatpush1.bf16.msra.mxu1 %v7438_v59 }
  0x5f   :  { %573 = vmatprep.subr.bf16.mxu0 %v7440_v60  ;;  %614 = vmatprep.subr.bf16.mxu1 %v7442_v61 }
  0x62   :  { %574 = vmatpush1.bf16.msra.mxu0 %v7448_v62  ;;  %615 = vmatpush1.bf16.msra.mxu1 %v7450_v63 }
  0x63   :  { %575 = vmatprep.subr.bf16.mxu0 %v7452_v1  ;;  %616 = vmatprep.subr.bf16.mxu1 %v7454_v2 }
  0x66   :  { %576 = vmatpush1.bf16.msra.mxu0 %v7460_v3  ;;  %617 = vmatpush1.bf16.msra.mxu1 %v7462_v4 }
  0x67   :  { %865 = vmatprep.subr.bf16.mxu0 %v7372_v35  ;;  %906 = vmatprep.subr.bf16.mxu1 %v7374_v36 }
  0x69   :  { %594 = vmatmul.mubr.bf16.vlgmr.msra.gmra.mrb[4].mxu0 %v368_v6  ;;  %635 = vmatmul.mubr.bf16.vlgmr.msra.gmra.mrb[4].mxu1 %v368_v6 }
  0x6a   :  { %866 = vmatpush1.bf16.msra.mxu0 %v7376_v38  ;;  %907 = vmatpush1.bf16.msra.mxu1 %v7378_v39 }
  0x6b   :  { %867 = vmatprep.subr.bf16.mxu0 %v7382_v40  ;;  %908 = vmatprep.subr.bf16.mxu1 %v7384_v41 }
  0x6c   :  { %897 = vmatprep.mubr.bf16.mxu0 %v7280_v0  ;;  %938 = vmatprep.mubr.bf16.mxu1 %v7280_v0 }
  0x6e   :  { %868 = vmatpush1.bf16.msra.mxu0 %v7388_v42  ;;  %909 = vmatpush1.bf16.msra.mxu1 %v7390_v43 }
  0x6f   :  { %869 = vmatprep.subr.bf16.mxu0 %v7394_v44  ;;  %910 = vmatprep.subr.bf16.mxu1 %v7396_v45 }
  0x72   :  { %870 = vmatpush1.bf16.msra.mxu0 %v7402_v46  ;;  %911 = vmatpush1.bf16.msra.mxu1 %v7404_v47 }
  0x73   :  { %871 = vmatprep.subr.bf16.mxu0 %v7408_v48  ;;  %912 = vmatprep.subr.bf16.mxu1 %v7410_v49 }
  0x76   :  { %872 = vmatpush1.bf16.msra.mxu0 %v7412_v50  ;;  %913 = vmatpush1.bf16.msra.mxu1 %v7414_v51 }
  0x77   :  { %873 = vmatprep.subr.bf16.mxu0 %v7416_v52  ;;  %914 = vmatprep.subr.bf16.mxu1 %v7418_v53 }
  0x7a   :  { %874 = vmatpush1.bf16.msra.mxu0 %v7424_v54  ;;  %915 = vmatpush1.bf16.msra.mxu1 %v7426_v55 }
  0x7b   :  { %875 = vmatprep.subr.bf16.mxu0 %v7428_v56  ;;  %916 = vmatprep.subr.bf16.mxu1 %v7430_v57 }
  0x7e   :  { %876 = vmatpush1.bf16.msra.mxu0 %v7436_v58  ;;  %917 = vmatpush1.bf16.msra.mxu1 %v7438_v59 }
  0x7f   :  { %877 = vmatprep.subr.bf16.mxu0 %v7440_v60  ;;  %918 = vmatprep.subr.bf16.mxu1 %v7442_v61 }
  0x82   :  { %878 = vmatpush1.bf16.msra.mxu0 %v7448_v62  ;;  %919 = vmatpush1.bf16.msra.mxu1 %v7450_v63 }
  0x83   :  { %879 = vmatprep.subr.bf16.mxu0 %v7452_v1  ;;  %920 = vmatprep.subr.bf16.mxu1 %v7454_v2 }
  0x86   :  { %880 = vmatpush1.bf16.msra.mxu0 %v7460_v3  ;;  %921 = vmatpush1.bf16.msra.mxu1 %v7462_v4 }
  0x87   :  { %1187 = vmatprep.subr.bf16.mxu0 %v7372_v35  ;;  %1228 = vmatprep.subr.bf16.mxu1 %v7374_v36 }
 0x11c   :  { %v314_v16 = vpop.f32.mrb[0].mxu0  ;;  %v357_v17 = vpop.f32.mrb[0].mxu1 }
 0x11d   :  { %v316_v19 = vpop.f32.mrb[1].mxu0  ;;  %v359_v20 = vpop.f32.mrb[1].mxu1  ;;  %v7536_v30 = vadd.f32 %v314_v16, %v103_v14  ;;  %v7545_v16 = vadd.f32 %v357_v17, %v111_v15 }
 0x11e   :  { %v318_v22 = vpop.f32.mrb[2].mxu0  ;;  %v361_v23 = vpop.f32.mrb[2].mxu1  ;;  %v7538_v31 = vadd.f32 %v316_v19, %v107_v21 }
 0x11f   :  { %v7528_v24 = vadd.f32 %v318_v22, %v103_v14  ;;  %v320_v25 = vpop.f32.mrb[3].mxu0  ;;  %v7530_v26 = vadd.f32 %v361_v23, %v111_v15  ;;  %v363_v27 = vpop.f32.mrb[3].mxu1 }
 0x120   :  { %v7532_v28 = vadd.f32 %v320_v25, %v107_v21  ;;  %v7534_v29 = vadd.f32 %v363_v27, %v115_v18  ;;  %v7542_v27 = vadd.f32 %v359_v20, %v115_v18 }
 0x13c   :  { %v595_v32 = vpop.f32.mrb[4].mxu0  ;;  %v636_v33 = vpop.f32.mrb[4].mxu1 }
 0x13d   :  { %v643_v34 = vadd.f32 %v595_v32, %v7536_v30  ;;  %v597_v37 = vpop.f32.mrb[5].mxu0  ;;  %v638_v5 = vpop.f32.mrb[5].mxu1  ;;  %v645_v21 = vadd.f32 %v636_v33, %v7545_v16 }
 0x13e   :  { %v644_v6 = vadd.f32 %v597_v37, %v7538_v31  ;;  %v599_v7 = vpop.f32.mrb[6].mxu0  ;;  %v640_v11 = vpop.f32.mrb[6].mxu1  ;;  %v646_v14 = vadd.f32 %v638_v5, %v7542_v27 }
 0x13f   :  { %v6024_v22 = vmul.f32 -1.442695, %v643_v34  ;;  %v600_v23 = vpop.f32.mrb[7].mxu0  ;;  %v641_v25 = vpop.f32.mrb[7].mxu1 }
 0x140   :  { %v6025_v12 = vmul.f32 -1.442695, %v644_v6  ;;  %v6026_v19 = vmul.f32 -1.442695, %v646_v14 }
 0x141   :  { %6924 = vpow2.f32 %v6024_v22 }
 0x142   :  { %6926 = vpow2.f32 %v6025_v12  ;;  %v367_v12 = vld [vmem:[%s8465_s2] sm:$0x3] }
 0x143   :  { %6928 = vpow2.f32 %v6026_v19 }
 0x144   :  { %6930 = vtanh.f32 %v645_v21 }
 0x14b   :  { %v6925_v32 = vpop.eup %6924 }
 0x14c   :  { %v6927_v10 = vpop.eup %6926  ;;  %v650_v37 = vadd.f32 1.0, %v6925_v32 }
 0x14d   :  { %v656_v34 = vadd.f32 1.0, %v6927_v10  ;;  %v6929_v6 = vpop.eup %6928 }
 0x14e   :  { %6932 = vrcp.f32 %v650_v37  ;;  %v6931_v7 = vpop.eup %6930  ;;  %v663_v20 = vadd.f32 1.0, %v6929_v6 }
 0x14f   :  { %6934 = vrcp.f32 %v656_v34 }
 0x150   :  { %6936 = vrcp.f32 %v663_v20 }
 0x158   :  { %v6933_v18 = vpop.eup %6932 }
 0x159   :  { %v6935_v15 = vpop.eup %6934  ;;  %v667_v17 = vmul.f32 %v6933_v18, %v6931_v7 }
 0x15a   :  { %v666_v5 = vmul.f32 %v6935_v15, %v367_v12  ;;  %v6937_v11 = vpop.eup %6936 }
 0x15c   :  { %v7551_v33 = vadd.f32 %v667_v17, %v666_v5 }
 0x15e   :  { %6938 = vtanh.f32 %v7551_v33 }
 0x168   :  { %v6939_v10 = vpop.eup %6938 }
 0x169   :  { %v670_v22 = vmul.f32 %v6939_v10, %v6937_v11 }
 0x16b   :  { %671 = vst [vmem:[#allocation2] sm:$0x3] %v670_v22  ;;  %v672_v23 = vpack.c.bf16 %v670_v22, %v670_v22 }
 0x16d   :  { %898 = vmatmul.mubr.bf16.vlgmr.msra.gmra.mrb[8].mxu0 %v672_v23  ;;  %939 = vmatmul.mubr.bf16.vlgmr.msra.gmra.mrb[8].mxu1 %v672_v23 }
 0x16e   :  { %1188 = vmatpush1.bf16.msra.mxu0 %v7376_v38  ;;  %1229 = vmatpush1.bf16.msra.mxu1 %v7378_v39 }
 0x16f   :  { %1189 = vmatprep.subr.bf16.mxu0 %v7382_v40  ;;  %1230 = vmatprep.subr.bf16.mxu1 %v7384_v41 }
 0x170   :  { %1219 = vmatprep.mubr.bf16.mxu0 %v7280_v0  ;;  %1260 = vmatprep.mubr.bf16.mxu1 %v7280_v0 }
 0x172   :  { %1190 = vmatpush1.bf16.msra.mxu0 %v7388_v42  ;;  %1231 = vmatpush1.bf16.msra.mxu1 %v7390_v43 }
 0x173   :  { %1191 = vmatprep.subr.bf16.mxu0 %v7394_v44  ;;  %1232 = vmatprep.subr.bf16.mxu1 %v7396_v45 }
 0x176   :  { %1192 = vmatpush1.bf16.msra.mxu0 %v7402_v46  ;;  %1233 = vmatpush1.bf16.msra.mxu1 %v7404_v47 }
 0x177   :  { %1193 = vmatprep.subr.bf16.mxu0 %v7408_v48  ;;  %1234 = vmatprep.subr.bf16.mxu1 %v7410_v49 }
 0x17a   :  { %1194 = vmatpush1.bf16.msra.mxu0 %v7412_v50  ;;  %1235 = vmatpush1.bf16.msra.mxu1 %v7414_v51 }
 0x17b   :  { %1195 = vmatprep.subr.bf16.mxu0 %v7416_v52  ;;  %1236 = vmatprep.subr.bf16.mxu1 %v7418_v53 }
 0x17e   :  { %1196 = vmatpush1.bf16.msra.mxu0 %v7424_v54  ;;  %1237 = vmatpush1.bf16.msra.mxu1 %v7426_v55 }
 0x17f   :  { %1197 = vmatprep.subr.bf16.mxu0 %v7428_v56  ;;  %1238 = vmatprep.subr.bf16.mxu1 %v7430_v57 }
 0x182   :  { %1198 = vmatpush1.bf16.msra.mxu0 %v7436_v58  ;;  %1239 = vmatpush1.bf16.msra.mxu1 %v7438_v59 }
 0x183   :  { %1199 = vmatprep.subr.bf16.mxu0 %v7440_v60  ;;  %1240 = vmatprep.subr.bf16.mxu1 %v7442_v61 }
 0x186   :  { %1200 = vmatpush1.bf16.msra.mxu0 %v7448_v62  ;;  %1241 = vmatpush1.bf16.msra.mxu1 %v7450_v63 }
 0x187   :  { %1201 = vmatprep.subr.bf16.mxu0 %v7452_v1  ;;  %1242 = vmatprep.subr.bf16.mxu1 %v7454_v2 }
 0x18a   :  { %1202 = vmatpush1.bf16.msra.mxu0 %v7460_v3  ;;  %1243 = vmatpush1.bf16.msra.mxu1 %v7462_v4 }
 0x18b   :  { %1509 = vmatprep.subr.bf16.mxu0 %v7372_v35  ;;  %1550 = vmatprep.subr.bf16.mxu1 %v7374_v36 }
 0x240   :  { %v899_v25 = vpop.f32.mrb[8].mxu0  ;;  %v940_v14 = vpop.f32.mrb[8].mxu1 }
 0x241   :  { %v951_v19 = vrot.slane %v899_v25, 6  ;;  %v901_v21 = vpop.f32.mrb[9].mxu0  ;;  %v942_v32 = vpop.f32.mrb[9].mxu1  ;;  %v953_v36 = vrot.slane %v940_v14, 6 }
 0x242   :  { %v952_v37 = vrot.slane %v901_v21, 6  ;;  %v903_v34 = vpop.f32.mrb[10].mxu0  ;;  %v944_v6 = vpop.f32.mrb[10].mxu1  ;;  %v954_v5 = vrot.slane %v942_v32, 6  ;;  %v983_v32 = vrot.slane %v7551_v33, 6 }
 0x243   :  { %v959_v7 = vadd.f32 %v951_v19, %v7536_v30  ;;  %v904_v12 = vpop.f32.mrb[11].mxu0  ;;  %v945_v18 = vpop.f32.mrb[11].mxu1  ;;  %v961_v10 = vadd.f32 %v953_v36, %v7545_v16 }
 0x244   :  { %v960_v15 = vadd.f32 %v952_v37, %v7538_v31  ;;  %v962_v35 = vadd.f32 %v954_v5, %v7542_v27 }
 0x245   :  { %v6059_v17 = vmul.f32 -1.442695, %v959_v7 }
 0x246   :  { %v6060_v20 = vmul.f32 -1.442695, %v960_v15  ;;  %v6061_v11 = vmul.f32 -1.442695, %v962_v35 }
 0x247   :  { %6940 = vpow2.f32 %v6059_v17 }
 0x248   :  { %6942 = vpow2.f32 %v6060_v20 }
 0x249   :  { %6944 = vpow2.f32 %v6061_v11 }
 0x24a   :  { %6946 = vtanh.f32 %v961_v10 }
 0x251   :  { %v6941_v22 = vpop.eup %6940 }
 0x252   :  { %v6943_v23 = vpop.eup %6942  ;;  %v966_v25 = vadd.f32 1.0, %v6941_v22 }
 0x253   :  { %v972_v19 = vadd.f32 1.0, %v6943_v23  ;;  %v6945_v21 = vpop.eup %6944 }
 0x254   :  { %6948 = vrcp.f32 %v966_v25  ;;  %v6947_v37 = vpop.eup %6946  ;;  %v979_v12 = vadd.f32 1.0, %v6945_v21  ;;  %v7640_v21 = vld [vmem:[#allocation6 + $0xc] ss:$16 sps:$4 sm:$0xff]  }
 0x255   :  { %6950 = vrcp.f32 %v972_v19  ;;  %v7638_v19 = vld [vmem:[#allocation6 + $0x4] ss:$16 sps:$4 sm:$0xff]  }
 0x256   :  { %6952 = vrcp.f32 %v979_v12  ;;  %v7656_v12 = vld [vmem:[#allocation6 + $0x28] ss:$16 sps:$4 sm:$0xff]  }
 0x25e   :  { %v6949_v34 = vpop.eup %6948 }
 0x25f   :  { %v6951_v6 = vpop.eup %6950  ;;  %v986_v7 = vmul.f32 %v6949_v34, %v6947_v37  ;;  %v7642_v37 = vld [vmem:[#allocation6] ss:$16 sps:$4 sm:$0xff]   ;;  %v7644_v34 = vld [vmem:[#allocation6 + $0x8] ss:$16 sps:$4 sm:$0xff]  }
 0x260   :  { %v985_v14 = vmul.f32 %v6951_v6, %v983_v32  ;;  %v6953_v15 = vpop.eup %6952  ;;  %v7650_v32 = vld [vmem:[#allocation6 + $0x24] ss:$16 sps:$4 sm:$0xff]   ;;  %v7652_v6 = vld [vmem:[#allocation6 + $0x2c] ss:$16 sps:$4 sm:$0xff]  }
 0x262   :  { %v7593_v18 = vadd.f32 %v986_v7, %v985_v14  ;;  %v7654_v7 = vld [vmem:[#allocation6 + $0x20] ss:$16 sps:$4 sm:$0xff]   ;;  %v7662_v14 = vld [vmem:[#allocation6 + $0x44] ss:$16 sps:$4 sm:$0xff]  }
 0x264   :  { %6954 = vtanh.f32 %v7593_v18 }
 0x26e   :  { %v6955_v17 = vpop.eup %6954 }
 0x26f   :  { %v989_v20 = vmul.f32 %v6955_v17, %v6953_v15  ;;  %v7666_v15 = vld [vmem:[#allocation6 + $0x40] ss:$16 sps:$4 sm:$0xff]   ;;  %v7668_v17 = vld [vmem:[#allocation6 + $0x48] ss:$16 sps:$4 sm:$0xff]  }
 0x271   :  { %990 = vst [vmem:[#allocation2] sm:$0xc] %v989_v20  ;;  %v991_v5 = vpack.c.bf16 %v989_v20, %v989_v20  ;;  %v7674_v20 = vld [vmem:[#allocation6 + $0x64] ss:$16 sps:$4 sm:$0xff]  }
 0x273   :  { %v1025_v35 = vrot.slane %v991_v5, 1  ;;  %v7676_v5 = vld [vmem:[#allocation6 + $0x6c] ss:$16 sps:$4 sm:$0xff]  }
 0x275   :  { %1220 = vmatmul.mubr.bf16.vlgmr.msra.gmra.mrb[12].mxu0 %v1025_v35  ;;  %1261 = vmatmul.mubr.bf16.vlgmr.msra.gmra.mrb[12].mxu1 %v1025_v35  ;;  %v7678_v35 = vld [vmem:[#allocation6 + $0x60] ss:$16 sps:$4 sm:$0xff]  }
 0x276   :  { %1510 = vmatpush1.bf16.msra.mxu0 %v7376_v38  ;;  %1551 = vmatpush1.bf16.msra.mxu1 %v7378_v39 }
 0x277   :  { %1511 = vmatprep.subr.bf16.mxu0 %v7382_v40  ;;  %1552 = vmatprep.subr.bf16.mxu1 %v7384_v41 }
 0x278   :  { %1541 = vmatprep.mubr.bf16.mxu0 %v7280_v0  ;;  %1582 = vmatprep.mubr.bf16.mxu1 %v7280_v0 }
 0x27a   :  { %1512 = vmatpush1.bf16.msra.mxu0 %v7388_v42  ;;  %1553 = vmatpush1.bf16.msra.mxu1 %v7390_v43 }
 0x27b   :  { %1513 = vmatprep.subr.bf16.mxu0 %v7394_v44  ;;  %1554 = vmatprep.subr.bf16.mxu1 %v7396_v45 }
 0x27e   :  { %1514 = vmatpush1.bf16.msra.mxu0 %v7402_v46  ;;  %1555 = vmatpush1.bf16.msra.mxu1 %v7404_v47 }
 0x27f   :  { %1515 = vmatprep.subr.bf16.mxu0 %v7408_v48  ;;  %1556 = vmatprep.subr.bf16.mxu1 %v7410_v49 }
 0x282   :  { %1516 = vmatpush1.bf16.msra.mxu0 %v7412_v50  ;;  %1557 = vmatpush1.bf16.msra.mxu1 %v7414_v51 }
 0x283   :  { %1517 = vmatprep.subr.bf16.mxu0 %v7416_v52  ;;  %1558 = vmatprep.subr.bf16.mxu1 %v7418_v53 }
 0x286   :  { %1518 = vmatpush1.bf16.msra.mxu0 %v7424_v54  ;;  %1559 = vmatpush1.bf16.msra.mxu1 %v7426_v55 }
 0x287   :  { %1519 = vmatprep.subr.bf16.mxu0 %v7428_v56  ;;  %1560 = vmatprep.subr.bf16.mxu1 %v7430_v57 }
 0x28a   :  { %1520 = vmatpush1.bf16.msra.mxu0 %v7436_v58  ;;  %1561 = vmatpush1.bf16.msra.mxu1 %v7438_v59 }
 0x28b   :  { %1521 = vmatprep.subr.bf16.mxu0 %v7440_v60  ;;  %1562 = vmatprep.subr.bf16.mxu1 %v7442_v61 }
 0x28e   :  { %1522 = vmatpush1.bf16.msra.mxu0 %v7448_v62  ;;  %1563 = vmatpush1.bf16.msra.mxu1 %v7450_v63 }
 0x28f   :  { %1523 = vmatprep.subr.bf16.mxu0 %v7452_v1  ;;  %1564 = vmatprep.subr.bf16.mxu1 %v7454_v2  ;;  %v1305_v1 = vrot.slane %v7593_v18, 6  ;;  %v7664_v18 = vld [vmem:[#allocation6 + $0x4c] ss:$16 sps:$4 sm:$0xff]  }
 0x292   :  { %1524 = vmatpush1.bf16.msra.mxu0 %v7460_v3  ;;  %1565 = vmatpush1.bf16.msra.mxu1 %v7462_v4 }
 0x293   :  { %1831 = vmatprep.subr.bf16.mxu0 %v7638_v19  ;;  %1872 = vmatprep.subr.bf16.mxu1 %v7640_v21 }
 0x348   :  { %v1221_v38 = vpop.f32.mrb[12].mxu0  ;;  %v1262_v39 = vpop.f32.mrb[12].mxu1 }
 0x349   :  { %v1273_v40 = vrot.slane %v1221_v38, 4  ;;  %v1223_v41 = vpop.f32.mrb[13].mxu0  ;;  %v1264_v42 = vpop.f32.mrb[13].mxu1  ;;  %v1275_v54 = vrot.slane %v1262_v39, 4  ;;  %v7680_v38 = vld [vmem:[#allocation6 + $0x68] ss:$16 sps:$4 sm:$0xff]  }
 0x34a   :  { %v1274_v43 = vrot.slane %v1223_v41, 4  ;;  %v1225_v44 = vpop.f32.mrb[14].mxu0  ;;  %v1266_v45 = vpop.f32.mrb[14].mxu1  ;;  %v1276_v52 = vrot.slane %v1264_v42, 4  ;;  %v7684_v39 = vld [vmem:[#allocation6 + $0x84] ss:$16 sps:$4 sm:$0xff]  }
 0x34b   :  { %v1281_v46 = vadd.f32 %v1273_v40, %v7536_v30  ;;  %v1226_v47 = vpop.f32.mrb[15].mxu0  ;;  %v1267_v48 = vpop.f32.mrb[15].mxu1  ;;  %v1283_v56 = vadd.f32 %v1275_v54, %v7545_v16  ;;  %v7688_v40 = vld [vmem:[#allocation6 + $0x80] ss:$16 sps:$4 sm:$0xff]   ;;  %v7690_v41 = vld [vmem:[#allocation6 + $0x88] ss:$16 sps:$4 sm:$0xff]  }
 0x34c   :  { %v1282_v49 = vadd.f32 %v1274_v43, %v7538_v31  ;;  %v1284_v53 = vadd.f32 %v1276_v52, %v7542_v27  ;;  %v7692_v42 = vld [vmem:[#allocation6 + $0x8c] ss:$16 sps:$4 sm:$0xff]   ;;  %v7695_v43 = vld [vmem:[#allocation6 + $0xa4] ss:$16 sps:$4 sm:$0xff]   ;;  %v7702_v45 = vld [vmem:[#allocation6 + $0xa0] ss:$16 sps:$4 sm:$0xff]  }
 0x34d   :  { %v6094_v50 = vmul.f32 -1.442695, %v1281_v46  ;;  %v7697_v44 = vld [vmem:[#allocation6 + $0xac] ss:$16 sps:$4 sm:$0xff]   ;;  %v7704_v46 = vld [vmem:[#allocation6 + $0xa8] ss:$16 sps:$4 sm:$0xff]  }
 0x34e   :  { %v6095_v51 = vmul.f32 -1.442695, %v1282_v49  ;;  %v6096_v55 = vmul.f32 -1.442695, %v1284_v53  ;;  %v7708_v47 = vld [vmem:[#allocation6 + $0xc4] ss:$16 sps:$4 sm:$0xff]  }
 0x34f   :  { %6956 = vpow2.f32 %v6094_v50  ;;  %v7710_v48 = vld [vmem:[#allocation6 + $0xcc] ss:$16 sps:$4 sm:$0xff]   ;;  %v7714_v49 = vld [vmem:[#allocation6 + $0xc0] ss:$16 sps:$4 sm:$0xff]   ;;  %v7716_v50 = vld [vmem:[#allocation6 + $0xc8] ss:$16 sps:$4 sm:$0xff]  }
 0x350   :  { %6958 = vpow2.f32 %v6095_v51  ;;  %v7720_v51 = vld [vmem:[#allocation6 + $0xe4] ss:$16 sps:$4 sm:$0xff]   ;;  %v7722_v52 = vld [vmem:[#allocation6 + $0xec] ss:$16 sps:$4 sm:$0xff]   ;;  %v7726_v53 = vld [vmem:[#allocation6 + $0xe0] ss:$16 sps:$4 sm:$0xff]  }
 0x351   :  { %6960 = vpow2.f32 %v6096_v55  ;;  %v7728_v54 = vld [vmem:[#allocation6 + $0xe8] ss:$16 sps:$4 sm:$0xff]  }
 0x352   :  { %6962 = vtanh.f32 %v1283_v56 }
 0x359   :  { %v6957_v57 = vpop.eup %6956 }
 0x35a   :  { %v6959_v58 = vpop.eup %6958  ;;  %v1288_v59 = vadd.f32 1.0, %v6957_v57 }
 0x35b   :  { %v1294_v60 = vadd.f32 1.0, %v6959_v58  ;;  %v6961_v61 = vpop.eup %6960 }
 0x35c   :  { %6964 = vrcp.f32 %v1288_v59  ;;  %v6963_v62 = vpop.eup %6962  ;;  %v1301_v4 = vadd.f32 1.0, %v6961_v61 }
 0x35d   :  { %6966 = vrcp.f32 %v1294_v60 }
 0x35e   :  { %6968 = vrcp.f32 %v1301_v4 }
 0x366   :  { %v6965_v63 = vpop.eup %6964 }
 0x367   :  { %v6967_v2 = vpop.eup %6966  ;;  %v1308_v3 = vmul.f32 %v6965_v63, %v6963_v62 }
 0x368   :  { %v1307_v33 = vmul.f32 %v6967_v2, %v1305_v1  ;;  %v6969_v11 = vpop.eup %6968 }
 0x36a   :  { %v7633_v36 = vadd.f32 %v1308_v3, %v1307_v33 }
 0x36c   :  { %6970 = vtanh.f32 %v7633_v36 }
 0x376   :  { %v6971_v10 = vpop.eup %6970 }
 0x377   :  { %v1311_v22 = vmul.f32 %v6971_v10, %v6969_v11 }
 0x379   :  { %1312 = vst [vmem:[#allocation2] sm:$0x30] %v1311_v22  ;;  %v1313_v23 = vpack.c.bf16 %v1311_v22, %v1311_v22 }
 0x37b   :  { %v1347_v25 = vrot.slane %v1313_v23, 2 }
 0x37d   :  { %1542 = vmatmul.mubr.bf16.vlgmr.msra.gmra.mrb[16].mxu0 %v1347_v25  ;;  %1583 = vmatmul.mubr.bf16.vlgmr.msra.gmra.mrb[16].mxu1 %v1347_v25 }
 0x37e   :  { %1863 = vmatprep.mubr.bf16.mxu0 %v7280_v0  ;;  %1904 = vmatprep.mubr.bf16.mxu1 %v7280_v0 }
 0x37f   :  { %1832 = vmatpush1.bf16.msra.mxu0 %v7642_v37  ;;  %1873 = vmatpush1.bf16.msra.mxu1 %v7644_v34 }
 0x380   :  { %1833 = vmatprep.subr.bf16.mxu0 %v7650_v32  ;;  %1874 = vmatprep.subr.bf16.mxu1 %v7652_v6 }
 0x383   :  { %1834 = vmatpush1.bf16.msra.mxu0 %v7654_v7  ;;  %1875 = vmatpush1.bf16.msra.mxu1 %v7656_v12 }
 0x384   :  { %1835 = vmatprep.subr.bf16.mxu0 %v7662_v14  ;;  %1876 = vmatprep.subr.bf16.mxu1 %v7664_v18 }
 0x387   :  { %1836 = vmatpush1.bf16.msra.mxu0 %v7666_v15  ;;  %1877 = vmatpush1.bf16.msra.mxu1 %v7668_v17 }
 0x388   :  { %1837 = vmatprep.subr.bf16.mxu0 %v7674_v20  ;;  %1878 = vmatprep.subr.bf16.mxu1 %v7676_v5 }
 0x38b   :  { %1838 = vmatpush1.bf16.msra.mxu0 %v7678_v35  ;;  %1879 = vmatpush1.bf16.msra.mxu1 %v7680_v38 }
 0x38c   :  { %1839 = vmatprep.subr.bf16.mxu0 %v7684_v39  ;;  %1880 = vmatprep.subr.bf16.mxu1 %v7692_v42 }
 0x38f   :  { %1840 = vmatpush1.bf16.msra.mxu0 %v7688_v40  ;;  %1881 = vmatpush1.bf16.msra.mxu1 %v7690_v41 }
 0x390   :  { %1841 = vmatprep.subr.bf16.mxu0 %v7695_v43  ;;  %1882 = vmatprep.subr.bf16.mxu1 %v7697_v44 }
 0x393   :  { %1842 = vmatpush1.bf16.msra.mxu0 %v7702_v45  ;;  %1883 = vmatpush1.bf16.msra.mxu1 %v7704_v46 }
 0x394   :  { %1843 = vmatprep.subr.bf16.mxu0 %v7708_v47  ;;  %1884 = vmatprep.subr.bf16.mxu1 %v7710_v48 }
 0x397   :  { %1844 = vmatpush1.bf16.msra.mxu0 %v7714_v49  ;;  %1885 = vmatpush1.bf16.msra.mxu1 %v7716_v50 }
 0x398   :  { %1845 = vmatprep.subr.bf16.mxu0 %v7720_v51  ;;  %1886 = vmatprep.subr.bf16.mxu1 %v7722_v52 }
 0x39b   :  { %1846 = vmatpush1.bf16.msra.mxu0 %v7726_v53  ;;  %1887 = vmatpush1.bf16.msra.mxu1 %v7728_v54 }
 0x39c   :  { %2138 = vmatprep.subr.bf16.mxu0 %v7638_v19  ;;  %2179 = vmatprep.subr.bf16.mxu1 %v7640_v21 }
 0x450   :  { %v1543_v55 = vpop.f32.mrb[16].mxu0  ;;  %v1584_v56 = vpop.f32.mrb[16].mxu1 }
 0x451   :  { %v1595_v57 = vrot.slane %v1543_v55, 2  ;;  %v1545_v58 = vpop.f32.mrb[17].mxu0  ;;  %v1586_v59 = vpop.f32.mrb[17].mxu1  ;;  %v1597_v22 = vrot.slane %v1584_v56, 2 }
 0x452   :  { %v1596_v60 = vrot.slane %v1545_v58, 2  ;;  %v1547_v61 = vpop.f32.mrb[18].mxu0  ;;  %v1588_v62 = vpop.f32.mrb[18].mxu1  ;;  %v1598_v11 = vrot.slane %v1586_v59, 2  ;;  %v1627_v59 = vrot.slane %v7633_v36, 6 }
 0x453   :  { %v1603_v63 = vadd.f32 %v1595_v57, %v7536_v30  ;;  %v1548_v1 = vpop.f32.mrb[19].mxu0  ;;  %v1589_v2 = vpop.f32.mrb[19].mxu1  ;;  %v1605_v25 = vadd.f32 %v1597_v22, %v7545_v16 }
 0x454   :  { %v1604_v3 = vadd.f32 %v1596_v60, %v7538_v31  ;;  %v1606_v10 = vadd.f32 %v1598_v11, %v7542_v27 }
 0x455   :  { %v6129_v4 = vmul.f32 -1.442695, %v1603_v63 }
 0x456   :  { %v6130_v33 = vmul.f32 -1.442695, %v1604_v3  ;;  %v6131_v23 = vmul.f32 -1.442695, %v1606_v10 }
 0x457   :  { %6972 = vpow2.f32 %v6129_v4 }
 0x458   :  { %6974 = vpow2.f32 %v6130_v33 }
 0x459   :  { %6976 = vpow2.f32 %v6131_v23 }
 0x45a   :  { %6978 = vtanh.f32 %v1605_v25 }
 0x461   :  { %v6973_v55 = vpop.eup %6972 }
 0x462   :  { %v6975_v58 = vpop.eup %6974  ;;  %v1610_v61 = vadd.f32 1.0, %v6973_v55 }
 0x463   :  { %v1616_v30 = vadd.f32 1.0, %v6975_v58  ;;  %v6977_v31 = vpop.eup %6976 }
 0x464   :  { %6980 = vrcp.f32 %v1610_v61  ;;  %v6979_v57 = vpop.eup %6978  ;;  %v1623_v27 = vadd.f32 1.0, %v6977_v31 }
 0x465   :  { %6982 = vrcp.f32 %v1616_v30 }
 0x466   :  { %6984 = vrcp.f32 %v1623_v27 }
 0x46e   :  { %v6981_v60 = vpop.eup %6980 }
 0x46f   :  { %v6983_v62 = vpop.eup %6982  ;;  %v1630_v63 = vmul.f32 %v6981_v60, %v6979_v57 }
 0x470   :  { %v1629_v56 = vmul.f32 %v6983_v62, %v1627_v59  ;;  %v6985_v16 = vpop.eup %6984 }
 0x472   :  { %v7741_v1 = vadd.f32 %v1630_v63, %v1629_v56 }
 0x474   :  { %6986 = vtanh.f32 %v7741_v1 }
 0x47e   :  { %v6987_v2 = vpop.eup %6986 }
 0x47f   :  { %v1633_v3 = vmul.f32 %v6987_v2, %v6985_v16 }
 0x481   :  { %1634 = vst [vmem:[#allocation2] sm:$0xc0] %v1633_v3  ;;  %v1635_v4 = vpack.c.bf16 %v1633_v3, %v1633_v3 }
 0x483   :  { %v1669_v33 = vrot.slane %v1635_v4, 3 }
 0x485   :  { %1864 = vmatmul.mubr.bf16.vlgmr.msra.gmra.mrb[20].mxu0 %v1669_v33  ;;  %1905 = vmatmul.mubr.bf16.vlgmr.msra.gmra.mrb[20].mxu1 %v1669_v33  ;;  %v1937_v33 = vrot.slane %v7741_v1, 6 }
 0x486   :  { %2139 = vmatpush1.bf16.msra.mxu0 %v7642_v37  ;;  %2180 = vmatpush1.bf16.msra.mxu1 %v7644_v34 }
 0x487   :  { %2140 = vmatprep.subr.bf16.mxu0 %v7650_v32  ;;  %2181 = vmatprep.subr.bf16.mxu1 %v7652_v6 }
 0x488   :  { %2170 = vmatprep.mubr.bf16.mxu0 %v7280_v0  ;;  %2211 = vmatprep.mubr.bf16.mxu1 %v7280_v0 }
 0x48a   :  { %2141 = vmatpush1.bf16.msra.mxu0 %v7654_v7  ;;  %2182 = vmatpush1.bf16.msra.mxu1 %v7656_v12 }
 0x48b   :  { %2142 = vmatprep.subr.bf16.mxu0 %v7662_v14  ;;  %2183 = vmatprep.subr.bf16.mxu1 %v7664_v18 }
 0x48e   :  { %2143 = vmatpush1.bf16.msra.mxu0 %v7666_v15  ;;  %2184 = vmatpush1.bf16.msra.mxu1 %v7668_v17 }
 0x48f   :  { %2144 = vmatprep.subr.bf16.mxu0 %v7674_v20  ;;  %2185 = vmatprep.subr.bf16.mxu1 %v7676_v5 }
 0x492   :  { %2145 = vmatpush1.bf16.msra.mxu0 %v7678_v35  ;;  %2186 = vmatpush1.bf16.msra.mxu1 %v7680_v38 }
 0x493   :  { %2146 = vmatprep.subr.bf16.mxu0 %v7684_v39  ;;  %2187 = vmatprep.subr.bf16.mxu1 %v7692_v42 }
 0x496   :  { %2147 = vmatpush1.bf16.msra.mxu0 %v7688_v40  ;;  %2188 = vmatpush1.bf16.msra.mxu1 %v7690_v41 }
 0x497   :  { %2148 = vmatprep.subr.bf16.mxu0 %v7695_v43  ;;  %2189 = vmatprep.subr.bf16.mxu1 %v7697_v44 }
 0x49a   :  { %2149 = vmatpush1.bf16.msra.mxu0 %v7702_v45  ;;  %2190 = vmatpush1.bf16.msra.mxu1 %v7704_v46 }
 0x49b   :  { %2150 = vmatprep.subr.bf16.mxu0 %v7708_v47  ;;  %2191 = vmatprep.subr.bf16.mxu1 %v7710_v48 }
 0x49e   :  { %2151 = vmatpush1.bf16.msra.mxu0 %v7714_v49  ;;  %2192 = vmatpush1.bf16.msra.mxu1 %v7716_v50 }
 0x49f   :  { %2152 = vmatprep.subr.bf16.mxu0 %v7720_v51  ;;  %2193 = vmatprep.subr.bf16.mxu1 %v7722_v52 }
 0x4a2   :  { %2153 = vmatpush1.bf16.msra.mxu0 %v7726_v53  ;;  %2194 = vmatpush1.bf16.msra.mxu1 %v7728_v54 }
 0x4a3   :  { %2460 = vmatprep.subr.bf16.mxu0 %v7638_v19  ;;  %2501 = vmatprep.subr.bf16.mxu1 %v7640_v21 }
 0x558   :  { %v1865_v36 = vpop.f32.mrb[20].mxu0  ;;  %v1906_v11 = vpop.f32.mrb[20].mxu1 }
 0x559   :  { %v1913_v10 = vadd.f32 %v1865_v36, %v7528_v24  ;;  %v1867_v22 = vpop.f32.mrb[21].mxu0  ;;  %v1908_v23 = vpop.f32.mrb[21].mxu1  ;;  %v1915_v62 = vadd.f32 %v1906_v11, %v7530_v26 }
 0x55a   :  { %v1914_v25 = vadd.f32 %v1867_v22, %v7532_v28  ;;  %v1869_v55 = vpop.f32.mrb[22].mxu0  ;;  %v1910_v58 = vpop.f32.mrb[22].mxu1  ;;  %v1916_v60 = vadd.f32 %v1908_v23, %v7534_v29 }
 0x55b   :  { %v6164_v61 = vmul.f32 -1.442695, %v1913_v10  ;;  %v1870_v30 = vpop.f32.mrb[23].mxu0  ;;  %v1911_v31 = vpop.f32.mrb[23].mxu1 }
 0x55c   :  { %v6165_v57 = vmul.f32 -1.442695, %v1914_v25  ;;  %v6166_v59 = vmul.f32 -1.442695, %v1916_v60 }
 0x55d   :  { %6988 = vpow2.f32 %v6164_v61 }
 0x55e   :  { %6990 = vpow2.f32 %v6165_v57 }
 0x55f   :  { %6992 = vpow2.f32 %v6166_v59 }
 0x560   :  { %6994 = vtanh.f32 %v1915_v62 }
 0x567   :  { %v6989_v63 = vpop.eup %6988 }
 0x568   :  { %v6991_v27 = vpop.eup %6990  ;;  %v1920_v56 = vadd.f32 1.0, %v6989_v63 }
 0x569   :  { %v1926_v16 = vadd.f32 1.0, %v6991_v27  ;;  %v6993_v2 = vpop.eup %6992 }
 0x56a   :  { %6996 = vrcp.f32 %v1920_v56  ;;  %v6995_v3 = vpop.eup %6994  ;;  %v1933_v22 = vadd.f32 1.0, %v6993_v2 }
 0x56b   :  { %6998 = vrcp.f32 %v1926_v16 }
 0x56c   :  { %7000 = vrcp.f32 %v1933_v22 }
 0x574   :  { %v6997_v4 = vpop.eup %6996 }
 0x575   :  { %v6999_v36 = vpop.eup %6998  ;;  %v1940_v10 = vmul.f32 %v6997_v4, %v6995_v3 }
 0x576   :  { %v1939_v23 = vmul.f32 %v6999_v36, %v1937_v33  ;;  %v7001_v11 = vpop.eup %7000 }
 0x578   :  { %v7783_v25 = vadd.f32 %v1940_v10, %v1939_v23 }
 0x57a   :  { %7002 = vtanh.f32 %v7783_v25 }
 0x584   :  { %v7003_v55 = vpop.eup %7002 }
 0x585   :  { %v1943_v58 = vmul.f32 %v7003_v55, %v7001_v11 }
 0x587   :  { %1944 = vst [vmem:[#allocation2 + $0x8] sm:$0x3] %v1943_v58  ;;  %v1945_v61 = vpack.c.bf16 %v1943_v58, %v1943_v58 }
 0x589   :  { %2171 = vmatmul.mubr.bf16.vlgmr.msra.gmra.mrb[24].mxu0 %v1945_v61  ;;  %2212 = vmatmul.mubr.bf16.vlgmr.msra.gmra.mrb[24].mxu1 %v1945_v61 }
 0x58a   :  { %2461 = vmatpush1.bf16.msra.mxu0 %v7642_v37  ;;  %2502 = vmatpush1.bf16.msra.mxu1 %v7644_v34 }
 0x58b   :  { %2462 = vmatprep.subr.bf16.mxu0 %v7650_v32  ;;  %2503 = vmatprep.subr.bf16.mxu1 %v7652_v6 }
 0x58c   :  { %2492 = vmatprep.mubr.bf16.mxu0 %v7280_v0  ;;  %2533 = vmatprep.mubr.bf16.mxu1 %v7280_v0 }
 0x58e   :  { %2463 = vmatpush1.bf16.msra.mxu0 %v7654_v7  ;;  %2504 = vmatpush1.bf16.msra.mxu1 %v7656_v12 }
 0x58f   :  { %2464 = vmatprep.subr.bf16.mxu0 %v7662_v14  ;;  %2505 = vmatprep.subr.bf16.mxu1 %v7664_v18 }
 0x592   :  { %2465 = vmatpush1.bf16.msra.mxu0 %v7666_v15  ;;  %2506 = vmatpush1.bf16.msra.mxu1 %v7668_v17 }
 0x593   :  { %2466 = vmatprep.subr.bf16.mxu0 %v7674_v20  ;;  %2507 = vmatprep.subr.bf16.mxu1 %v7676_v5 }
 0x596   :  { %2467 = vmatpush1.bf16.msra.mxu0 %v7678_v35  ;;  %2508 = vmatpush1.bf16.msra.mxu1 %v7680_v38 }
 0x597   :  { %2468 = vmatprep.subr.bf16.mxu0 %v7684_v39  ;;  %2509 = vmatprep.subr.bf16.mxu1 %v7692_v42 }
 0x59a   :  { %2469 = vmatpush1.bf16.msra.mxu0 %v7688_v40  ;;  %2510 = vmatpush1.bf16.msra.mxu1 %v7690_v41 }
 0x59b   :  { %2470 = vmatprep.subr.bf16.mxu0 %v7695_v43  ;;  %2511 = vmatprep.subr.bf16.mxu1 %v7697_v44 }
 0x59e   :  { %2471 = vmatpush1.bf16.msra.mxu0 %v7702_v45  ;;  %2512 = vmatpush1.bf16.msra.mxu1 %v7704_v46 }
 0x59f   :  { %2472 = vmatprep.subr.bf16.mxu0 %v7708_v47  ;;  %2513 = vmatprep.subr.bf16.mxu1 %v7710_v48 }
 0x5a2   :  { %2473 = vmatpush1.bf16.msra.mxu0 %v7714_v49  ;;  %2514 = vmatpush1.bf16.msra.mxu1 %v7716_v50 }
 0x5a3   :  { %2474 = vmatprep.subr.bf16.mxu0 %v7720_v51  ;;  %2515 = vmatprep.subr.bf16.mxu1 %v7722_v52 }
 0x5a6   :  { %2475 = vmatpush1.bf16.msra.mxu0 %v7726_v53  ;;  %2516 = vmatpush1.bf16.msra.mxu1 %v7728_v54 }
 0x5a7   :  { %2782 = vmatprep.subr.bf16.mxu0 %v7638_v19  ;;  %2823 = vmatprep.subr.bf16.mxu1 %v7640_v21 }
 0x65c   :  { %v2172_v1 = vpop.f32.mrb[24].mxu0  ;;  %v2213_v30 = vpop.f32.mrb[24].mxu1 }
 0x65d   :  { %v2224_v31 = vrot.slane %v2172_v1, 6  ;;  %v2174_v57 = vpop.f32.mrb[25].mxu0  ;;  %v2215_v60 = vpop.f32.mrb[25].mxu1  ;;  %v2226_v21 = vrot.slane %v2213_v30, 6 }
 0x65e   :  { %v2225_v59 = vrot.slane %v2174_v57, 6  ;;  %v2176_v62 = vpop.f32.mrb[26].mxu0  ;;  %v2217_v63 = vpop.f32.mrb[26].mxu1  ;;  %v2227_v33 = vrot.slane %v2215_v60, 6 }
 0x65f   :  { %v2232_v27 = vadd.f32 %v2224_v31, %v7528_v24  ;;  %v2177_v56 = vpop.f32.mrb[27].mxu0  ;;  %v2218_v16 = vpop.f32.mrb[27].mxu1  ;;  %v2234_v10 = vadd.f32 %v2226_v21, %v7530_v26  ;;  %v2256_v31 = vrot.slane %v7783_v25, 6 }
 0x660   :  { %v2233_v2 = vadd.f32 %v2225_v59, %v7532_v28  ;;  %v2235_v19 = vadd.f32 %v2227_v33, %v7534_v29 }
 0x661   :  { %v6199_v3 = vmul.f32 -1.442695, %v2232_v27 }
 0x662   :  { %v6200_v4 = vmul.f32 -1.442695, %v2233_v2  ;;  %v6201_v36 = vmul.f32 -1.442695, %v2235_v19 }
 0x663   :  { %7004 = vpow2.f32 %v6199_v3 }
 0x664   :  { %7006 = vpow2.f32 %v6200_v4 }
 0x665   :  { %7008 = vpow2.f32 %v6201_v36 }
 0x666   :  { %7010 = vtanh.f32 %v2234_v10  ;;  %v6758_v10 = vld [vmem:[#allocation3 + $0x104] ss:$16 sps:$4 sm:$0xff]  }
 0x66d   :  { %v7005_v22 = vpop.eup %7004 }
 0x66e   :  { %v7007_v23 = vpop.eup %7006  ;;  %v2239_v11 = vadd.f32 1.0, %v7005_v22  ;;  %v6761_v22 = vld [vmem:[#allocation3 + $0x10c] ss:$16 sps:$4 sm:$0xff]  }
 0x66f   :  { %v2245_v55 = vadd.f32 1.0, %v7007_v23  ;;  %v7009_v58 = vpop.eup %7008  ;;  %v6756_v23 = vld [vmem:[#allocation3 + $0x100] ss:$16 sps:$4 sm:$0xff]  }
 0x670   :  { %7012 = vrcp.f32 %v2239_v11  ;;  %v7011_v61 = vpop.eup %7010  ;;  %v2252_v59 = vadd.f32 1.0, %v7009_v58  ;;  %v6759_v11 = vld [vmem:[#allocation3 + $0x108] ss:$16 sps:$4 sm:$0xff]   ;;  %v6767_v58 = vld [vmem:[#allocation3 + $0x12c] ss:$16 sps:$4 sm:$0xff]  }
 0x671   :  { %7014 = vrcp.f32 %v2245_v55  ;;  %v6764_v55 = vld [vmem:[#allocation3 + $0x124] ss:$16 sps:$4 sm:$0xff]  }
 0x672   :  { %7016 = vrcp.f32 %v2252_v59  ;;  %v6771_v59 = vld [vmem:[#allocation3 + $0x148] ss:$16 sps:$4 sm:$0xff]  }
 0x67a   :  { %v7013_v1 = vpop.eup %7012 }
 0x67b   :  { %v7015_v57 = vpop.eup %7014  ;;  %v2259_v60 = vmul.f32 %v7013_v1, %v7011_v61  ;;  %v6762_v61 = vld [vmem:[#allocation3 + $0x120] ss:$16 sps:$4 sm:$0xff]   ;;  %v6765_v1 = vld [vmem:[#allocation3 + $0x128] ss:$16 sps:$4 sm:$0xff]  }
 0x67c   :  { %v2258_v30 = vmul.f32 %v7015_v57, %v2256_v31  ;;  %v7017_v63 = vpop.eup %7016  ;;  %v6770_v31 = vld [vmem:[#allocation3 + $0x144] ss:$16 sps:$4 sm:$0xff]   ;;  %v6773_v57 = vld [vmem:[#allocation3 + $0x14c] ss:$16 sps:$4 sm:$0xff]  }
 0x67e   :  { %v7825_v62 = vadd.f32 %v2259_v60, %v2258_v30  ;;  %v6768_v60 = vld [vmem:[#allocation3 + $0x140] ss:$16 sps:$4 sm:$0xff]   ;;  %v6776_v30 = vld [vmem:[#allocation3 + $0x164] ss:$16 sps:$4 sm:$0xff]  }
 0x680   :  { %7018 = vtanh.f32 %v7825_v62 }
 0x68a   :  { %v7019_v27 = vpop.eup %7018 }
 0x68b   :  { %v2262_v56 = vmul.f32 %v7019_v27, %v7017_v63  ;;  %v6774_v63 = vld [vmem:[#allocation3 + $0x160] ss:$16 sps:$4 sm:$0xff]   ;;  %v6777_v27 = vld [vmem:[#allocation3 + $0x168] ss:$16 sps:$4 sm:$0xff]  }
 0x68d   :  { %2263 = vst [vmem:[#allocation2 + $0x8] sm:$0xc] %v2262_v56  ;;  %v2264_v16 = vpack.c.bf16 %v2262_v56, %v2262_v56  ;;  %v6782_v56 = vld [vmem:[#allocation3 + $0x184] ss:$16 sps:$4 sm:$0xff]  }
 0x68f   :  { %v2298_v2 = vrot.slane %v2264_v16, 1  ;;  %v6785_v16 = vld [vmem:[#allocation3 + $0x18c] ss:$16 sps:$4 sm:$0xff]  }
 0x691   :  { %2493 = vmatmul.mubr.bf16.vlgmr.msra.gmra.mrb[28].mxu0 %v2298_v2  ;;  %2534 = vmatmul.mubr.bf16.vlgmr.msra.gmra.mrb[28].mxu1 %v2298_v2  ;;  %v6780_v2 = vld [vmem:[#allocation3 + $0x180] ss:$16 sps:$4 sm:$0xff]  }
 0x692   :  { %2783 = vmatpush1.bf16.msra.mxu0 %v7642_v37  ;;  %2824 = vmatpush1.bf16.msra.mxu1 %v7644_v34 }
 0x693   :  { %2784 = vmatprep.subr.bf16.mxu0 %v7650_v32  ;;  %2825 = vmatprep.subr.bf16.mxu1 %v7652_v6 }
 0x694   :  { %2814 = vmatprep.mubr.bf16.mxu0 %v7280_v0  ;;  %2855 = vmatprep.mubr.bf16.mxu1 %v7280_v0 }
 0x696   :  { %2785 = vmatpush1.bf16.msra.mxu0 %v7654_v7  ;;  %2826 = vmatpush1.bf16.msra.mxu1 %v7656_v12 }
 0x697   :  { %2786 = vmatprep.subr.bf16.mxu0 %v7662_v14  ;;  %2827 = vmatprep.subr.bf16.mxu1 %v7664_v18 }
 0x69a   :  { %2787 = vmatpush1.bf16.msra.mxu0 %v7666_v15  ;;  %2828 = vmatpush1.bf16.msra.mxu1 %v7668_v17 }
 0x69b   :  { %2788 = vmatprep.subr.bf16.mxu0 %v7674_v20  ;;  %2829 = vmatprep.subr.bf16.mxu1 %v7676_v5 }
 0x69e   :  { %2789 = vmatpush1.bf16.msra.mxu0 %v7678_v35  ;;  %2830 = vmatpush1.bf16.msra.mxu1 %v7680_v38 }
 0x69f   :  { %2790 = vmatprep.subr.bf16.mxu0 %v7684_v39  ;;  %2831 = vmatprep.subr.bf16.mxu1 %v7692_v42 }
 0x6a2   :  { %2791 = vmatpush1.bf16.msra.mxu0 %v7688_v40  ;;  %2832 = vmatpush1.bf16.msra.mxu1 %v7690_v41 }
 0x6a3   :  { %2792 = vmatprep.subr.bf16.mxu0 %v7695_v43  ;;  %2833 = vmatprep.subr.bf16.mxu1 %v7697_v44 }
 0x6a6   :  { %2793 = vmatpush1.bf16.msra.mxu0 %v7702_v45  ;;  %2834 = vmatpush1.bf16.msra.mxu1 %v7704_v46 }
 0x6a7   :  { %2794 = vmatprep.subr.bf16.mxu0 %v7708_v47  ;;  %2835 = vmatprep.subr.bf16.mxu1 %v7710_v48 }
 0x6aa   :  { %2795 = vmatpush1.bf16.msra.mxu0 %v7714_v49  ;;  %2836 = vmatpush1.bf16.msra.mxu1 %v7716_v50 }
 0x6ab   :  { %2796 = vmatprep.subr.bf16.mxu0 %v7720_v51  ;;  %2837 = vmatprep.subr.bf16.mxu1 %v7722_v52  ;;  %v2578_v51 = vrot.slane %v7825_v62, 6  ;;  %v6779_v62 = vld [vmem:[#allocation3 + $0x16c] ss:$16 sps:$4 sm:$0xff]  }
 0x6ae   :  { %2797 = vmatpush1.bf16.msra.mxu0 %v7726_v53  ;;  %2838 = vmatpush1.bf16.msra.mxu1 %v7728_v54 }
 0x6af   :  { %3129 = vmatprep.subr.bf16.mxu0 %v6758_v10  ;;  %3172 = vmatprep.subr.bf16.mxu1 %v6761_v22 }
 0x764   :  { %v2494_v37 = vpop.f32.mrb[28].mxu0  ;;  %v2535_v34 = vpop.f32.mrb[28].mxu1 }
 0x765   :  { %v2546_v32 = vrot.slane %v2494_v37, 4  ;;  %v2496_v6 = vpop.f32.mrb[29].mxu0  ;;  %v2537_v7 = vpop.f32.mrb[29].mxu1  ;;  %v2548_v41 = vrot.slane %v2535_v34, 4  ;;  %v6783_v37 = vld [vmem:[#allocation3 + $0x188] ss:$16 sps:$4 sm:$0xff]  }
 0x766   :  { %v2547_v12 = vrot.slane %v2496_v6, 4  ;;  %v2498_v14 = vpop.f32.mrb[30].mxu0  ;;  %v2539_v18 = vpop.f32.mrb[30].mxu1  ;;  %v2549_v39 = vrot.slane %v2537_v7, 4  ;;  %v6788_v34 = vld [vmem:[#allocation3 + $0x1a4] ss:$16 sps:$4 sm:$0xff]  }
 0x767   :  { %v2554_v15 = vadd.f32 %v2546_v32, %v7528_v24  ;;  %v2499_v17 = vpop.f32.mrb[31].mxu0  ;;  %v2540_v20 = vpop.f32.mrb[31].mxu1  ;;  %v2556_v43 = vadd.f32 %v2548_v41, %v7530_v26  ;;  %v6791_v32 = vld [vmem:[#allocation3 + $0x1ac] ss:$16 sps:$4 sm:$0xff]   ;;  %v6786_v6 = vld [vmem:[#allocation3 + $0x1a0] ss:$16 sps:$4 sm:$0xff]  }
 0x768   :  { %v2555_v5 = vadd.f32 %v2547_v12, %v7532_v28  ;;  %v2557_v40 = vadd.f32 %v2549_v39, %v7534_v29  ;;  %v6789_v7 = vld [vmem:[#allocation3 + $0x1a8] ss:$16 sps:$4 sm:$0xff]   ;;  %v6792_v12 = vld [vmem:[#allocation3 + $0x1c0] ss:$16 sps:$4 sm:$0xff]   ;;  %v6794_v14 = vld [vmem:[#allocation3 + $0x1c4] ss:$16 sps:$4 sm:$0xff]  }
 0x769   :  { %v6234_v35 = vmul.f32 -1.442695, %v2554_v15  ;;  %v6795_v18 = vld [vmem:[#allocation3 + $0x1c8] ss:$16 sps:$4 sm:$0xff]   ;;  %v6797_v15 = vld [vmem:[#allocation3 + $0x1cc] ss:$16 sps:$4 sm:$0xff]  }
 0x76a   :  { %v6235_v38 = vmul.f32 -1.442695, %v2555_v5  ;;  %v6236_v42 = vmul.f32 -1.442695, %v2557_v40  ;;  %v6800_v17 = vld [vmem:[#allocation3 + $0x1e4] ss:$16 sps:$4 sm:$0xff]  }
 0x76b   :  { %7020 = vpow2.f32 %v6234_v35  ;;  %v6803_v20 = vld [vmem:[#allocation3 + $0x1ec] ss:$16 sps:$4 sm:$0xff]   ;;  %v6798_v5 = vld [vmem:[#allocation3 + $0x1e0] ss:$16 sps:$4 sm:$0xff]   ;;  %v6801_v35 = vld [vmem:[#allocation3 + $0x1e8] ss:$16 sps:$4 sm:$0xff]  }
 0x76c   :  { %7022 = vpow2.f32 %v6235_v38  ;;  %v7870_v38 = vld [vmem:[#allocation6 + $0x104] ss:$16 sps:$4 sm:$0xff]   ;;  %v7872_v39 = vld [vmem:[#allocation6 + $0x10c] ss:$16 sps:$4 sm:$0xff]  }
 0x76d   :  { %7024 = vpow2.f32 %v6236_v42 }
 0x76e   :  { %7026 = vtanh.f32 %v2556_v43 }
 0x775   :  { %v7021_v44 = vpop.eup %7020 }
 0x776   :  { %v7023_v45 = vpop.eup %7022  ;;  %v2561_v46 = vadd.f32 1.0, %v7021_v44 }
 0x777   :  { %v2567_v47 = vadd.f32 1.0, %v7023_v45  ;;  %v7025_v48 = vpop.eup %7024 }
 0x778   :  { %7028 = vrcp.f32 %v2561_v46  ;;  %v7027_v49 = vpop.eup %7026  ;;  %v2574_v54 = vadd.f32 1.0, %v7025_v48 }
 0x779   :  { %7030 = vrcp.f32 %v2567_v47 }
 0x77a   :  { %7032 = vrcp.f32 %v2574_v54 }
 0x782   :  { %v7029_v50 = vpop.eup %7028 }
 0x783   :  { %v7031_v52 = vpop.eup %7030  ;;  %v2581_v53 = vmul.f32 %v7029_v50, %v7027_v49 }
 0x784   :  { %v2580_v25 = vmul.f32 %v7031_v52, %v2578_v51  ;;  %v7033_v4 = vpop.eup %7032 }
 0x786   :  { %v7865_v3 = vadd.f32 %v2581_v53, %v2580_v25 }
 0x788   :  { %7034 = vtanh.f32 %v7865_v3 }
 0x792   :  { %v7035_v33 = vpop.eup %7034 }
 0x793   :  { %v2584_v19 = vmul.f32 %v7035_v33, %v7033_v4 }
 0x795   :  { %2585 = vst [vmem:[#allocation2 + $0x8] sm:$0x30] %v2584_v19  ;;  %v2586_v21 = vpack.c.bf16 %v2584_v19, %v2584_v19 }
 0x797   :  { %v2620_v36 = vrot.slane %v2586_v21, 2 }
 0x799   :  { %2815 = vmatmul.mubr.bf16.vlgmr.msra.gmra.mrb[32].mxu0 %v2620_v36  ;;  %2856 = vmatmul.mubr.bf16.vlgmr.msra.gmra.mrb[32].mxu1 %v2620_v36 }
 0x79a   :  { %3161 = vmatprep.mubr.bf16.mxu0 %v7280_v0  ;;  %3204 = vmatprep.mubr.bf16.mxu1 %v7280_v0 }
 0x79b   :  { %3130 = vmatpush1.bf16.msra.mxu0 %v6756_v23  ;;  %3173 = vmatpush1.bf16.msra.mxu1 %v6759_v11  ;;  %v2900_v11 = vrot.slane %v7865_v3, 6 }
 0x79c   :  { %3131 = vmatprep.subr.bf16.mxu0 %v6764_v55  ;;  %3174 = vmatprep.subr.bf16.mxu1 %v6767_v58 }
 0x79f   :  { %3132 = vmatpush1.bf16.msra.mxu0 %v6762_v61  ;;  %3175 = vmatpush1.bf16.msra.mxu1 %v6765_v1 }
 0x7a0   :  { %3133 = vmatprep.subr.bf16.mxu0 %v6770_v31  ;;  %3176 = vmatprep.subr.bf16.mxu1 %v6773_v57 }
 0x7a3   :  { %3134 = vmatpush1.bf16.msra.mxu0 %v6768_v60  ;;  %3177 = vmatpush1.bf16.msra.mxu1 %v6771_v59  ;;  %v2910_v60 = vld [vmem:[#allocation2] sm:$0xff] }
 0x7a4   :  { %3135 = vmatprep.subr.bf16.mxu0 %v6776_v30  ;;  %3178 = vmatprep.subr.bf16.mxu1 %v6779_v62  ;;  %v7881_v59 = vld [vmem:[#allocation6 + $0x100] ss:$16 sps:$4 sm:$0xff]   ;;  %v7883_v30 = vld [vmem:[#allocation6 + $0x108] ss:$16 sps:$4 sm:$0xff]  }
 0x7a7   :  { %3136 = vmatpush1.bf16.msra.mxu0 %v6774_v63  ;;  %3179 = vmatpush1.bf16.msra.mxu1 %v6777_v27  ;;  %v7885_v63 = vld [vmem:[#allocation6 + $0x124] ss:$16 sps:$4 sm:$0xff]   ;;  %v7887_v27 = vld [vmem:[#allocation6 + $0x12c] ss:$16 sps:$4 sm:$0xff]  }
 0x7a8   :  { %3137 = vmatprep.subr.bf16.mxu0 %v6782_v56  ;;  %3180 = vmatprep.subr.bf16.mxu1 %v6785_v16  ;;  %v7891_v56 = vld [vmem:[#allocation6 + $0x120] ss:$16 sps:$4 sm:$0xff]   ;;  %v7893_v16 = vld [vmem:[#allocation6 + $0x128] ss:$16 sps:$4 sm:$0xff]  }
 0x7ab   :  { %3138 = vmatpush1.bf16.msra.mxu0 %v6780_v2  ;;  %3181 = vmatpush1.bf16.msra.mxu1 %v6783_v37  ;;  %v7897_v2 = vld [vmem:[#allocation6 + $0x144] ss:$16 sps:$4 sm:$0xff]   ;;  %v7899_v37 = vld [vmem:[#allocation6 + $0x14c] ss:$16 sps:$4 sm:$0xff]  }
 0x7ac   :  { %3139 = vmatprep.subr.bf16.mxu0 %v6788_v34  ;;  %3182 = vmatprep.subr.bf16.mxu1 %v6791_v32  ;;  %v7905_v34 = vld [vmem:[#allocation6 + $0x140] ss:$16 sps:$4 sm:$0xff]   ;;  %v7907_v32 = vld [vmem:[#allocation6 + $0x148] ss:$16 sps:$4 sm:$0xff]  }
 0x7af   :  { %3140 = vmatpush1.bf16.msra.mxu0 %v6786_v6  ;;  %3183 = vmatpush1.bf16.msra.mxu1 %v6789_v7  ;;  %v7911_v6 = vld [vmem:[#allocation6 + $0x164] ss:$16 sps:$4 sm:$0xff]   ;;  %v7913_v7 = vld [vmem:[#allocation6 + $0x16c] ss:$16 sps:$4 sm:$0xff]  }
 0x7b0   :  { %3141 = vmatprep.subr.bf16.mxu0 %v6794_v14  ;;  %3184 = vmatprep.subr.bf16.mxu1 %v6797_v15  ;;  %v7919_v14 = vld [vmem:[#allocation6 + $0x168] ss:$16 sps:$4 sm:$0xff]   ;;  %v7925_v15 = vld [vmem:[#allocation6 + $0x18c] ss:$16 sps:$4 sm:$0xff]  }
 0x7b3   :  { %3142 = vmatpush1.bf16.msra.mxu0 %v6792_v12  ;;  %3185 = vmatpush1.bf16.msra.mxu1 %v6795_v18  ;;  %v7917_v12 = vld [vmem:[#allocation6 + $0x160] ss:$16 sps:$4 sm:$0xff]   ;;  %v7923_v18 = vld [vmem:[#allocation6 + $0x184] ss:$16 sps:$4 sm:$0xff]  }
 0x7b4   :  { %3143 = vmatprep.subr.bf16.mxu0 %v6800_v17  ;;  %3186 = vmatprep.subr.bf16.mxu1 %v6803_v20  ;;  %v7929_v17 = vld [vmem:[#allocation6 + $0x180] ss:$16 sps:$4 sm:$0xff]   ;;  %v7931_v20 = vld [vmem:[#allocation6 + $0x188] ss:$16 sps:$4 sm:$0xff]  }
 0x7b7   :  { %3144 = vmatpush1.bf16.msra.mxu0 %v6798_v5  ;;  %3187 = vmatpush1.bf16.msra.mxu1 %v6801_v35  ;;  %v7935_v5 = vld [vmem:[#allocation6 + $0x1a4] ss:$16 sps:$4 sm:$0xff]   ;;  %v7937_v35 = vld [vmem:[#allocation6 + $0x1ac] ss:$16 sps:$4 sm:$0xff]  }
 0x7b8   :  { %3413 = vmatprep.subr.bf16.mxu0 %v7870_v38  ;;  %3454 = vmatprep.subr.bf16.mxu1 %v7872_v39 }
 0x86c   :  { %v2816_v40 = vpop.f32.mrb[32].mxu0  ;;  %v2857_v41 = vpop.f32.mrb[32].mxu1 }
 0x86d   :  { %v2868_v42 = vrot.slane %v2816_v40, 2  ;;  %v2818_v43 = vpop.f32.mrb[33].mxu0  ;;  %v2859_v44 = vpop.f32.mrb[33].mxu1  ;;  %v2870_v4 = vrot.slane %v2857_v41, 2  ;;  %v7941_v40 = vld [vmem:[#allocation6 + $0x1a0] ss:$16 sps:$4 sm:$0xff]  }
 0x86e   :  { %v2869_v45 = vrot.slane %v2818_v43, 2  ;;  %v2820_v46 = vpop.f32.mrb[34].mxu0  ;;  %v2861_v47 = vpop.f32.mrb[34].mxu1  ;;  %v2871_v54 = vrot.slane %v2859_v44, 2  ;;  %v7943_v41 = vld [vmem:[#allocation6 + $0x1a8] ss:$16 sps:$4 sm:$0xff]  }
 0x86f   :  { %v2876_v48 = vadd.f32 %v2868_v42, %v7528_v24  ;;  %v2821_v49 = vpop.f32.mrb[35].mxu0  ;;  %v2862_v50 = vpop.f32.mrb[35].mxu1  ;;  %v2878_v19 = vadd.f32 %v2870_v4, %v7530_v26  ;;  %v7947_v42 = vld [vmem:[#allocation6 + $0x1c4] ss:$16 sps:$4 sm:$0xff]   ;;  %v7949_v43 = vld [vmem:[#allocation6 + $0x1cc] ss:$16 sps:$4 sm:$0xff]  }
 0x870   :  { %v2877_v51 = vadd.f32 %v2869_v45, %v7532_v28  ;;  %v2879_v25 = vadd.f32 %v2871_v54, %v7534_v29  ;;  %v7953_v44 = vld [vmem:[#allocation6 + $0x1c0] ss:$16 sps:$4 sm:$0xff]   ;;  %v7955_v45 = vld [vmem:[#allocation6 + $0x1c8] ss:$16 sps:$4 sm:$0xff]   ;;  %v7959_v46 = vld [vmem:[#allocation6 + $0x1e4] ss:$16 sps:$4 sm:$0xff]  }
 0x871   :  { %v6269_v52 = vmul.f32 -1.442695, %v2876_v48  ;;  %v7961_v47 = vld [vmem:[#allocation6 + $0x1ec] ss:$16 sps:$4 sm:$0xff]   ;;  %v7965_v48 = vld [vmem:[#allocation6 + $0x1e0] ss:$16 sps:$4 sm:$0xff]  }
 0x872   :  { %v6270_v53 = vmul.f32 -1.442695, %v2877_v51  ;;  %v6271_v33 = vmul.f32 -1.442695, %v2879_v25  ;;  %v7967_v49 = vld [vmem:[#allocation6 + $0x1e8] ss:$16 sps:$4 sm:$0xff]  }
 0x873   :  { %7036 = vpow2.f32 %v6269_v52  ;;  %v6305_v50 = vld [vmem:[%s8464_s1 + $0x2] sm:$0x3]  ;;  %v6272_v52 = vld [vmem:[%s8468_s5 + $0x4] sm:$0xf]  ;;  %v8476_v4 = vsub.s32 2, %v7509_v8 }
 0x874   :  { %7038 = vpow2.f32 %v6270_v53  ;;  %v3219_v51 = vpack.c.bf16 %v6305_v50, %v6305_v50  ;;  %v2952_v25 = vrot.slane %v6272_v52, %v7512_v9 }
 0x875   :  { %7040 = vpow2.f32 %v6271_v33  ;;  %v2960_v33 = vrot.slane %v6272_v52, %v8476_v4 }
 0x876   :  { %7042 = vtanh.f32 %v2878_v19 }
 0x87d   :  { %v7037_v21 = vpop.eup %7036 }
 0x87e   :  { %v7039_v36 = vpop.eup %7038  ;;  %v2883_v10 = vadd.f32 1.0, %v7037_v21 }
 0x87f   :  { %v2889_v24 = vadd.f32 1.0, %v7039_v36  ;;  %v7041_v28 = vpop.eup %7040  ;;  %v2956_v36 = vrot.slane %v6272_v52, %v7520_v13 }
 0x880   :  { %7044 = vrcp.f32 %v2883_v10  ;;  %v7043_v22 = vpop.eup %7042  ;;  %v2896_v29 = vadd.f32 1.0, %v7041_v28  ;;  %v8477_v10 = vsub.s32 3, %v7509_v8 }
 0x881   :  { %7046 = vrcp.f32 %v2889_v24 }
 0x882   :  { %7048 = vrcp.f32 %v2896_v29  ;;  %v2964_v24 = vrot.slane %v6272_v52, %v8477_v10 }
 0x88a   :  { %v7045_v23 = vpop.eup %7044 }
 0x88b   :  { %v7047_v55 = vpop.eup %7046  ;;  %v2903_v58 = vmul.f32 %v7045_v23, %v7043_v22 }
 0x88c   :  { %v2902_v61 = vmul.f32 %v7047_v55, %v2900_v11  ;;  %v7049_v26 = vpop.eup %7048 }
 0x88e   :  { %v2904_v1 = vadd.f32 %v2903_v58, %v2902_v61 }
 0x890   :  { %7050 = vtanh.f32 %v2904_v1  ;;  %2909 = vst [vmem:[#allocation9 - $0x6] sm:$0xc0] %v2904_v1 }
 0x89a   :  { %v7051_v31 = vpop.eup %7050 }
 0x89b   :  { %v2906_v57 = vmul.f32 %v7051_v31, %v7049_v26 }
 0x89d   :  { %2907 = vst [vmem:[#allocation2 + $0x8] sm:$0xc0] %v2906_v57  ;;  %2908 = vst [vmem:[#allocation8 - $0x6] sm:$0xc0] %v2906_v57 }
 0x8a4   :  { %v2911_v62 = vld [vmem:[#allocation2 + $0x8] sm:$0xff] }
 0x8a5   :  { %v2912_v3 = vpack.c.bf16 %v2911_v62, %v2910_v60 }
 0x8a7   :  { %3162 = vmatmul.mubr.bf16.vlgmr.msra.gmra.mrb[36].mxu0 %v2912_v3  ;;  %3205 = vmatmul.mubr.bf16.vlgmr.msra.gmra.mrb[36].mxu1 %v2912_v3 }
 0x8a8   :  { %3414 = vmatpush1.bf16.msra.mxu0 %v7881_v59  ;;  %3455 = vmatpush1.bf16.msra.mxu1 %v7883_v30 }
 0x8a9   :  { %3415 = vmatprep.subr.bf16.mxu0 %v7885_v63  ;;  %3456 = vmatprep.subr.bf16.mxu1 %v7887_v27 }
 0x8aa   :  { %3445 = vmatprep.mubr.bf16.mxu0 %v7280_v0  ;;  %3486 = vmatprep.mubr.bf16.mxu1 %v7280_v0 }
 0x8ac   :  { %3416 = vmatpush1.bf16.msra.mxu0 %v7891_v56  ;;  %3457 = vmatpush1.bf16.msra.mxu1 %v7893_v16 }
 0x8ad   :  { %3417 = vmatprep.subr.bf16.mxu0 %v7897_v2  ;;  %3458 = vmatprep.subr.bf16.mxu1 %v7899_v37 }
 0x8b0   :  { %3418 = vmatpush1.bf16.msra.mxu0 %v7905_v34  ;;  %3459 = vmatpush1.bf16.msra.mxu1 %v7907_v32 }
 0x8b1   :  { %3419 = vmatprep.subr.bf16.mxu0 %v7911_v6  ;;  %3460 = vmatprep.subr.bf16.mxu1 %v7913_v7 }
 0x8b4   :  { %3420 = vmatpush1.bf16.msra.mxu0 %v7917_v12  ;;  %3461 = vmatpush1.bf16.msra.mxu1 %v7919_v14 }
 0x8b5   :  { %3421 = vmatprep.subr.bf16.mxu0 %v7923_v18  ;;  %3462 = vmatprep.subr.bf16.mxu1 %v7925_v15 }
 0x8b8   :  { %3422 = vmatpush1.bf16.msra.mxu0 %v7929_v17  ;;  %3463 = vmatpush1.bf16.msra.mxu1 %v7931_v20 }
 0x8b9   :  { %3423 = vmatprep.subr.bf16.mxu0 %v7935_v5  ;;  %3464 = vmatprep.subr.bf16.mxu1 %v7937_v35 }
 0x8bc   :  { %3424 = vmatpush1.bf16.msra.mxu0 %v7941_v40  ;;  %3465 = vmatpush1.bf16.msra.mxu1 %v7943_v41 }
 0x8bd   :  { %3425 = vmatprep.subr.bf16.mxu0 %v7947_v42  ;;  %3466 = vmatprep.subr.bf16.mxu1 %v7949_v43 }
 0x8c0   :  { %3426 = vmatpush1.bf16.msra.mxu0 %v7953_v44  ;;  %3467 = vmatpush1.bf16.msra.mxu1 %v7955_v45 }
 0x8c1   :  { %3427 = vmatprep.subr.bf16.mxu0 %v7959_v46  ;;  %3468 = vmatprep.subr.bf16.mxu1 %v7961_v47 }
 0x8c4   :  { %3428 = vmatpush1.bf16.msra.mxu0 %v7965_v48  ;;  %3469 = vmatpush1.bf16.msra.mxu1 %v7967_v49 }
 0x8c5   :  { %3717 = vmatprep.subr.bf16.mxu0 %v7870_v38  ;;  %3758 = vmatprep.subr.bf16.mxu1 %v7872_v39 }
 0x8c7   :  { %3446 = vmatmul.mubr.bf16.vlgmr.msra.gmra.mrb[40].mxu0 %v3219_v51  ;;  %3487 = vmatmul.mubr.bf16.vlgmr.msra.gmra.mrb[40].mxu1 %v3219_v51 }
 0x8c8   :  { %3718 = vmatpush1.bf16.msra.mxu0 %v7881_v59  ;;  %3759 = vmatpush1.bf16.msra.mxu1 %v7883_v30 }
 0x8c9   :  { %3719 = vmatprep.subr.bf16.mxu0 %v7885_v63  ;;  %3760 = vmatprep.subr.bf16.mxu1 %v7887_v27 }
 0x8ca   :  { %3749 = vmatprep.mubr.bf16.mxu0 %v7280_v0  ;;  %3790 = vmatprep.mubr.bf16.mxu1 %v7280_v0 }
 0x8cc   :  { %3720 = vmatpush1.bf16.msra.mxu0 %v7891_v56  ;;  %3761 = vmatpush1.bf16.msra.mxu1 %v7893_v16 }
 0x8cd   :  { %3721 = vmatprep.subr.bf16.mxu0 %v7897_v2  ;;  %3762 = vmatprep.subr.bf16.mxu1 %v7899_v37 }
 0x8d0   :  { %3722 = vmatpush1.bf16.msra.mxu0 %v7905_v34  ;;  %3763 = vmatpush1.bf16.msra.mxu1 %v7907_v32 }
 0x8d1   :  { %3723 = vmatprep.subr.bf16.mxu0 %v7911_v6  ;;  %3764 = vmatprep.subr.bf16.mxu1 %v7913_v7 }
 0x8d4   :  { %3724 = vmatpush1.bf16.msra.mxu0 %v7917_v12  ;;  %3765 = vmatpush1.bf16.msra.mxu1 %v7919_v14 }
 0x8d5   :  { %3725 = vmatprep.subr.bf16.mxu0 %v7923_v18  ;;  %3766 = vmatprep.subr.bf16.mxu1 %v7925_v15 }
 0x8d8   :  { %3726 = vmatpush1.bf16.msra.mxu0 %v7929_v17  ;;  %3767 = vmatpush1.bf16.msra.mxu1 %v7931_v20 }
 0x8d9   :  { %3727 = vmatprep.subr.bf16.mxu0 %v7935_v5  ;;  %3768 = vmatprep.subr.bf16.mxu1 %v7937_v35 }
 0x8dc   :  { %3728 = vmatpush1.bf16.msra.mxu0 %v7941_v40  ;;  %3769 = vmatpush1.bf16.msra.mxu1 %v7943_v41 }
 0x8dd   :  { %3729 = vmatprep.subr.bf16.mxu0 %v7947_v42  ;;  %3770 = vmatprep.subr.bf16.mxu1 %v7949_v43 }
 0x8e0   :  { %3730 = vmatpush1.bf16.msra.mxu0 %v7953_v44  ;;  %3771 = vmatpush1.bf16.msra.mxu1 %v7955_v45 }
 0x8e1   :  { %3731 = vmatprep.subr.bf16.mxu0 %v7959_v46  ;;  %3772 = vmatprep.subr.bf16.mxu1 %v7961_v47 }
 0x8e4   :  { %3732 = vmatpush1.bf16.msra.mxu0 %v7965_v48  ;;  %3773 = vmatpush1.bf16.msra.mxu1 %v7967_v49 }
 0x8e5   :  { %4039 = vmatprep.subr.bf16.mxu0 %v7870_v38  ;;  %4080 = vmatprep.subr.bf16.mxu1 %v7872_v39 }
 0x97a   :  { %v3163_v53 = vpop.f32.mrb[36].mxu0  ;;  %v3206_v54 = vpop.f32.mrb[36].mxu1 }
 0x97b   :  { %v3165_v19 = vpop.f32.mrb[37].mxu0  ;;  %v3208_v21 = vpop.f32.mrb[37].mxu1  ;;  %v8029_v1 = vadd.f32 %v3163_v53, %v2952_v25 }
 0x97c   :  { %v3167_v28 = vpop.f32.mrb[38].mxu0  ;;  %v3210_v22 = vpop.f32.mrb[38].mxu1  ;;  %v8031_v26 = vadd.f32 %v3165_v19, %v2956_v36 }
 0x97d   :  { %v8021_v23 = vadd.f32 %v3167_v28, %v2952_v25  ;;  %v8023_v11 = vadd.f32 %v3210_v22, %v2960_v33  ;;  %v3169_v55 = vpop.f32.mrb[39].mxu0  ;;  %v3212_v58 = vpop.f32.mrb[39].mxu1  ;;  %v8035_v22 = vadd.f32 %v3208_v21, %v2964_v24  ;;  %v8038_v25 = vadd.f32 %v3206_v54, %v2960_v33  ;;  %v6306_v21 = vld [vmem:[%s8465_s2 + $0x2] sm:$0x3] }
 0x97e   :  { %v8025_v29 = vadd.f32 %v3169_v55, %v2956_v36  ;;  %v8027_v61 = vadd.f32 %v3212_v58, %v2964_v24 }
 0x99a   :  { %v3447_v31 = vpop.f32.mrb[40].mxu0  ;;  %v3488_v57 = vpop.f32.mrb[40].mxu1 }
 0x99b   :  { %v3495_v8 = vadd.f32 %v3447_v31, %v8029_v1  ;;  %v3449_v60 = vpop.f32.mrb[41].mxu0  ;;  %v3490_v62 = vpop.f32.mrb[41].mxu1  ;;  %v3497_v36 = vadd.f32 %v3488_v57, %v8038_v25 }
 0x99c   :  { %v3496_v3 = vadd.f32 %v3449_v60, %v8031_v26  ;;  %v3451_v50 = vpop.f32.mrb[42].mxu0  ;;  %v3492_v51 = vpop.f32.mrb[42].mxu1  ;;  %v3498_v53 = vadd.f32 %v3490_v62, %v8035_v22 }
 0x99d   :  { %v6339_v52 = vmul.f32 -1.442695, %v3495_v8  ;;  %v3452_v4 = vpop.f32.mrb[43].mxu0  ;;  %v3493_v10 = vpop.f32.mrb[43].mxu1 }
 0x99e   :  { %v6340_v28 = vmul.f32 -1.442695, %v3496_v3  ;;  %v6341_v19 = vmul.f32 -1.442695, %v3498_v53 }
 0x99f   :  { %7052 = vpow2.f32 %v6339_v52 }
 0x9a0   :  { %7054 = vpow2.f32 %v6340_v28 }
 0x9a1   :  { %7056 = vpow2.f32 %v6341_v19 }
 0x9a2   :  { %7058 = vtanh.f32 %v3497_v36 }
 0x9a9   :  { %v7053_v55 = vpop.eup %7052 }
 0x9aa   :  { %v7055_v58 = vpop.eup %7054  ;;  %v3502_v31 = vadd.f32 1.0, %v7053_v55 }
 0x9ab   :  { %v3508_v8 = vadd.f32 1.0, %v7055_v58  ;;  %v7057_v60 = vpop.eup %7056 }
 0x9ac   :  { %7060 = vrcp.f32 %v3502_v31  ;;  %v7059_v3 = vpop.eup %7058  ;;  %v3515_v62 = vadd.f32 1.0, %v7057_v60 }
 0x9ad   :  { %7062 = vrcp.f32 %v3508_v8 }
 0x9ae   :  { %7064 = vrcp.f32 %v3515_v62 }
 0x9b6   :  { %v7061_v24 = vpop.eup %7060 }
 0x9b7   :  { %v7063_v54 = vpop.eup %7062  ;;  %v3519_v33 = vmul.f32 %v7061_v24, %v7059_v3 }
 0x9b8   :  { %v3518_v50 = vmul.f32 %v7063_v54, %v6306_v21  ;;  %v7065_v51 = vpop.eup %7064 }
 0x9ba   :  { %v8044_v57 = vadd.f32 %v3519_v33, %v3518_v50 }
 0x9bc   :  { %7066 = vtanh.f32 %v8044_v57 }
 0x9c6   :  { %v7067_v52 = vpop.eup %7066 }
 0x9c7   :  { %v3522_v4 = vmul.f32 %v7067_v52, %v7065_v51 }
 0x9c9   :  { %3523 = vst [vmem:[#allocation2] sm:$0x3] %v3522_v4  ;;  %v3524_v10 = vpack.c.bf16 %v3522_v4, %v3522_v4 }
 0x9cb   :  { %3750 = vmatmul.mubr.bf16.vlgmr.msra.gmra.mrb[44].mxu0 %v3524_v10  ;;  %3791 = vmatmul.mubr.bf16.vlgmr.msra.gmra.mrb[44].mxu1 %v3524_v10 }
 0x9cc   :  { %4040 = vmatpush1.bf16.msra.mxu0 %v7881_v59  ;;  %4081 = vmatpush1.bf16.msra.mxu1 %v7883_v30 }
 0x9cd   :  { %4041 = vmatprep.subr.bf16.mxu0 %v7885_v63  ;;  %4082 = vmatprep.subr.bf16.mxu1 %v7887_v27 }
 0x9ce   :  { %4071 = vmatprep.mubr.bf16.mxu0 %v7280_v0  ;;  %4112 = vmatprep.mubr.bf16.mxu1 %v7280_v0 }
 0x9d0   :  { %4042 = vmatpush1.bf16.msra.mxu0 %v7891_v56  ;;  %4083 = vmatpush1.bf16.msra.mxu1 %v7893_v16 }
 0x9d1   :  { %4043 = vmatprep.subr.bf16.mxu0 %v7897_v2  ;;  %4084 = vmatprep.subr.bf16.mxu1 %v7899_v37 }
 0x9d4   :  { %4044 = vmatpush1.bf16.msra.mxu0 %v7905_v34  ;;  %4085 = vmatpush1.bf16.msra.mxu1 %v7907_v32 }
 0x9d5   :  { %4045 = vmatprep.subr.bf16.mxu0 %v7911_v6  ;;  %4086 = vmatprep.subr.bf16.mxu1 %v7913_v7 }
 0x9d8   :  { %4046 = vmatpush1.bf16.msra.mxu0 %v7917_v12  ;;  %4087 = vmatpush1.bf16.msra.mxu1 %v7919_v14 }
 0x9d9   :  { %4047 = vmatprep.subr.bf16.mxu0 %v7923_v18  ;;  %4088 = vmatprep.subr.bf16.mxu1 %v7925_v15 }
 0x9dc   :  { %4048 = vmatpush1.bf16.msra.mxu0 %v7929_v17  ;;  %4089 = vmatpush1.bf16.msra.mxu1 %v7931_v20 }
 0x9dd   :  { %4049 = vmatprep.subr.bf16.mxu0 %v7935_v5  ;;  %4090 = vmatprep.subr.bf16.mxu1 %v7937_v35 }
 0x9e0   :  { %4050 = vmatpush1.bf16.msra.mxu0 %v7941_v40  ;;  %4091 = vmatpush1.bf16.msra.mxu1 %v7943_v41 }
 0x9e1   :  { %4051 = vmatprep.subr.bf16.mxu0 %v7947_v42  ;;  %4092 = vmatprep.subr.bf16.mxu1 %v7949_v43 }
 0x9e4   :  { %4052 = vmatpush1.bf16.msra.mxu0 %v7953_v44  ;;  %4093 = vmatpush1.bf16.msra.mxu1 %v7955_v45 }
 0x9e5   :  { %4053 = vmatprep.subr.bf16.mxu0 %v7959_v46  ;;  %4094 = vmatprep.subr.bf16.mxu1 %v7961_v47 }
 0x9e8   :  { %4054 = vmatpush1.bf16.msra.mxu0 %v7965_v48  ;;  %4095 = vmatpush1.bf16.msra.mxu1 %v7967_v49 }
 0x9e9   :  { %4361 = vmatprep.subr.bf16.mxu0 %v7870_v38  ;;  %4402 = vmatprep.subr.bf16.mxu1 %v7872_v39 }
 0xa9e   :  { %v3751_v28 = vpop.f32.mrb[44].mxu0  ;;  %v3792_v53 = vpop.f32.mrb[44].mxu1 }
 0xa9f   :  { %v3803_v19 = vrot.slane %v3751_v28, 6  ;;  %v3753_v36 = vpop.f32.mrb[45].mxu0  ;;  %v3794_v55 = vpop.f32.mrb[45].mxu1  ;;  %v3805_v39 = vrot.slane %v3792_v53, 6 }
 0xaa0   :  { %v3804_v58 = vrot.slane %v3753_v36, 6  ;;  %v3755_v31 = vpop.f32.mrb[46].mxu0  ;;  %v3796_v8 = vpop.f32.mrb[46].mxu1  ;;  %v3806_v62 = vrot.slane %v3794_v55, 6  ;;  %v3835_v55 = vrot.slane %v8044_v57, 6 }
 0xaa1   :  { %v3811_v60 = vadd.f32 %v3803_v19, %v8029_v1  ;;  %v3756_v3 = vpop.f32.mrb[47].mxu0  ;;  %v3797_v21 = vpop.f32.mrb[47].mxu1  ;;  %v3813_v51 = vadd.f32 %v3805_v39, %v8038_v25 }
 0xaa2   :  { %v3812_v24 = vadd.f32 %v3804_v58, %v8031_v26  ;;  %v3814_v38 = vadd.f32 %v3806_v62, %v8035_v22 }
 0xaa3   :  { %v6374_v54 = vmul.f32 -1.442695, %v3811_v60 }
 0xaa4   :  { %v6375_v33 = vmul.f32 -1.442695, %v3812_v24  ;;  %v6376_v50 = vmul.f32 -1.442695, %v3814_v38 }
 0xaa5   :  { %7068 = vpow2.f32 %v6374_v54 }
 0xaa6   :  { %7070 = vpow2.f32 %v6375_v33 }
 0xaa7   :  { %7072 = vpow2.f32 %v6376_v50 }
 0xaa8   :  { %7074 = vtanh.f32 %v3813_v51 }
 0xaaf   :  { %v7069_v52 = vpop.eup %7068 }
 0xab0   :  { %v7071_v4 = vpop.eup %7070  ;;  %v3818_v10 = vadd.f32 1.0, %v7069_v52 }
 0xab1   :  { %v3824_v28 = vadd.f32 1.0, %v7071_v4  ;;  %v7073_v19 = vpop.eup %7072 }
 0xab2   :  { %7076 = vrcp.f32 %v3818_v10  ;;  %v7075_v36 = vpop.eup %7074  ;;  %v3831_v60 = vadd.f32 1.0, %v7073_v19  ;;  %v8131_v10 = vld [vmem:[#allocation6 + $0x104] ss:$16 sps:$4 sm:$0xff]   ;;  %v8135_v19 = vld [vmem:[#allocation6 + $0x100] ss:$16 sps:$4 sm:$0xff]  }
 0xab3   :  { %7078 = vrcp.f32 %v3824_v28  ;;  %v8133_v28 = vld [vmem:[#allocation6 + $0x10c] ss:$16 sps:$4 sm:$0xff]  }
 0xab4   :  { %7080 = vrcp.f32 %v3831_v60  ;;  %v8155_v60 = vld [vmem:[#allocation6 + $0x144] ss:$16 sps:$4 sm:$0xff]  }
 0xabc   :  { %v7077_v58 = vpop.eup %7076 }
 0xabd   :  { %v7079_v31 = vpop.eup %7078  ;;  %v3838_v8 = vmul.f32 %v7077_v58, %v7075_v36  ;;  %v8137_v36 = vld [vmem:[#allocation6 + $0x108] ss:$16 sps:$4 sm:$0xff]   ;;  %v8143_v58 = vld [vmem:[#allocation6 + $0x124] ss:$16 sps:$4 sm:$0xff]  }
 0xabe   :  { %v3837_v53 = vmul.f32 %v7079_v31, %v3835_v55  ;;  %v7081_v21 = vpop.eup %7080  ;;  %v8145_v55 = vld [vmem:[#allocation6 + $0x12c] ss:$16 sps:$4 sm:$0xff]   ;;  %v8147_v31 = vld [vmem:[#allocation6 + $0x120] ss:$16 sps:$4 sm:$0xff]  }
 0xac0   :  { %v8086_v3 = vadd.f32 %v3838_v8, %v3837_v53  ;;  %v8149_v8 = vld [vmem:[#allocation6 + $0x128] ss:$16 sps:$4 sm:$0xff]   ;;  %v8157_v53 = vld [vmem:[#allocation6 + $0x14c] ss:$16 sps:$4 sm:$0xff]  }
 0xac2   :  { %7082 = vtanh.f32 %v8086_v3 }
 0xacc   :  { %v7083_v24 = vpop.eup %7082 }
 0xacd   :  { %v3841_v54 = vmul.f32 %v7083_v24, %v7081_v21  ;;  %v8161_v21 = vld [vmem:[#allocation6 + $0x148] ss:$16 sps:$4 sm:$0xff]   ;;  %v8167_v24 = vld [vmem:[#allocation6 + $0x164] ss:$16 sps:$4 sm:$0xff]  }
 0xacf   :  { %3842 = vst [vmem:[#allocation2] sm:$0xc] %v3841_v54  ;;  %v3843_v33 = vpack.c.bf16 %v3841_v54, %v3841_v54  ;;  %v8169_v54 = vld [vmem:[#allocation6 + $0x16c] ss:$16 sps:$4 sm:$0xff]  }
 0xad1   :  { %v3877_v62 = vrot.slane %v3843_v33, 1  ;;  %v8171_v33 = vld [vmem:[#allocation6 + $0x160] ss:$16 sps:$4 sm:$0xff]  }
 0xad3   :  { %4072 = vmatmul.mubr.bf16.vlgmr.msra.gmra.mrb[48].mxu0 %v3877_v62  ;;  %4113 = vmatmul.mubr.bf16.vlgmr.msra.gmra.mrb[48].mxu1 %v3877_v62  ;;  %v8173_v62 = vld [vmem:[#allocation6 + $0x168] ss:$16 sps:$4 sm:$0xff]  }
 0xad4   :  { %4362 = vmatpush1.bf16.msra.mxu0 %v7881_v59  ;;  %4403 = vmatpush1.bf16.msra.mxu1 %v7883_v30 }
 0xad5   :  { %4363 = vmatprep.subr.bf16.mxu0 %v7885_v63  ;;  %4404 = vmatprep.subr.bf16.mxu1 %v7887_v27 }
 0xad6   :  { %4393 = vmatprep.mubr.bf16.mxu0 %v7280_v0  ;;  %4434 = vmatprep.mubr.bf16.mxu1 %v7280_v0 }
 0xad8   :  { %4364 = vmatpush1.bf16.msra.mxu0 %v7891_v56  ;;  %4405 = vmatpush1.bf16.msra.mxu1 %v7893_v16 }
 0xad9   :  { %4365 = vmatprep.subr.bf16.mxu0 %v7897_v2  ;;  %4406 = vmatprep.subr.bf16.mxu1 %v7899_v37 }
 0xadc   :  { %4366 = vmatpush1.bf16.msra.mxu0 %v7905_v34  ;;  %4407 = vmatpush1.bf16.msra.mxu1 %v7907_v32 }
 0xadd   :  { %4367 = vmatprep.subr.bf16.mxu0 %v7911_v6  ;;  %4408 = vmatprep.subr.bf16.mxu1 %v7913_v7 }
 0xae0   :  { %4368 = vmatpush1.bf16.msra.mxu0 %v7917_v12  ;;  %4409 = vmatpush1.bf16.msra.mxu1 %v7919_v14 }
 0xae1   :  { %4369 = vmatprep.subr.bf16.mxu0 %v7923_v18  ;;  %4410 = vmatprep.subr.bf16.mxu1 %v7925_v15 }
 0xae4   :  { %4370 = vmatpush1.bf16.msra.mxu0 %v7929_v17  ;;  %4411 = vmatpush1.bf16.msra.mxu1 %v7931_v20 }
 0xae5   :  { %4371 = vmatprep.subr.bf16.mxu0 %v7935_v5  ;;  %4412 = vmatprep.subr.bf16.mxu1 %v7937_v35 }
 0xae8   :  { %4372 = vmatpush1.bf16.msra.mxu0 %v7941_v40  ;;  %4413 = vmatpush1.bf16.msra.mxu1 %v7943_v41 }
 0xae9   :  { %4373 = vmatprep.subr.bf16.mxu0 %v7947_v42  ;;  %4414 = vmatprep.subr.bf16.mxu1 %v7949_v43 }
 0xaec   :  { %4374 = vmatpush1.bf16.msra.mxu0 %v7953_v44  ;;  %4415 = vmatpush1.bf16.msra.mxu1 %v7955_v45 }
 0xaed   :  { %4375 = vmatprep.subr.bf16.mxu0 %v7959_v46  ;;  %4416 = vmatprep.subr.bf16.mxu1 %v7961_v47  ;;  %v4157_v46 = vrot.slane %v8086_v3, 6  ;;  %v8159_v3 = vld [vmem:[#allocation6 + $0x140] ss:$16 sps:$4 sm:$0xff]  }
 0xaf0   :  { %4376 = vmatpush1.bf16.msra.mxu0 %v7965_v48  ;;  %4417 = vmatpush1.bf16.msra.mxu1 %v7967_v49 }
 0xaf1   :  { %4683 = vmatprep.subr.bf16.mxu0 %v8131_v10  ;;  %4724 = vmatprep.subr.bf16.mxu1 %v8133_v28 }
 0xba6   :  { %v4073_v59 = vpop.f32.mrb[48].mxu0  ;;  %v4114_v30 = vpop.f32.mrb[48].mxu1 }
 0xba7   :  { %v4125_v63 = vrot.slane %v4073_v59, 4  ;;  %v4075_v27 = vpop.f32.mrb[49].mxu0  ;;  %v4116_v56 = vpop.f32.mrb[49].mxu1  ;;  %v4127_v17 = vrot.slane %v4114_v30, 4  ;;  %v8177_v59 = vld [vmem:[#allocation6 + $0x184] ss:$16 sps:$4 sm:$0xff]  }
 0xba8   :  { %v4126_v16 = vrot.slane %v4075_v27, 4  ;;  %v4077_v2 = vpop.f32.mrb[50].mxu0  ;;  %v4118_v37 = vpop.f32.mrb[50].mxu1  ;;  %v4128_v18 = vrot.slane %v4116_v56, 4  ;;  %v8181_v30 = vld [vmem:[#allocation6 + $0x180] ss:$16 sps:$4 sm:$0xff]  }
 0xba9   :  { %v4133_v34 = vadd.f32 %v4125_v63, %v8029_v1  ;;  %v4078_v32 = vpop.f32.mrb[51].mxu0  ;;  %v4119_v6 = vpop.f32.mrb[51].mxu1  ;;  %v4135_v5 = vadd.f32 %v4127_v17, %v8038_v25  ;;  %v8183_v63 = vld [vmem:[#allocation6 + $0x188] ss:$16 sps:$4 sm:$0xff]   ;;  %v8185_v27 = vld [vmem:[#allocation6 + $0x18c] ss:$16 sps:$4 sm:$0xff]  }
 0xbaa   :  { %v4134_v7 = vadd.f32 %v4126_v16, %v8031_v26  ;;  %v4136_v15 = vadd.f32 %v4128_v18, %v8035_v22  ;;  %v8188_v56 = vld [vmem:[#allocation6 + $0x1a4] ss:$16 sps:$4 sm:$0xff]   ;;  %v8190_v16 = vld [vmem:[#allocation6 + $0x1ac] ss:$16 sps:$4 sm:$0xff]   ;;  %v8195_v2 = vld [vmem:[#allocation6 + $0x1a0] ss:$16 sps:$4 sm:$0xff]  }
 0xbab   :  { %v6409_v12 = vmul.f32 -1.442695, %v4133_v34  ;;  %v8197_v37 = vld [vmem:[#allocation6 + $0x1a8] ss:$16 sps:$4 sm:$0xff]   ;;  %v8201_v34 = vld [vmem:[#allocation6 + $0x1c4] ss:$16 sps:$4 sm:$0xff]  }
 0xbac   :  { %v6410_v14 = vmul.f32 -1.442695, %v4134_v7  ;;  %v6411_v20 = vmul.f32 -1.442695, %v4136_v15  ;;  %v8203_v32 = vld [vmem:[#allocation6 + $0x1cc] ss:$16 sps:$4 sm:$0xff]  }
 0xbad   :  { %7084 = vpow2.f32 %v6409_v12  ;;  %v8207_v6 = vld [vmem:[#allocation6 + $0x1c0] ss:$16 sps:$4 sm:$0xff]   ;;  %v8209_v7 = vld [vmem:[#allocation6 + $0x1c8] ss:$16 sps:$4 sm:$0xff]   ;;  %v8213_v12 = vld [vmem:[#allocation6 + $0x1e4] ss:$16 sps:$4 sm:$0xff]  }
 0xbae   :  { %7086 = vpow2.f32 %v6410_v14  ;;  %v8215_v14 = vld [vmem:[#allocation6 + $0x1ec] ss:$16 sps:$4 sm:$0xff]   ;;  %v8219_v18 = vld [vmem:[#allocation6 + $0x1e0] ss:$16 sps:$4 sm:$0xff]   ;;  %v8221_v15 = vld [vmem:[#allocation6 + $0x1e8] ss:$16 sps:$4 sm:$0xff]  }
 0xbaf   :  { %7088 = vpow2.f32 %v6411_v20 }
 0xbb0   :  { %7090 = vtanh.f32 %v4135_v5 }
 0xbb7   :  { %v7085_v35 = vpop.eup %7084 }
 0xbb8   :  { %v7087_v40 = vpop.eup %7086  ;;  %v4140_v41 = vadd.f32 1.0, %v7085_v35 }
 0xbb9   :  { %v4146_v42 = vadd.f32 1.0, %v7087_v40  ;;  %v7089_v43 = vpop.eup %7088 }
 0xbba   :  { %7092 = vrcp.f32 %v4140_v41  ;;  %v7091_v44 = vpop.eup %7090  ;;  %v4153_v49 = vadd.f32 1.0, %v7089_v43 }
 0xbbb   :  { %7094 = vrcp.f32 %v4146_v42 }
 0xbbc   :  { %7096 = vrcp.f32 %v4153_v49 }
 0xbc4   :  { %v7093_v45 = vpop.eup %7092 }
 0xbc5   :  { %v7095_v47 = vpop.eup %7094  ;;  %v4160_v48 = vmul.f32 %v7093_v45, %v7091_v44 }
 0xbc6   :  { %v4159_v57 = vmul.f32 %v7095_v47, %v4157_v46  ;;  %v7097_v39 = vpop.eup %7096 }
 0xbc8   :  { %v8126_v38 = vadd.f32 %v4160_v48, %v4159_v57 }
 0xbca   :  { %7098 = vtanh.f32 %v8126_v38 }
 0xbd4   :  { %v7099_v50 = vpop.eup %7098 }
 0xbd5   :  { %v4163_v51 = vmul.f32 %v7099_v50, %v7097_v39 }
 0xbd7   :  { %4164 = vst [vmem:[#allocation2] sm:$0x30] %v4163_v51  ;;  %v4165_v52 = vpack.c.bf16 %v4163_v51, %v4163_v51 }
 0xbd9   :  { %v4199_v4 = vrot.slane %v4165_v52, 2 }
 0xbdb   :  { %4394 = vmatmul.mubr.bf16.vlgmr.msra.gmra.mrb[52].mxu0 %v4199_v4  ;;  %4435 = vmatmul.mubr.bf16.vlgmr.msra.gmra.mrb[52].mxu1 %v4199_v4 }
 0xbdc   :  { %4715 = vmatprep.mubr.bf16.mxu0 %v7280_v0  ;;  %4756 = vmatprep.mubr.bf16.mxu1 %v7280_v0 }
 0xbdd   :  { %4684 = vmatpush1.bf16.msra.mxu0 %v8135_v19  ;;  %4725 = vmatpush1.bf16.msra.mxu1 %v8137_v36 }
 0xbde   :  { %4685 = vmatprep.subr.bf16.mxu0 %v8143_v58  ;;  %4726 = vmatprep.subr.bf16.mxu1 %v8145_v55 }
 0xbe1   :  { %4686 = vmatpush1.bf16.msra.mxu0 %v8147_v31  ;;  %4727 = vmatpush1.bf16.msra.mxu1 %v8149_v8 }
 0xbe2   :  { %4687 = vmatprep.subr.bf16.mxu0 %v8155_v60  ;;  %4728 = vmatprep.subr.bf16.mxu1 %v8157_v53 }
 0xbe5   :  { %4688 = vmatpush1.bf16.msra.mxu0 %v8159_v3  ;;  %4729 = vmatpush1.bf16.msra.mxu1 %v8161_v21 }
 0xbe6   :  { %4689 = vmatprep.subr.bf16.mxu0 %v8167_v24  ;;  %4730 = vmatprep.subr.bf16.mxu1 %v8169_v54 }
 0xbe9   :  { %4690 = vmatpush1.bf16.msra.mxu0 %v8171_v33  ;;  %4731 = vmatpush1.bf16.msra.mxu1 %v8173_v62 }
 0xbea   :  { %4691 = vmatprep.subr.bf16.mxu0 %v8177_v59  ;;  %4732 = vmatprep.subr.bf16.mxu1 %v8185_v27 }
 0xbed   :  { %4692 = vmatpush1.bf16.msra.mxu0 %v8181_v30  ;;  %4733 = vmatpush1.bf16.msra.mxu1 %v8183_v63 }
 0xbee   :  { %4693 = vmatprep.subr.bf16.mxu0 %v8188_v56  ;;  %4734 = vmatprep.subr.bf16.mxu1 %v8190_v16 }
 0xbf1   :  { %4694 = vmatpush1.bf16.msra.mxu0 %v8195_v2  ;;  %4735 = vmatpush1.bf16.msra.mxu1 %v8197_v37 }
 0xbf2   :  { %4695 = vmatprep.subr.bf16.mxu0 %v8201_v34  ;;  %4736 = vmatprep.subr.bf16.mxu1 %v8203_v32 }
 0xbf5   :  { %4696 = vmatpush1.bf16.msra.mxu0 %v8207_v6  ;;  %4737 = vmatpush1.bf16.msra.mxu1 %v8209_v7 }
 0xbf6   :  { %4697 = vmatprep.subr.bf16.mxu0 %v8213_v12  ;;  %4738 = vmatprep.subr.bf16.mxu1 %v8215_v14 }
 0xbf9   :  { %4698 = vmatpush1.bf16.msra.mxu0 %v8219_v18  ;;  %4739 = vmatpush1.bf16.msra.mxu1 %v8221_v15 }
 0xbfa   :  { %4990 = vmatprep.subr.bf16.mxu0 %v8131_v10  ;;  %5031 = vmatprep.subr.bf16.mxu1 %v8133_v28 }
 0xcae   :  { %v4395_v17 = vpop.f32.mrb[52].mxu0  ;;  %v4436_v20 = vpop.f32.mrb[52].mxu1 }
 0xcaf   :  { %v4447_v5 = vrot.slane %v4395_v17, 2  ;;  %v4397_v35 = vpop.f32.mrb[53].mxu0  ;;  %v4438_v40 = vpop.f32.mrb[53].mxu1  ;;  %v4449_v50 = vrot.slane %v4436_v20, 2 }
 0xcb0   :  { %v4448_v41 = vrot.slane %v4397_v35, 2  ;;  %v4399_v42 = vpop.f32.mrb[54].mxu0  ;;  %v4440_v43 = vpop.f32.mrb[54].mxu1  ;;  %v4450_v57 = vrot.slane %v4438_v40, 2  ;;  %v4479_v40 = vrot.slane %v8126_v38, 6 }
 0xcb1   :  { %v4455_v44 = vadd.f32 %v4447_v5, %v8029_v1  ;;  %v4400_v45 = vpop.f32.mrb[55].mxu0  ;;  %v4441_v46 = vpop.f32.mrb[55].mxu1  ;;  %v4457_v52 = vadd.f32 %v4449_v50, %v8038_v25 }
 0xcb2   :  { %v4456_v47 = vadd.f32 %v4448_v41, %v8031_v26  ;;  %v4458_v39 = vadd.f32 %v4450_v57, %v8035_v22 }
 0xcb3   :  { %v6444_v48 = vmul.f32 -1.442695, %v4455_v44 }
 0xcb4   :  { %v6445_v49 = vmul.f32 -1.442695, %v4456_v47  ;;  %v6446_v51 = vmul.f32 -1.442695, %v4458_v39 }
 0xcb5   :  { %7100 = vpow2.f32 %v6444_v48 }
 0xcb6   :  { %7102 = vpow2.f32 %v6445_v49 }
 0xcb7   :  { %7104 = vpow2.f32 %v6446_v51 }
 0xcb8   :  { %7106 = vtanh.f32 %v4457_v52 }
 0xcbf   :  { %v7101_v4 = vpop.eup %7100 }
 0xcc0   :  { %v7103_v17 = vpop.eup %7102  ;;  %v4462_v35 = vadd.f32 1.0, %v7101_v4 }
 0xcc1   :  { %v4468_v1 = vadd.f32 1.0, %v7103_v17  ;;  %v7105_v26 = vpop.eup %7104 }
 0xcc2   :  { %7108 = vrcp.f32 %v4462_v35  ;;  %v7107_v5 = vpop.eup %7106  ;;  %v4475_v22 = vadd.f32 1.0, %v7105_v26 }
 0xcc3   :  { %7110 = vrcp.f32 %v4468_v1 }
 0xcc4   :  { %7112 = vrcp.f32 %v4475_v22 }
 0xccc   :  { %v7109_v41 = vpop.eup %7108 }
 0xccd   :  { %v7111_v42 = vpop.eup %7110  ;;  %v4482_v43 = vmul.f32 %v7109_v41, %v7107_v5 }
 0xcce   :  { %v4481_v20 = vmul.f32 %v7111_v42, %v4479_v40  ;;  %v7113_v25 = vpop.eup %7112 }
 0xcd0   :  { %v8234_v44 = vadd.f32 %v4482_v43, %v4481_v20 }
 0xcd2   :  { %7114 = vtanh.f32 %v8234_v44 }
 0xcdc   :  { %v7115_v45 = vpop.eup %7114 }
 0xcdd   :  { %v4485_v46 = vmul.f32 %v7115_v45, %v7113_v25 }
 0xcdf   :  { %4486 = vst [vmem:[#allocation2] sm:$0xc0] %v4485_v46  ;;  %v4487_v47 = vpack.c.bf16 %v4485_v46, %v4485_v46 }
 0xce1   :  { %v4521_v48 = vrot.slane %v4487_v47, 3  ;;  %v4789_v47 = vrot.slane %v8234_v44, 6 }
 0xce3   :  { %4716 = vmatmul.mubr.bf16.vlgmr.msra.gmra.mrb[56].mxu0 %v4521_v48  ;;  %4757 = vmatmul.mubr.bf16.vlgmr.msra.gmra.mrb[56].mxu1 %v4521_v48 }
 0xce4   :  { %4991 = vmatpush1.bf16.msra.mxu0 %v8135_v19  ;;  %5032 = vmatpush1.bf16.msra.mxu1 %v8137_v36 }
 0xce5   :  { %4992 = vmatprep.subr.bf16.mxu0 %v8143_v58  ;;  %5033 = vmatprep.subr.bf16.mxu1 %v8145_v55 }
 0xce6   :  { %5022 = vmatprep.mubr.bf16.mxu0 %v7280_v0  ;;  %5063 = vmatprep.mubr.bf16.mxu1 %v7280_v0 }
 0xce8   :  { %4993 = vmatpush1.bf16.msra.mxu0 %v8147_v31  ;;  %5034 = vmatpush1.bf16.msra.mxu1 %v8149_v8 }
 0xce9   :  { %4994 = vmatprep.subr.bf16.mxu0 %v8155_v60  ;;  %5035 = vmatprep.subr.bf16.mxu1 %v8157_v53 }
 0xcec   :  { %4995 = vmatpush1.bf16.msra.mxu0 %v8159_v3  ;;  %5036 = vmatpush1.bf16.msra.mxu1 %v8161_v21 }
 0xced   :  { %4996 = vmatprep.subr.bf16.mxu0 %v8167_v24  ;;  %5037 = vmatprep.subr.bf16.mxu1 %v8169_v54 }
 0xcf0   :  { %4997 = vmatpush1.bf16.msra.mxu0 %v8171_v33  ;;  %5038 = vmatpush1.bf16.msra.mxu1 %v8173_v62 }
 0xcf1   :  { %4998 = vmatprep.subr.bf16.mxu0 %v8177_v59  ;;  %5039 = vmatprep.subr.bf16.mxu1 %v8185_v27 }
 0xcf4   :  { %4999 = vmatpush1.bf16.msra.mxu0 %v8181_v30  ;;  %5040 = vmatpush1.bf16.msra.mxu1 %v8183_v63 }
 0xcf5   :  { %5000 = vmatprep.subr.bf16.mxu0 %v8188_v56  ;;  %5041 = vmatprep.subr.bf16.mxu1 %v8190_v16 }
 0xcf8   :  { %5001 = vmatpush1.bf16.msra.mxu0 %v8195_v2  ;;  %5042 = vmatpush1.bf16.msra.mxu1 %v8197_v37 }
 0xcf9   :  { %5002 = vmatprep.subr.bf16.mxu0 %v8201_v34  ;;  %5043 = vmatprep.subr.bf16.mxu1 %v8203_v32 }
 0xcfc   :  { %5003 = vmatpush1.bf16.msra.mxu0 %v8207_v6  ;;  %5044 = vmatpush1.bf16.msra.mxu1 %v8209_v7 }
 0xcfd   :  { %5004 = vmatprep.subr.bf16.mxu0 %v8213_v12  ;;  %5045 = vmatprep.subr.bf16.mxu1 %v8215_v14 }
 0xd00   :  { %5005 = vmatpush1.bf16.msra.mxu0 %v8219_v18  ;;  %5046 = vmatpush1.bf16.msra.mxu1 %v8221_v15 }
 0xd01   :  { %5312 = vmatprep.subr.bf16.mxu0 %v8131_v10  ;;  %5353 = vmatprep.subr.bf16.mxu1 %v8133_v28 }
 0xdb6   :  { %v4717_v38 = vpop.f32.mrb[56].mxu0  ;;  %v4758_v49 = vpop.f32.mrb[56].mxu1 }
 0xdb7   :  { %v4765_v57 = vadd.f32 %v4717_v38, %v8021_v23  ;;  %v4719_v39 = vpop.f32.mrb[57].mxu0  ;;  %v4760_v50 = vpop.f32.mrb[57].mxu1  ;;  %v4767_v40 = vadd.f32 %v4758_v49, %v8023_v11 }
 0xdb8   :  { %v4766_v51 = vadd.f32 %v4719_v39, %v8025_v29  ;;  %v4721_v52 = vpop.f32.mrb[58].mxu0  ;;  %v4762_v4 = vpop.f32.mrb[58].mxu1  ;;  %v4768_v5 = vadd.f32 %v4760_v50, %v8027_v61 }
 0xdb9   :  { %v6479_v17 = vmul.f32 -1.442695, %v4765_v57  ;;  %v4722_v35 = vpop.f32.mrb[59].mxu0  ;;  %v4763_v1 = vpop.f32.mrb[59].mxu1 }
 0xdba   :  { %v6480_v26 = vmul.f32 -1.442695, %v4766_v51  ;;  %v6481_v41 = vmul.f32 -1.442695, %v4768_v5 }
 0xdbb   :  { %7116 = vpow2.f32 %v6479_v17 }
 0xdbc   :  { %7118 = vpow2.f32 %v6480_v26 }
 0xdbd   :  { %7120 = vpow2.f32 %v6481_v41 }
 0xdbe   :  { %7122 = vtanh.f32 %v4767_v40 }
 0xdc5   :  { %v7117_v42 = vpop.eup %7116 }
 0xdc6   :  { %v7119_v43 = vpop.eup %7118  ;;  %v4772_v22 = vadd.f32 1.0, %v7117_v42 }
 0xdc7   :  { %v4778_v20 = vadd.f32 1.0, %v7119_v43  ;;  %v7121_v25 = vpop.eup %7120 }
 0xdc8   :  { %7124 = vrcp.f32 %v4772_v22  ;;  %v7123_v45 = vpop.eup %7122  ;;  %v4785_v57 = vadd.f32 1.0, %v7121_v25 }
 0xdc9   :  { %7126 = vrcp.f32 %v4778_v20 }
 0xdca   :  { %7128 = vrcp.f32 %v4785_v57 }
 0xdd2   :  { %v7125_v46 = vpop.eup %7124 }
 0xdd3   :  { %v7127_v48 = vpop.eup %7126  ;;  %v4792_v38 = vmul.f32 %v7125_v46, %v7123_v45 }
 0xdd4   :  { %v4791_v39 = vmul.f32 %v7127_v48, %v4789_v47  ;;  %v7129_v49 = vpop.eup %7128 }
 0xdd6   :  { %v8276_v50 = vadd.f32 %v4792_v38, %v4791_v39 }
 0xdd8   :  { %7130 = vtanh.f32 %v8276_v50 }
 0xde2   :  { %v7131_v51 = vpop.eup %7130 }
 0xde3   :  { %v4795_v52 = vmul.f32 %v7131_v51, %v7129_v49 }
 0xde5   :  { %4796 = vst [vmem:[#allocation2 + $0x8] sm:$0x3] %v4795_v52  ;;  %v4797_v4 = vpack.c.bf16 %v4795_v52, %v4795_v52 }
 0xde7   :  { %5023 = vmatmul.mubr.bf16.vlgmr.msra.gmra.mrb[60].mxu0 %v4797_v4  ;;  %5064 = vmatmul.mubr.bf16.vlgmr.msra.gmra.mrb[60].mxu1 %v4797_v4 }
 0xde8   :  { %5313 = vmatpush1.bf16.msra.mxu0 %v8135_v19  ;;  %5354 = vmatpush1.bf16.msra.mxu1 %v8137_v36 }
 0xde9   :  { %5314 = vmatprep.subr.bf16.mxu0 %v8143_v58  ;;  %5355 = vmatprep.subr.bf16.mxu1 %v8145_v55 }
 0xdea   :  { %5344 = vmatprep.mubr.bf16.mxu0 %v7280_v0  ;;  %5385 = vmatprep.mubr.bf16.mxu1 %v7280_v0 }
 0xdec   :  { %5315 = vmatpush1.bf16.msra.mxu0 %v8147_v31  ;;  %5356 = vmatpush1.bf16.msra.mxu1 %v8149_v8 }
 0xded   :  { %5316 = vmatprep.subr.bf16.mxu0 %v8155_v60  ;;  %5357 = vmatprep.subr.bf16.mxu1 %v8157_v53 }
 0xdf0   :  { %5317 = vmatpush1.bf16.msra.mxu0 %v8159_v3  ;;  %5358 = vmatpush1.bf16.msra.mxu1 %v8161_v21 }
 0xdf1   :  { %5318 = vmatprep.subr.bf16.mxu0 %v8167_v24  ;;  %5359 = vmatprep.subr.bf16.mxu1 %v8169_v54 }
 0xdf4   :  { %5319 = vmatpush1.bf16.msra.mxu0 %v8171_v33  ;;  %5360 = vmatpush1.bf16.msra.mxu1 %v8173_v62 }
 0xdf5   :  { %5320 = vmatprep.subr.bf16.mxu0 %v8177_v59  ;;  %5361 = vmatprep.subr.bf16.mxu1 %v8185_v27 }
 0xdf8   :  { %5321 = vmatpush1.bf16.msra.mxu0 %v8181_v30  ;;  %5362 = vmatpush1.bf16.msra.mxu1 %v8183_v63 }
 0xdf9   :  { %5322 = vmatprep.subr.bf16.mxu0 %v8188_v56  ;;  %5363 = vmatprep.subr.bf16.mxu1 %v8190_v16 }
 0xdfc   :  { %5323 = vmatpush1.bf16.msra.mxu0 %v8195_v2  ;;  %5364 = vmatpush1.bf16.msra.mxu1 %v8197_v37 }
 0xdfd   :  { %5324 = vmatprep.subr.bf16.mxu0 %v8201_v34  ;;  %5365 = vmatprep.subr.bf16.mxu1 %v8203_v32 }
 0xe00   :  { %5325 = vmatpush1.bf16.msra.mxu0 %v8207_v6  ;;  %5366 = vmatpush1.bf16.msra.mxu1 %v8209_v7 }
 0xe01   :  { %5326 = vmatprep.subr.bf16.mxu0 %v8213_v12  ;;  %5367 = vmatprep.subr.bf16.mxu1 %v8215_v14 }
 0xe04   :  { %5327 = vmatpush1.bf16.msra.mxu0 %v8219_v18  ;;  %5368 = vmatpush1.bf16.msra.mxu1 %v8221_v15 }
 0xe05   :  { %5634 = vmatprep.subr.bf16.mxu0 %v8131_v10  ;;  %5675 = vmatprep.subr.bf16.mxu1 %v8133_v28 }
 0xeba   :  { %v5024_v44 = vpop.f32.mrb[60].mxu0  ;;  %v5065_v17 = vpop.f32.mrb[60].mxu1 }
 0xebb   :  { %v5076_v35 = vrot.slane %v5024_v44, 6  ;;  %v5026_v1 = vpop.f32.mrb[61].mxu0  ;;  %v5067_v26 = vpop.f32.mrb[61].mxu1  ;;  %v5078_v28 = vrot.slane %v5065_v17, 6  ;;  %v5108_v44 = vrot.slane %v8276_v50, 6 }
 0xebc   :  { %v5077_v5 = vrot.slane %v5026_v1, 6  ;;  %v5028_v41 = vpop.f32.mrb[62].mxu0  ;;  %v5069_v40 = vpop.f32.mrb[62].mxu1  ;;  %v5079_v46 = vrot.slane %v5067_v26, 6 }
 0xebd   :  { %v5084_v42 = vadd.f32 %v5076_v35, %v8021_v23  ;;  %v5029_v43 = vpop.f32.mrb[63].mxu0  ;;  %v5070_v22 = vpop.f32.mrb[63].mxu1  ;;  %v5086_v48 = vadd.f32 %v5078_v28, %v8023_v11 }
 0xebe   :  { %v5085_v20 = vadd.f32 %v5077_v5, %v8025_v29  ;;  %v5087_v10 = vadd.f32 %v5079_v46, %v8027_v61 }
 0xebf   :  { %v6514_v25 = vmul.f32 -1.442695, %v5084_v42 }
 0xec0   :  { %v6515_v45 = vmul.f32 -1.442695, %v5085_v20  ;;  %v6516_v47 = vmul.f32 -1.442695, %v5087_v10 }
 0xec1   :  { %7132 = vpow2.f32 %v6514_v25 }
 0xec2   :  { %7134 = vpow2.f32 %v6515_v45 }
 0xec3   :  { %7136 = vpow2.f32 %v6516_v47  ;;  %v6902_v47 = vld [vmem:[%s8469_s6 + $0x4] ss:$8 sps:$4 sm:$0xff]  }
 0xec4   :  { %7138 = vtanh.f32 %v5086_v48  ;;  %v6900_v48 = vld [vmem:[%s8469_s6] ss:$8 sps:$4 sm:$0xff]  }
 0xecb   :  { %v7133_v38 = vpop.eup %7132 }
 0xecc   :  { %v7135_v57 = vpop.eup %7134  ;;  %v5091_v39 = vadd.f32 1.0, %v7133_v38  ;;  %v6905_v38 = vld [vmem:[%s8469_s6 + $0x14] ss:$8 sps:$4 sm:$0xff]  }
 0xecd   :  { %v5097_v49 = vadd.f32 1.0, %v7135_v57  ;;  %v7137_v51 = vpop.eup %7136  ;;  %v6903_v57 = vld [vmem:[%s8469_s6 + $0x10] ss:$8 sps:$4 sm:$0xff]  }
 0xece   :  { %7140 = vrcp.f32 %v5091_v39  ;;  %v7139_v52 = vpop.eup %7138  ;;  %v5104_v26 = vadd.f32 1.0, %v7137_v51  ;;  %v6906_v39 = vld [vmem:[%s8469_s6 + $0x20] ss:$8 sps:$4 sm:$0xff]   ;;  %v6909_v51 = vld [vmem:[%s8469_s6 + $0x30] ss:$8 sps:$4 sm:$0xff]  }
 0xecf   :  { %7142 = vrcp.f32 %v5097_v49  ;;  %v6911_v49 = vld [vmem:[%s8469_s6 + $0x34] ss:$8 sps:$4 sm:$0xff]  }
 0xed0   :  { %7144 = vrcp.f32 %v5104_v26  ;;  %v6920_v26 = vld [vmem:[%s8469_s6 + $0x64] ss:$8 sps:$4 sm:$0xff]  }
 0xed8   :  { %v7141_v4 = vpop.eup %7140 }
 0xed9   :  { %v7143_v35 = vpop.eup %7142  ;;  %v5111_v1 = vmul.f32 %v7141_v4, %v7139_v52  ;;  %v6914_v52 = vld [vmem:[%s8469_s6 + $0x44] ss:$8 sps:$4 sm:$0xff]   ;;  %v6912_v4 = vld [vmem:[%s8469_s6 + $0x40] ss:$8 sps:$4 sm:$0xff]  }
 0xeda   :  { %v5110_v17 = vmul.f32 %v7143_v35, %v5108_v44  ;;  %v7145_v41 = vpop.eup %7144  ;;  %v6917_v44 = vld [vmem:[%s8469_s6 + $0x54] ss:$8 sps:$4 sm:$0xff]   ;;  %v6915_v35 = vld [vmem:[%s8469_s6 + $0x50] ss:$8 sps:$4 sm:$0xff]  }
 0xedc   :  { %v8318_v5 = vadd.f32 %v5111_v1, %v5110_v17  ;;  %v6918_v1 = vld [vmem:[%s8469_s6 + $0x60] ss:$8 sps:$4 sm:$0xff]   ;;  %v6923_v17 = vld [vmem:[%s8469_s6 + $0x74] ss:$8 sps:$4 sm:$0xff]  }
 0xede   :  { %7146 = vtanh.f32 %v8318_v5 }
 0xee8   :  { %v7147_v40 = vpop.eup %7146 }
 0xee9   :  { %v5114_v42 = vmul.f32 %v7147_v40, %v7145_v41 }
 0xeeb   :  { %5115 = vst [vmem:[#allocation2 + $0x8] sm:$0xc] %v5114_v42  ;;  %v5116_v43 = vpack.c.bf16 %v5114_v42, %v5114_v42 }
 0xeed   :  { %v5150_v22 = vrot.slane %v5116_v43, 1 }
 0xeef   :  { %5345 = vmatmul.mubr.bf16.vlgmr.msra.gmra.mrb[64].mxu0 %v5150_v22  ;;  %5386 = vmatmul.mubr.bf16.vlgmr.msra.gmra.mrb[64].mxu1 %v5150_v22 }
 0xef0   :  { %5635 = vmatpush1.bf16.msra.mxu0 %v8135_v19  ;;  %5676 = vmatpush1.bf16.msra.mxu1 %v8137_v36 }
 0xef1   :  { %5636 = vmatprep.subr.bf16.mxu0 %v8143_v58  ;;  %5677 = vmatprep.subr.bf16.mxu1 %v8145_v55 }
 0xef2   :  { %5666 = vmatprep.mubr.bf16.mxu0 %v7280_v0  ;;  %5707 = vmatprep.mubr.bf16.mxu1 %v7280_v0 }
 0xef4   :  { %5637 = vmatpush1.bf16.msra.mxu0 %v8147_v31  ;;  %5678 = vmatpush1.bf16.msra.mxu1 %v8149_v8 }
 0xef5   :  { %5638 = vmatprep.subr.bf16.mxu0 %v8155_v60  ;;  %5679 = vmatprep.subr.bf16.mxu1 %v8157_v53 }
 0xef8   :  { %5639 = vmatpush1.bf16.msra.mxu0 %v8159_v3  ;;  %5680 = vmatpush1.bf16.msra.mxu1 %v8161_v21 }
 0xef9   :  { %5640 = vmatprep.subr.bf16.mxu0 %v8167_v24  ;;  %5681 = vmatprep.subr.bf16.mxu1 %v8169_v54 }
 0xefc   :  { %5641 = vmatpush1.bf16.msra.mxu0 %v8171_v33  ;;  %5682 = vmatpush1.bf16.msra.mxu1 %v8173_v62 }
 0xefd   :  { %5642 = vmatprep.subr.bf16.mxu0 %v8177_v59  ;;  %5683 = vmatprep.subr.bf16.mxu1 %v8185_v27 }
 0xf00   :  { %5643 = vmatpush1.bf16.msra.mxu0 %v8181_v30  ;;  %5684 = vmatpush1.bf16.msra.mxu1 %v8183_v63 }
 0xf01   :  { %5644 = vmatprep.subr.bf16.mxu0 %v8188_v56  ;;  %5685 = vmatprep.subr.bf16.mxu1 %v8190_v16 }
 0xf04   :  { %5645 = vmatpush1.bf16.msra.mxu0 %v8195_v2  ;;  %5686 = vmatpush1.bf16.msra.mxu1 %v8197_v37 }
 0xf05   :  { %5646 = vmatprep.subr.bf16.mxu0 %v8201_v34  ;;  %5687 = vmatprep.subr.bf16.mxu1 %v8203_v32 }
 0xf08   :  { %5647 = vmatpush1.bf16.msra.mxu0 %v8207_v6  ;;  %5688 = vmatpush1.bf16.msra.mxu1 %v8209_v7 }
 0xf09   :  { %5648 = vmatprep.subr.bf16.mxu0 %v8213_v12  ;;  %5689 = vmatprep.subr.bf16.mxu1 %v8215_v14  ;;  %v5430_v12 = vrot.slane %v8318_v5, 6  ;;  %v6921_v5 = vld [vmem:[%s8469_s6 + $0x70] ss:$8 sps:$4 sm:$0xff]  }
 0xf0c   :  { %5649 = vmatpush1.bf16.msra.mxu0 %v8219_v18  ;;  %5690 = vmatpush1.bf16.msra.mxu1 %v8221_v15 }
 0xf0d   :  { %5875 = vmatprep.subr.bf16.mxu0 %v6902_v47 }
 0xfc2   :  { %v5346_v19 = vpop.f32.mrb[64].mxu0  ;;  %v5387_v36 = vpop.f32.mrb[64].mxu1 }
 0xfc3   :  { %v5398_v58 = vrot.slane %v5346_v19, 4  ;;  %v5348_v55 = vpop.f32.mrb[65].mxu0  ;;  %v5389_v31 = vpop.f32.mrb[65].mxu1  ;;  %v5400_v63 = vrot.slane %v5387_v36, 4 }
 0xfc4   :  { %v5399_v8 = vrot.slane %v5348_v55, 4  ;;  %v5350_v60 = vpop.f32.mrb[66].mxu0  ;;  %v5391_v53 = vpop.f32.mrb[66].mxu1  ;;  %v5401_v59 = vrot.slane %v5389_v31, 4 }
 0xfc5   :  { %v5406_v3 = vadd.f32 %v5398_v58, %v8021_v23  ;;  %v5351_v21 = vpop.f32.mrb[67].mxu0  ;;  %v5392_v24 = vpop.f32.mrb[67].mxu1  ;;  %v5408_v56 = vadd.f32 %v5400_v63, %v8023_v11 }
 0xfc6   :  { %v5407_v54 = vadd.f32 %v5399_v8, %v8025_v29  ;;  %v5409_v30 = vadd.f32 %v5401_v59, %v8027_v61 }
 0xfc7   :  { %v6549_v33 = vmul.f32 -1.442695, %v5406_v3 }
 0xfc8   :  { %v6550_v62 = vmul.f32 -1.442695, %v5407_v54  ;;  %v6551_v27 = vmul.f32 -1.442695, %v5409_v30 }
 0xfc9   :  { %7148 = vpow2.f32 %v6549_v33 }
 0xfca   :  { %7150 = vpow2.f32 %v6550_v62 }
 0xfcb   :  { %7152 = vpow2.f32 %v6551_v27 }
 0xfcc   :  { %7154 = vtanh.f32 %v5408_v56 }
 0xfd3   :  { %v7149_v16 = vpop.eup %7148 }
 0xfd4   :  { %v7151_v2 = vpop.eup %7150  ;;  %v5413_v37 = vadd.f32 1.0, %v7149_v16 }
 0xfd5   :  { %v5419_v34 = vadd.f32 1.0, %v7151_v2  ;;  %v7153_v32 = vpop.eup %7152 }
 0xfd6   :  { %7156 = vrcp.f32 %v5413_v37  ;;  %v7155_v6 = vpop.eup %7154  ;;  %v5426_v15 = vadd.f32 1.0, %v7153_v32 }
 0xfd7   :  { %7158 = vrcp.f32 %v5419_v34 }
 0xfd8   :  { %7160 = vrcp.f32 %v5426_v15 }
 0xfe0   :  { %v7157_v7 = vpop.eup %7156 }
 0xfe1   :  { %v7159_v14 = vpop.eup %7158  ;;  %v5433_v18 = vmul.f32 %v7157_v7, %v7155_v6 }
 0xfe2   :  { %v5432_v50 = vmul.f32 %v7159_v14, %v5430_v12  ;;  %v7161_v25 = vpop.eup %7160  ;;  %v5764_v12 = vld [vmem:[#allocation2] sm:$0xff] }
 0xfe4   :  { %v8358_v20 = vadd.f32 %v5433_v18, %v5432_v50 }
 0xfe6   :  { %7162 = vtanh.f32 %v8358_v20  ;;  %v5752_v16 = vrot.slane %v8358_v20, 6 }
 0xff0   :  { %v7163_v45 = vpop.eup %7162 }
 0xff1   :  { %v5436_v46 = vmul.f32 %v7163_v45, %v7161_v25 }
 0xff3   :  { %5437 = vst [vmem:[#allocation2 + $0x8] sm:$0x30] %v5436_v46  ;;  %v5438_v10 = vpack.c.bf16 %v5436_v46, %v5436_v46 }
 0xff5   :  { %v5472_v28 = vrot.slane %v5438_v10, 2 }
 0xff7   :  { %5667 = vmatmul.mubr.bf16.vlgmr.msra.gmra.mrb[68].mxu0 %v5472_v28  ;;  %5708 = vmatmul.mubr.bf16.vlgmr.msra.gmra.mrb[68].mxu1 %v5472_v28 }
 0xff8   :  { %5907 = vmatprep.mubr.bf16.mxu0 %v7280_v0  ;;  %5876 = vmatpush1.bf16.msra.mxu0 %v6900_v48  ;;  %v6908_v0 = vld [vmem:[%s8469_s6 + $0x24] ss:$8 sps:$4 sm:$0xff]   ;;  %s7281_s6 = smov [#allocation8]  }
 0xff9   :  { %5877 = vmatprep.subr.bf16.mxu0 %v6905_v38  ;;  %s5929_s16 = sshll.u32 %s7281_s6, 4  ;;  %s5930_s16 = int_to_ptr.vmem [resolvable:$true] %s5929_s16 }
 0xffa   :  { %s7224_s14 = scalar_lea.vmem %s5930_s16, 64  ;;  %p7229_p3 = scmp.lt.s32.totalorder %s5930_s16, %s5930_s16 }
 0xffb   :  { %p7225_p2 = scmp.ne.s32.totalorder %s5930_s16, %s7224_s14  ;;  %p7230_p4 = scmp.lt.s32.totalorder %s7224_s14, %s7224_s14 }
 0xffc   :  { %5878 = vmatpush1.bf16.msra.mxu0 %v6903_v57 }
 0xffd   :  { %5879 = vmatprep.subr.bf16.mxu0 %v6908_v0  ;;  %p7231_p5 = por %p7230_p4, %p7229_p3 }
 0xfff   :  { %p7232_p6 = pnand %p7231_p5, %p7225_p2 }
0x1000   :  { %5880 = vmatpush1.bf16.msra.mxu0 %v6906_v39 }
0x1001   :  { %5881 = vmatprep.subr.bf16.mxu0 %v6911_v49 }
0x1004   :  { %5882 = vmatpush1.bf16.msra.mxu0 %v6909_v51 }
0x1005   :  { %5883 = vmatprep.subr.bf16.mxu0 %v6914_v52 }
0x1008   :  { %5884 = vmatpush1.bf16.msra.mxu0 %v6912_v4 }
0x1009   :  { %5885 = vmatprep.subr.bf16.mxu0 %v6917_v44 }
0x100c   :  { %5886 = vmatpush1.bf16.msra.mxu0 %v6915_v35 }
0x100d   :  { %5887 = vmatprep.subr.bf16.mxu0 %v6920_v26 }
0x1010   :  { %5888 = vmatpush1.bf16.msra.mxu0 %v6918_v1 }
0x1011   :  { %5889 = vmatprep.subr.bf16.mxu0 %v6923_v17 }
0x1014   :  { %5890 = vmatpush1.bf16.msra.mxu0 %v6921_v5 }
0x10ca   :  { %v5668_v41 = vpop.f32.mrb[68].mxu0  ;;  %v5709_v40 = vpop.f32.mrb[68].mxu1 }
0x10cb   :  { %v5720_v42 = vrot.slane %v5668_v41, 2  ;;  %v5670_v43 = vpop.f32.mrb[69].mxu0  ;;  %v5711_v22 = vpop.f32.mrb[69].mxu1  ;;  %v5722_v54 = vrot.slane %v5709_v40, 2 }
0x10cc   :  { %v5721_v19 = vrot.slane %v5670_v43, 2  ;;  %v5672_v36 = vpop.f32.mrb[70].mxu0  ;;  %v5713_v58 = vpop.f32.mrb[70].mxu1  ;;  %v5723_v21 = vrot.slane %v5711_v22, 2 }
0x10cd   :  { %v5728_v55 = vadd.f32 %v5720_v42, %v8021_v23  ;;  %v5673_v31 = vpop.f32.mrb[71].mxu0  ;;  %v5714_v8 = vpop.f32.mrb[71].mxu1  ;;  %v5730_v62 = vadd.f32 %v5722_v54, %v8023_v11 }
0x10ce   :  { %v5729_v60 = vadd.f32 %v5721_v19, %v8025_v29  ;;  %v5731_v24 = vadd.f32 %v5723_v21, %v8027_v61 }
0x10cf   :  { %v6584_v53 = vmul.f32 -1.442695, %v5728_v55 }
0x10d0   :  { %v6585_v3 = vmul.f32 -1.442695, %v5729_v60  ;;  %v6586_v33 = vmul.f32 -1.442695, %v5731_v24 }
0x10d1   :  { %7164 = vpow2.f32 %v6584_v53 }
0x10d2   :  { %7166 = vpow2.f32 %v6585_v3 }
0x10d3   :  { %7168 = vpow2.f32 %v6586_v33 }
0x10d4   :  { %7170 = vtanh.f32 %v5730_v62 }
0x10db   :  { %v7165_v59 = vpop.eup %7164 }
0x10dc   :  { %v7167_v30 = vpop.eup %7166  ;;  %v5735_v63 = vadd.f32 1.0, %v7165_v59 }
0x10dd   :  { %v5741_v23 = vadd.f32 1.0, %v7167_v30  ;;  %v7169_v29 = vpop.eup %7168 }
0x10de   :  { %7172 = vrcp.f32 %v5735_v63  ;;  %v7171_v27 = vpop.eup %7170  ;;  %v5748_v61 = vadd.f32 1.0, %v7169_v29 }
0x10df   :  { %7174 = vrcp.f32 %v5741_v23 }
0x10e0   :  { %7176 = vrcp.f32 %v5748_v61 }
0x10e8   :  { %v7173_v56 = vpop.eup %7172 }
0x10e9   :  { %v7175_v2 = vpop.eup %7174  ;;  %v5755_v37 = vmul.f32 %v7173_v56, %v7171_v27 }
0x10ea   :  { %v5754_v34 = vmul.f32 %v7175_v2, %v5752_v16  ;;  %v7177_v11 = vpop.eup %7176 }
0x10ec   :  { %v5756_v32 = vadd.f32 %v5755_v37, %v5754_v34 }
0x10ee   :  { %7178 = vtanh.f32 %v5756_v32  ;;  %5763 = vst [vmem:[#allocation9 - $0x4] sm:$0xc0] %v5756_v32 }
0x10f8   :  { %v7179_v6 = vpop.eup %7178 }
0x10f9   :  { %v5758_v7 = vmul.f32 %v7179_v6, %v7177_v11 }
0x10fb   :  { %5759 = vst [vmem:[#allocation2 + $0x8] sm:$0xc0] %v5758_v7  ;;  %5761 = vst [vmem:[#allocation8 - $0x4] sm:$0xc0] %v5758_v7 }
0x1102   :  { %v5765_v14 = vld [vmem:[#allocation2 + $0x8] sm:$0xff] }
0x1103   :  { %v5766_v18 = vpack.c.bf16 %v5765_v14, %v5764_v12 }
0x1105   :  { %5908 = vmatmul.mubr.bf16.vlgmr.msra.gmra.mrb[72].mxu0 %v5766_v18 }
0x1106   :  { %7235 = shalt.err (!%p7232_p6)
}
0x1107   :  { %s7236_s19 = scalar_lea.hbm %s8472_s9, 64 }
0x1108   :  { %p7237_p7 = scmp.ne.s32.totalorder %s8472_s9, %s7236_s19  ;;  %p7240_p8 = scmp.lt.u32.totalorder %s7236_s19, %s8472_s9 }
0x110a   :  { %p7242_p9 = pnand %p7240_p8, %p7237_p7 }
0x110c   :  { %7245 = shalt.err (!%p7242_p9)
}
0x110d   :  { %s7283_s23 = smov 32   ;;  %s7284_s24 = smov 2  }
0x110e   :  { %5935 = dma.vmem_to_hbm [thread:$0]  %s5930_s16, 64, %s8472_s9, [#allocation5], %s7283_s23, %s7283_s23, %s7284_s24  }
0x110f   :  { %s7246_s27 = scalar_lea.vmem %s8415_s3, 64  ;;  %p7251_p11 = scmp.lt.s32.totalorder %s8415_s3, %s8415_s3 }
0x1110   :  { %p7247_p10 = scmp.ne.s32.totalorder %s8415_s3, %s7246_s27  ;;  %p7252_p12 = scmp.lt.s32.totalorder %s7246_s27, %s7246_s27 }
0x1112   :  { %p7253_p13 = por %p7252_p12, %p7251_p11 }
0x1114   :  { %p7254_p0 = pnand %p7253_p13, %p7247_p10 }
0x1116   :  { %7257 = shalt.err (!%p7254_p0)
}
0x1117   :  { %s7258_s5 = scalar_lea.hbm %s8473_s10, 64 }
0x1118   :  { %p7259_p1 = scmp.ne.s32.totalorder %s8473_s10, %s7258_s5  ;;  %p7262_p2 = scmp.lt.u32.totalorder %s7258_s5, %s8473_s10 }
0x111a   :  { %p7264_p3 = pnand %p7262_p2, %p7259_p1 }
0x111c   :  { %7267 = shalt.err (!%p7264_p3)
}
0x111d   :  { %5947 = dma.vmem_to_hbm [thread:$0]  %s8415_s3, 64, %s8473_s10, [#allocation10], %s7283_s23, %s7283_s23, %s7284_s24  }
0x111e   :  { %v5783_v15 = vld [vmem:[%s8470_s7] sm:$0x3] }
0x111f   :  { %v5788_v50 = vrot.slane %v5783_v15, %v7512_v9  ;;  %v5792_v20 = vrot.slane %v5783_v15, %v7520_v13 }
0x11d8   :  { %v5909_v25 = vpop.f32.mrb[72].mxu0 }
0x11d9   :  { %v5910_v45 = vadd.f32 %v5909_v25, %v5788_v50  ;;  %v5911_v46 = vpop.f32.mrb[73].mxu0 }
0x11da   :  { %v5912_v10 = vadd.f32 %v5911_v46, %v5792_v20  ;;  %v5913_v28 = vpop.f32.mrb[74].mxu0 }
0x11db   :  { %5918 = vst [vmem:[%s8471_s8] sm:$0xff] %v5910_v45  ;;  %v5914_v47 = vadd.f32 %v5913_v28, %v5788_v50  ;;  %v5915_v48 = vpop.f32.mrb[75].mxu0 }
0x11dc   :  { %5919 = vst [vmem:[%s8471_s8 + $0x8] sm:$0xff] %v5912_v10  ;;  %v5916_v38 = vadd.f32 %v5915_v48, %v5792_v20 }
0x11dd   :  { %5920 = vst [vmem:[%s8471_s8 + $0x10] sm:$0xff] %v5914_v47 }
0x11de   :  { %5921 = vst [vmem:[%s8471_s8 + $0x18] sm:$0xff] %v5916_v38 }
0x11df   :  { %7272 = dma.done.wait [#allocation5], 64  }
0x11e0   :  { %7273 = vsyncadd [#allocation5], 4294967232 }
0x11e1   :  { %7274 = dma.done.wait [#allocation10], 64  }
0x11e2   :  { %7275 = vsyncadd [#allocation10], 4294967232 }
0x11e3   :  { %5956 = vsyncpa [#allocation4], 1 }
0x11e4   :  { %5957 = vsyncpa [#allocation7], 1 }
0x11e5   :  { %5958 = vsyncpa [#allocation5], 1 }
0x11e6   :  { %5959 = vsyncpa [#allocation10], 1 }

</bundles_post_ra>
